<compile_context>
chip_gen: v5e
topology: v5e:2x2
jax: 0.10.0
libtpu: 0.0.40
codegen_flags: <defaults>
</compile_context>

<pallas_src>
import functools

import jax
import jax.numpy as jnp
from jax.experimental import pallas as pl
from jax.experimental.pallas import tpu as pltpu

D_IN, H1, H2, ZDIM, K = 784, 512, 256, 20, 20
_HALF_LOG_2PI = 0.9189385332046727  # 0.5 * log(2*pi)


def vae_kernel(x_ref, eps_ref,
               w1_ref, b1_ref, w2_ref, b2_ref, weh_ref, beh_ref,
               wd1_ref, bd1_ref, wd2_ref, bd2_ref, wd3_ref, bd3_ref,
               wtaug_ref, baug_ref, daug_ref, wuhat_ref, uhat_ref,
               recon_ref, kld_ref):
    f32 = jnp.float32
    bf16 = jnp.bfloat16

    # ---------------- encoder: Linear->ReLU->Linear->ReLU ----------------
    x = x_ref[...].astype(bf16)                                          # (TB, 784)
    h = jnp.dot(x, w1_ref[...], preferred_element_type=f32) + b1_ref[...]
    h = jnp.maximum(h, 0.0)
    h = jnp.dot(h.astype(bf16), w2_ref[...], preferred_element_type=f32) + b2_ref[...]
    h = jnp.maximum(h, 0.0)
    # fused mu/logvar head: one (256,40) matmul, split columns
    head = jnp.dot(h.astype(bf16), weh_ref[...], preferred_element_type=f32) + beh_ref[...]
    mu = head[:, :ZDIM]                                                  # (TB, 20)
    logvar = head[:, ZDIM:]                                              # (TB, 20)

    # ---------------- reparameterize + base log-density ----------------
    eps = eps_ref[...]                                                   # (TB, 20) f32
    z0 = mu + eps * jnp.exp(0.5 * logvar)
    # log N(z0; mu, std) summed over dims == -0.5*logvar - c - 0.5*eps^2 summed
    log_q0_z0 = jnp.sum(-0.5 * logvar - _HALF_LOG_2PI - 0.5 * jnp.square(eps),
                        axis=-1, keepdims=True)                          # (TB, 1)

    # ---------------- planar flows (restructured recurrence) ----------------
    # SA[:, :K]  holds  w_j . z_k + b_j  for the current flow state z_k
    # SA[:, K:]  collects t_k = tanh(w_k . z_k + b_k)
    # wtaug = [w^T | 0] (20,2K), baug = [b | 0] (1,2K), daug = [u_hat@w^T | I] (K,2K)
    sa = jnp.dot(z0, wtaug_ref[...], preferred_element_type=f32) + baug_ref[...]  # (TB, 2K)
    for k in range(K):
        t = jnp.tanh(sa[:, k:k + 1])                                     # (TB, 1)
        sa = sa + t * daug_ref[k:k + 1, :]                               # broadcast FMA
    tmat = sa[:, K:]                                                     # (TB, K) = all t_k

    zK = z0 + jnp.dot(tmat, uhat_ref[...], preferred_element_type=f32)   # (TB, 20)
    det = 1.0 + (1.0 - tmat * tmat) * wuhat_ref[...]                     # 1 + psi . u_hat
    sldj = jnp.sum(jnp.log(jnp.abs(det) + 1e-8), axis=-1, keepdims=True)  # (TB, 1)

    # ---------------- densities: log q_K(zK) - log p(zK) ----------------
    log_prior_zK = jnp.sum(-_HALF_LOG_2PI - 0.5 * jnp.square(zK),
                           axis=-1, keepdims=True)                       # (TB, 1)
    # TODO(synk): the reference PlanarFlow source is unseen; we follow the standard
    # change-of-variables convention log q_K = log q0 - sum log|det J| (i.e. the SLDJ
    # the torch module adds is the negative summed log-det).
    kld_ref[...] = (log_q0_z0 - sldj) - log_prior_zK

    # -------- decoder: Linear->ReLU->Linear->ReLU->Linear->sigmoid --------
    d = jnp.dot(zK.astype(bf16), wd1_ref[...], preferred_element_type=f32) + bd1_ref[...]
    d = jnp.maximum(d, 0.0)
    d = jnp.dot(d.astype(bf16), wd2_ref[...], preferred_element_type=f32) + bd2_ref[...]
    d = jnp.maximum(d, 0.0)
    logits = jnp.dot(d.astype(bf16), wd3_ref[...], preferred_element_type=f32) + bd3_ref[...]
    sig = pl.reciprocal(1.0 + jnp.exp(-logits), approx=True)             # sigmoid on EUP path
    recon_ref[...] = sig.astype(recon_ref.dtype)                         # bf16 store


def _round_up(n, m):
    return (n + m - 1) // m * m


def _linear_init(key, fan_in, fan_out):
    """PyTorch-style nn.Linear init: U(-1/sqrt(fan_in), 1/sqrt(fan_in))."""
    kw, kb = jax.random.split(key)
    bound = 1.0 / jnp.sqrt(fan_in)
    w = jax.random.uniform(kw, (fan_in, fan_out), jnp.float32, -bound, bound)
    b = jax.random.uniform(kb, (1, fan_out), jnp.float32, -bound, bound)
    return w, b


def init_params(key):
    ks = jax.random.split(key, 10)
    w1, b1 = _linear_init(ks[0], D_IN, H1)
    w2, b2 = _linear_init(ks[1], H1, H2)
    we1, be1 = _linear_init(ks[2], H2, ZDIM)
    we2, be2 = _linear_init(ks[3], H2, ZDIM)
    wd1, bd1 = _linear_init(ks[4], ZDIM, H2)
    wd2, bd2 = _linear_init(ks[5], H2, H1)
    wd3, bd3 = _linear_init(ks[6], H1, D_IN)
    fu = 0.01 * jax.random.normal(ks[7], (K, ZDIM), jnp.float32)
    fw = 0.01 * jax.random.normal(ks[8], (K, ZDIM), jnp.float32)
    fb = 0.01 * jax.random.normal(ks[9], (K, 1), jnp.float32)
    return (w1, b1, w2, b2, we1, be1, we2, be2,
            wd1, bd1, wd2, bd2, wd3, bd3, fu, fw, fb)


def prepare_params(params):
    """Cast matmul weights to bf16, fuse the mu/logvar heads, and hoist all
    batch-independent planar-flow parameter math out of the kernel."""
    (w1, b1, w2, b2, we1, be1, we2, be2,
     wd1, bd1, wd2, bd2, wd3, bd3, fu, fw, fb) = params
    bf16 = jnp.bfloat16
    f32 = jnp.float32

    we_head = jnp.concatenate([we1, we2], axis=1)                         # (256, 40)
    be_head = jnp.concatenate([be1, be2], axis=1)                         # (1, 40)

    # planar-flow invertibility constraint (u_hat) + derived matrices, once.
    wu = jnp.sum(fw * fu, axis=-1, keepdims=True)                         # (K, 1)
    sp_wu = jnp.maximum(wu, 0.0) + jnp.log1p(jnp.exp(-jnp.abs(wu)))       # stable softplus
    ww = jnp.sum(fw * fw, axis=-1, keepdims=True) + 1e-8                  # eps-guarded
    u_hat = fu + ((sp_wu - 1.0) - wu) * fw / ww                           # (K, 20)
    d_mat = u_hat @ fw.T                                                  # (K, K): d[k,j] = u_hat_k . w_j
    daug = jnp.concatenate([d_mat, jnp.eye(K, dtype=f32)], axis=1)        # (K, 2K)
    wuhat_diag = jnp.sum(fw * u_hat, axis=-1)[None, :]                    # (1, K)  = diag(d_mat)
    wt_aug = jnp.concatenate([fw.T, jnp.zeros((ZDIM, K), f32)], axis=1)   # (20, 2K)
    b_aug = jnp.concatenate([fb.reshape(1, K), jnp.zeros((1, K), f32)], axis=1)  # (1, 2K)

    return (w1.astype(bf16), b1, w2.astype(bf16), b2,
            we_head.astype(bf16), be_head,
            wd1.astype(bf16), bd1, wd2.astype(bf16), bd2, wd3.astype(bf16), bd3,
            wt_aug, b_aug, daug, wuhat_diag, u_hat)


@functools.partial(jax.jit, static_argnames=("tb",))
def vae_forward(x, eps, prepped, tb=1024):
    B = x.shape[0]
    x2 = x.reshape(B, D_IN)                       # == x.view(B, 784), metadata-only

    B16 = _round_up(B, 16)                        # >= 8 sublanes; 16 for bf16 output tiles
    TB = min(tb, B16)
    if B16 // TB < 2 and B16 >= 32:
        TB = _round_up((B16 + 1) // 2, 16)        # >=2 grid steps so both v7x TCs get work
    Bp = _round_up(B16, TB)

    if Bp != B:                                   # only batch-remainder padding; no 784->896
        x2 = jnp.pad(x2, ((0, Bp - B), (0, 0)))
        eps_p = jnp.pad(eps, ((0, Bp - B), (0, 0)))
    else:
        eps_p = eps

    row_map = lambda i: (i, 0)
    const_map = lambda i: (0, 0)
    in_specs = ([pl.BlockSpec((TB, D_IN), row_map),          # x tile (f32, cast in-kernel)
                 pl.BlockSpec((TB, ZDIM), row_map)]          # eps tile
                + [pl.BlockSpec(p.shape, const_map) for p in prepped])   # resident params

    recon, kld = pl.pallas_call(
        vae_kernel,
        out_shape=(jax.ShapeDtypeStruct((Bp, D_IN), jnp.bfloat16),   # bf16 recon: half the HBM writes
                   jax.ShapeDtypeStruct((Bp, 1), jnp.float32)),
        grid=(Bp // TB,),
        in_specs=in_specs,
        out_specs=(pl.BlockSpec((TB, D_IN), row_map),
                   pl.BlockSpec((TB, 1), row_map)),
        compiler_params=pltpu.CompilerParams(
            dimension_semantics=("parallel",),
            vmem_limit_bytes=40 * 1024 * 1024),
    )(x2, eps_p, *prepped)

    if Bp != B:
        recon = recon[:B]
        kld = kld[:B]
    return recon, kld[:, 0]


if __name__ == "__main__":
    key = jax.random.PRNGKey(0)
    kx, keps, kp = jax.random.split(key, 3)
    B = 2
    # MNIST-like input, NCHW as in the PyTorch module.
    x = jax.random.uniform(kx, (B, 1, 28, 28), dtype=jnp.float32)
    # torch.randn_like(std) -> deterministic host-side noise passed into the kernel.
    eps = jax.random.normal(keps, (B, ZDIM), dtype=jnp.float32)
    params = prepare_params(init_params(kp))

    recon, kld_term = vae_forward(x, eps, params)
    jax.block_until_ready((recon, kld_term))

    assert recon.shape == (B, D_IN) and recon.dtype == jnp.bfloat16
    assert kld_term.shape == (B,) and kld_term.dtype == jnp.float32
    assert bool(jnp.all(jnp.isfinite(recon.astype(jnp.float32))))
    assert bool(jnp.all(jnp.isfinite(kld_term)))
    print("KERNEL_OK")
</pallas_src>

<mosaic_0001>
module attributes {stable_mosaic.version = 11 : i64} {
  func.func @vae_kernel(%arg0: i32, %arg1: memref<16x784xf32, #tpu.memory_space<vmem>>, %arg2: memref<16x20xf32, #tpu.memory_space<vmem>>, %arg3: memref<784x512xbf16, #tpu.memory_space<vmem>>, %arg4: memref<1x512xf32, #tpu.memory_space<vmem>>, %arg5: memref<512x256xbf16, #tpu.memory_space<vmem>>, %arg6: memref<1x256xf32, #tpu.memory_space<vmem>>, %arg7: memref<256x40xbf16, #tpu.memory_space<vmem>>, %arg8: memref<1x40xf32, #tpu.memory_space<vmem>>, %arg9: memref<20x256xbf16, #tpu.memory_space<vmem>>, %arg10: memref<1x256xf32, #tpu.memory_space<vmem>>, %arg11: memref<256x512xbf16, #tpu.memory_space<vmem>>, %arg12: memref<1x512xf32, #tpu.memory_space<vmem>>, %arg13: memref<512x784xbf16, #tpu.memory_space<vmem>>, %arg14: memref<1x784xf32, #tpu.memory_space<vmem>>, %arg15: memref<20x40xf32, #tpu.memory_space<vmem>>, %arg16: memref<1x40xf32, #tpu.memory_space<vmem>>, %arg17: memref<20x40xf32, #tpu.memory_space<vmem>>, %arg18: memref<1x20xf32, #tpu.memory_space<vmem>>, %arg19: memref<20x20xf32, #tpu.memory_space<vmem>>, %arg20: memref<16x784xbf16, #tpu.memory_space<vmem>>, %arg21: memref<16x1xf32, #tpu.memory_space<vmem>>) attributes {dimension_semantics = [#tpu.dimension_semantics<parallel>], iteration_bounds = array<i64: 1>, scalar_prefetch = 0 : i64, scratch_operands = 0 : i64, tpu.core_type = #tpu.core_type<tc>, window_params = [{transform_indices = @transform_0, window_bounds = array<i64: 16, 784>}, {transform_indices = @transform_1, window_bounds = array<i64: 16, 20>}, {pipeline_mode = #tpu.pipeline_mode<synchronous>, transform_indices = @transform_2, window_bounds = array<i64: 784, 512>}, {pipeline_mode = #tpu.pipeline_mode<synchronous>, transform_indices = @transform_3, window_bounds = array<i64: 1, 512>}, {pipeline_mode = #tpu.pipeline_mode<synchronous>, transform_indices = @transform_4, window_bounds = array<i64: 512, 256>}, {pipeline_mode = #tpu.pipeline_mode<synchronous>, transform_indices = @transform_5, window_bounds = array<i64: 1, 256>}, {pipeline_mode = #tpu.pipeline_mode<synchronous>, transform_indices = @transform_6, window_bounds = array<i64: 256, 40>}, {pipeline_mode = #tpu.pipeline_mode<synchronous>, transform_indices = @transform_7, window_bounds = array<i64: 1, 40>}, {pipeline_mode = #tpu.pipeline_mode<synchronous>, transform_indices = @transform_8, window_bounds = array<i64: 20, 256>}, {pipeline_mode = #tpu.pipeline_mode<synchronous>, transform_indices = @transform_9, window_bounds = array<i64: 1, 256>}, {pipeline_mode = #tpu.pipeline_mode<synchronous>, transform_indices = @transform_10, window_bounds = array<i64: 256, 512>}, {pipeline_mode = #tpu.pipeline_mode<synchronous>, transform_indices = @transform_11, window_bounds = array<i64: 1, 512>}, {pipeline_mode = #tpu.pipeline_mode<synchronous>, transform_indices = @transform_12, window_bounds = array<i64: 512, 784>}, {pipeline_mode = #tpu.pipeline_mode<synchronous>, transform_indices = @transform_13, window_bounds = array<i64: 1, 784>}, {pipeline_mode = #tpu.pipeline_mode<synchronous>, transform_indices = @transform_14, window_bounds = array<i64: 20, 40>}, {pipeline_mode = #tpu.pipeline_mode<synchronous>, transform_indices = @transform_15, window_bounds = array<i64: 1, 40>}, {pipeline_mode = #tpu.pipeline_mode<synchronous>, transform_indices = @transform_16, window_bounds = array<i64: 20, 40>}, {pipeline_mode = #tpu.pipeline_mode<synchronous>, transform_indices = @transform_17, window_bounds = array<i64: 1, 20>}, {pipeline_mode = #tpu.pipeline_mode<synchronous>, transform_indices = @transform_18, window_bounds = array<i64: 20, 20>}, {transform_indices = @transform_19, window_bounds = array<i64: 16, 784>}, {transform_indices = @transform_20, window_bounds = array<i64: 16, 1>}]} {
    %c0 = arith.constant 0 : index
    %c0_0 = arith.constant 0 : index
    %0 = vector.load %arg1[%c0, %c0_0] : memref<16x784xf32, #tpu.memory_space<vmem>>, vector<16x784xf32>
    %1 = arith.truncf %0 : vector<16x784xf32> to vector<16x784xbf16>
    %c0_1 = arith.constant 0 : index
    %c0_2 = arith.constant 0 : index
    %2 = vector.load %arg3[%c0_1, %c0_2] : memref<784x512xbf16, #tpu.memory_space<vmem>>, vector<784x512xbf16>
    %cst = arith.constant dense<0.000000e+00> : vector<16x512xf32>
    %3 = tpu.matmul %1, %2, %cst {dimension_numbers = #tpu.dot_dimension_numbers<[1], [0], [0], [1], [0, 0, 1, 1], [], []>} : vector<16x784xbf16>, vector<784x512xbf16>, vector<16x512xf32> -> vector<16x512xf32>
    %c0_3 = arith.constant 0 : index
    %c0_4 = arith.constant 0 : index
    %4 = vector.load %arg4[%c0_3, %c0_4] : memref<1x512xf32, #tpu.memory_space<vmem>>, vector<1x512xf32>
    %5 = vector.broadcast %4 : vector<1x512xf32> to vector<16x512xf32>
    %6 = arith.addf %3, %5 : vector<16x512xf32>
    %cst_5 = arith.constant 0.000000e+00 : f32
    %7 = vector.broadcast %cst_5 : f32 to vector<16x512xf32>
    %8 = arith.maximumf %6, %7 : vector<16x512xf32>
    %9 = arith.truncf %8 : vector<16x512xf32> to vector<16x512xbf16>
    %c0_6 = arith.constant 0 : index
    %c0_7 = arith.constant 0 : index
    %10 = vector.load %arg5[%c0_6, %c0_7] : memref<512x256xbf16, #tpu.memory_space<vmem>>, vector<512x256xbf16>
    %cst_8 = arith.constant dense<0.000000e+00> : vector<16x256xf32>
    %11 = tpu.matmul %9, %10, %cst_8 {dimension_numbers = #tpu.dot_dimension_numbers<[1], [0], [0], [1], [0, 0, 1, 1], [], []>} : vector<16x512xbf16>, vector<512x256xbf16>, vector<16x256xf32> -> vector<16x256xf32>
    %c0_9 = arith.constant 0 : index
    %c0_10 = arith.constant 0 : index
    %12 = vector.load %arg6[%c0_9, %c0_10] : memref<1x256xf32, #tpu.memory_space<vmem>>, vector<1x256xf32>
    %13 = vector.broadcast %12 : vector<1x256xf32> to vector<16x256xf32>
    %14 = arith.addf %11, %13 : vector<16x256xf32>
    %cst_11 = arith.constant 0.000000e+00 : f32
    %15 = vector.broadcast %cst_11 : f32 to vector<16x256xf32>
    %16 = arith.maximumf %14, %15 : vector<16x256xf32>
    %17 = arith.truncf %16 : vector<16x256xf32> to vector<16x256xbf16>
    %c0_12 = arith.constant 0 : index
    %c0_13 = arith.constant 0 : index
    %18 = vector.load %arg7[%c0_12, %c0_13] : memref<256x40xbf16, #tpu.memory_space<vmem>>, vector<256x40xbf16>
    %cst_14 = arith.constant dense<0.000000e+00> : vector<16x40xf32>
    %19 = tpu.matmul %17, %18, %cst_14 {dimension_numbers = #tpu.dot_dimension_numbers<[1], [0], [0], [1], [0, 0, 1, 1], [], []>} : vector<16x256xbf16>, vector<256x40xbf16>, vector<16x40xf32> -> vector<16x40xf32>
    %c0_15 = arith.constant 0 : index
    %c0_16 = arith.constant 0 : index
    %20 = vector.load %arg8[%c0_15, %c0_16] : memref<1x40xf32, #tpu.memory_space<vmem>>, vector<1x40xf32>
    %21 = vector.broadcast %20 : vector<1x40xf32> to vector<16x40xf32>
    %22 = arith.addf %19, %21 : vector<16x40xf32>
    %23 = vector.extract_strided_slice %22 {offsets = [0, 0], sizes = [16, 20], strides = [1, 1]} : vector<16x40xf32> to vector<16x20xf32>
    %24 = vector.extract_strided_slice %22 {offsets = [0, 20], sizes = [16, 20], strides = [1, 1]} : vector<16x40xf32> to vector<16x20xf32>
    %c0_17 = arith.constant 0 : index
    %c0_18 = arith.constant 0 : index
    %25 = vector.load %arg2[%c0_17, %c0_18] : memref<16x20xf32, #tpu.memory_space<vmem>>, vector<16x20xf32>
    %cst_19 = arith.constant 5.000000e-01 : f32
    %26 = vector.broadcast %cst_19 : f32 to vector<16x20xf32>
    %27 = arith.mulf %26, %24 : vector<16x20xf32>
    %28 = math.exp %27 : vector<16x20xf32>
    %29 = arith.mulf %25, %28 : vector<16x20xf32>
    %30 = arith.addf %23, %29 : vector<16x20xf32>
    %cst_20 = arith.constant -5.000000e-01 : f32
    %31 = vector.broadcast %cst_20 : f32 to vector<16x20xf32>
    %32 = arith.mulf %31, %24 : vector<16x20xf32>
    %cst_21 = arith.constant 0.918938517 : f32
    %33 = vector.broadcast %cst_21 : f32 to vector<16x20xf32>
    %34 = arith.subf %32, %33 : vector<16x20xf32>
    %35 = arith.mulf %25, %25 : vector<16x20xf32>
    %cst_22 = arith.constant 5.000000e-01 : f32
    %36 = vector.broadcast %cst_22 : f32 to vector<16x20xf32>
    %37 = arith.mulf %36, %35 : vector<16x20xf32>
    %38 = arith.subf %34, %37 : vector<16x20xf32>
    %cst_23 = arith.constant dense<0.000000e+00> : vector<16xf32>
    %39 = vector.multi_reduction <add>, %38, %cst_23 [1] : vector<16x20xf32> to vector<16xf32>
    %40 = vector.shape_cast %39 : vector<16xf32> to vector<16x1xf32>
    %c0_24 = arith.constant 0 : index
    %c0_25 = arith.constant 0 : index
    %41 = vector.load %arg15[%c0_24, %c0_25] : memref<20x40xf32, #tpu.memory_space<vmem>>, vector<20x40xf32>
    %cst_26 = arith.constant dense<0.000000e+00> : vector<16x40xf32>
    %42 = tpu.matmul %30, %41, %cst_26 {dimension_numbers = #tpu.dot_dimension_numbers<[1], [0], [0], [1], [0, 0, 1, 1], [], []>} : vector<16x20xf32>, vector<20x40xf32>, vector<16x40xf32> -> vector<16x40xf32>
    %c0_27 = arith.constant 0 : index
    %c0_28 = arith.constant 0 : index
    %43 = vector.load %arg16[%c0_27, %c0_28] : memref<1x40xf32, #tpu.memory_space<vmem>>, vector<1x40xf32>
    %44 = vector.broadcast %43 : vector<1x40xf32> to vector<16x40xf32>
    %45 = arith.addf %42, %44 : vector<16x40xf32>
    %46 = vector.extract_strided_slice %45 {offsets = [0, 0], sizes = [16, 1], strides = [1, 1]} : vector<16x40xf32> to vector<16x1xf32>
    %47 = math.tanh %46 : vector<16x1xf32>
    %c0_29 = arith.constant 0 : index
    %c0_30 = arith.constant 0 : index
    %48 = vector.load %arg17[%c0_29, %c0_30] : memref<20x40xf32, #tpu.memory_space<vmem>>, vector<1x40xf32>
    %49 = vector.broadcast %47 : vector<16x1xf32> to vector<16x40xf32>
    %50 = vector.broadcast %48 : vector<1x40xf32> to vector<16x40xf32>
    %51 = arith.mulf %49, %50 : vector<16x40xf32>
    %52 = arith.addf %45, %51 : vector<16x40xf32>
    %53 = vector.extract_strided_slice %52 {offsets = [0, 1], sizes = [16, 1], strides = [1, 1]} : vector<16x40xf32> to vector<16x1xf32>
    %54 = math.tanh %53 : vector<16x1xf32>
    %c1 = arith.constant 1 : index
    %c0_31 = arith.constant 0 : index
    %55 = vector.load %arg17[%c1, %c0_31] : memref<20x40xf32, #tpu.memory_space<vmem>>, vector<1x40xf32>
    %56 = vector.broadcast %54 : vector<16x1xf32> to vector<16x40xf32>
    %57 = vector.broadcast %55 : vector<1x40xf32> to vector<16x40xf32>
    %58 = arith.mulf %56, %57 : vector<16x40xf32>
    %59 = arith.addf %52, %58 : vector<16x40xf32>
    %60 = vector.extract_strided_slice %59 {offsets = [0, 2], sizes = [16, 1], strides = [1, 1]} : vector<16x40xf32> to vector<16x1xf32>
    %61 = math.tanh %60 : vector<16x1xf32>
    %c2 = arith.constant 2 : index
    %c0_32 = arith.constant 0 : index
    %62 = vector.load %arg17[%c2, %c0_32] : memref<20x40xf32, #tpu.memory_space<vmem>>, vector<1x40xf32>
    %63 = vector.broadcast %61 : vector<16x1xf32> to vector<16x40xf32>
    %64 = vector.broadcast %62 : vector<1x40xf32> to vector<16x40xf32>
    %65 = arith.mulf %63, %64 : vector<16x40xf32>
    %66 = arith.addf %59, %65 : vector<16x40xf32>
    %67 = vector.extract_strided_slice %66 {offsets = [0, 3], sizes = [16, 1], strides = [1, 1]} : vector<16x40xf32> to vector<16x1xf32>
    %68 = math.tanh %67 : vector<16x1xf32>
    %c3 = arith.constant 3 : index
    %c0_33 = arith.constant 0 : index
    %69 = vector.load %arg17[%c3, %c0_33] : memref<20x40xf32, #tpu.memory_space<vmem>>, vector<1x40xf32>
    %70 = vector.broadcast %68 : vector<16x1xf32> to vector<16x40xf32>
    %71 = vector.broadcast %69 : vector<1x40xf32> to vector<16x40xf32>
    %72 = arith.mulf %70, %71 : vector<16x40xf32>
    %73 = arith.addf %66, %72 : vector<16x40xf32>
    %74 = vector.extract_strided_slice %73 {offsets = [0, 4], sizes = [16, 1], strides = [1, 1]} : vector<16x40xf32> to vector<16x1xf32>
    %75 = math.tanh %74 : vector<16x1xf32>
    %c4 = arith.constant 4 : index
    %c0_34 = arith.constant 0 : index
    %76 = vector.load %arg17[%c4, %c0_34] : memref<20x40xf32, #tpu.memory_space<vmem>>, vector<1x40xf32>
    %77 = vector.broadcast %75 : vector<16x1xf32> to vector<16x40xf32>
    %78 = vector.broadcast %76 : vector<1x40xf32> to vector<16x40xf32>
    %79 = arith.mulf %77, %78 : vector<16x40xf32>
    %80 = arith.addf %73, %79 : vector<16x40xf32>
    %81 = vector.extract_strided_slice %80 {offsets = [0, 5], sizes = [16, 1], strides = [1, 1]} : vector<16x40xf32> to vector<16x1xf32>
    %82 = math.tanh %81 : vector<16x1xf32>
    %c5 = arith.constant 5 : index
    %c0_35 = arith.constant 0 : index
    %83 = vector.load %arg17[%c5, %c0_35] : memref<20x40xf32, #tpu.memory_space<vmem>>, vector<1x40xf32>
    %84 = vector.broadcast %82 : vector<16x1xf32> to vector<16x40xf32>
    %85 = vector.broadcast %83 : vector<1x40xf32> to vector<16x40xf32>
    %86 = arith.mulf %84, %85 : vector<16x40xf32>
    %87 = arith.addf %80, %86 : vector<16x40xf32>
    %88 = vector.extract_strided_slice %87 {offsets = [0, 6], sizes = [16, 1], strides = [1, 1]} : vector<16x40xf32> to vector<16x1xf32>
    %89 = math.tanh %88 : vector<16x1xf32>
    %c6 = arith.constant 6 : index
    %c0_36 = arith.constant 0 : index
    %90 = vector.load %arg17[%c6, %c0_36] : memref<20x40xf32, #tpu.memory_space<vmem>>, vector<1x40xf32>
    %91 = vector.broadcast %89 : vector<16x1xf32> to vector<16x40xf32>
    %92 = vector.broadcast %90 : vector<1x40xf32> to vector<16x40xf32>
    %93 = arith.mulf %91, %92 : vector<16x40xf32>
    %94 = arith.addf %87, %93 : vector<16x40xf32>
    %95 = vector.extract_strided_slice %94 {offsets = [0, 7], sizes = [16, 1], strides = [1, 1]} : vector<16x40xf32> to vector<16x1xf32>
    %96 = math.tanh %95 : vector<16x1xf32>
    %c7 = arith.constant 7 : index
    %c0_37 = arith.constant 0 : index
    %97 = vector.load %arg17[%c7, %c0_37] : memref<20x40xf32, #tpu.memory_space<vmem>>, vector<1x40xf32>
    %98 = vector.broadcast %96 : vector<16x1xf32> to vector<16x40xf32>
    %99 = vector.broadcast %97 : vector<1x40xf32> to vector<16x40xf32>
    %100 = arith.mulf %98, %99 : vector<16x40xf32>
    %101 = arith.addf %94, %100 : vector<16x40xf32>
    %102 = vector.extract_strided_slice %101 {offsets = [0, 8], sizes = [16, 1], strides = [1, 1]} : vector<16x40xf32> to vector<16x1xf32>
    %103 = math.tanh %102 : vector<16x1xf32>
    %c8 = arith.constant 8 : index
    %c0_38 = arith.constant 0 : index
    %104 = vector.load %arg17[%c8, %c0_38] : memref<20x40xf32, #tpu.memory_space<vmem>>, vector<1x40xf32>
    %105 = vector.broadcast %103 : vector<16x1xf32> to vector<16x40xf32>
    %106 = vector.broadcast %104 : vector<1x40xf32> to vector<16x40xf32>
    %107 = arith.mulf %105, %106 : vector<16x40xf32>
    %108 = arith.addf %101, %107 : vector<16x40xf32>
    %109 = vector.extract_strided_slice %108 {offsets = [0, 9], sizes = [16, 1], strides = [1, 1]} : vector<16x40xf32> to vector<16x1xf32>
    %110 = math.tanh %109 : vector<16x1xf32>
    %c9 = arith.constant 9 : index
    %c0_39 = arith.constant 0 : index
    %111 = vector.load %arg17[%c9, %c0_39] : memref<20x40xf32, #tpu.memory_space<vmem>>, vector<1x40xf32>
    %112 = vector.broadcast %110 : vector<16x1xf32> to vector<16x40xf32>
    %113 = vector.broadcast %111 : vector<1x40xf32> to vector<16x40xf32>
    %114 = arith.mulf %112, %113 : vector<16x40xf32>
    %115 = arith.addf %108, %114 : vector<16x40xf32>
    %116 = vector.extract_strided_slice %115 {offsets = [0, 10], sizes = [16, 1], strides = [1, 1]} : vector<16x40xf32> to vector<16x1xf32>
    %117 = math.tanh %116 : vector<16x1xf32>
    %c10 = arith.constant 10 : index
    %c0_40 = arith.constant 0 : index
    %118 = vector.load %arg17[%c10, %c0_40] : memref<20x40xf32, #tpu.memory_space<vmem>>, vector<1x40xf32>
    %119 = vector.broadcast %117 : vector<16x1xf32> to vector<16x40xf32>
    %120 = vector.broadcast %118 : vector<1x40xf32> to vector<16x40xf32>
    %121 = arith.mulf %119, %120 : vector<16x40xf32>
    %122 = arith.addf %115, %121 : vector<16x40xf32>
    %123 = vector.extract_strided_slice %122 {offsets = [0, 11], sizes = [16, 1], strides = [1, 1]} : vector<16x40xf32> to vector<16x1xf32>
    %124 = math.tanh %123 : vector<16x1xf32>
    %c11 = arith.constant 11 : index
    %c0_41 = arith.constant 0 : index
    %125 = vector.load %arg17[%c11, %c0_41] : memref<20x40xf32, #tpu.memory_space<vmem>>, vector<1x40xf32>
    %126 = vector.broadcast %124 : vector<16x1xf32> to vector<16x40xf32>
    %127 = vector.broadcast %125 : vector<1x40xf32> to vector<16x40xf32>
    %128 = arith.mulf %126, %127 : vector<16x40xf32>
    %129 = arith.addf %122, %128 : vector<16x40xf32>
    %130 = vector.extract_strided_slice %129 {offsets = [0, 12], sizes = [16, 1], strides = [1, 1]} : vector<16x40xf32> to vector<16x1xf32>
    %131 = math.tanh %130 : vector<16x1xf32>
    %c12 = arith.constant 12 : index
    %c0_42 = arith.constant 0 : index
    %132 = vector.load %arg17[%c12, %c0_42] : memref<20x40xf32, #tpu.memory_space<vmem>>, vector<1x40xf32>
    %133 = vector.broadcast %131 : vector<16x1xf32> to vector<16x40xf32>
    %134 = vector.broadcast %132 : vector<1x40xf32> to vector<16x40xf32>
    %135 = arith.mulf %133, %134 : vector<16x40xf32>
    %136 = arith.addf %129, %135 : vector<16x40xf32>
    %137 = vector.extract_strided_slice %136 {offsets = [0, 13], sizes = [16, 1], strides = [1, 1]} : vector<16x40xf32> to vector<16x1xf32>
    %138 = math.tanh %137 : vector<16x1xf32>
    %c13 = arith.constant 13 : index
    %c0_43 = arith.constant 0 : index
    %139 = vector.load %arg17[%c13, %c0_43] : memref<20x40xf32, #tpu.memory_space<vmem>>, vector<1x40xf32>
    %140 = vector.broadcast %138 : vector<16x1xf32> to vector<16x40xf32>
    %141 = vector.broadcast %139 : vector<1x40xf32> to vector<16x40xf32>
    %142 = arith.mulf %140, %141 : vector<16x40xf32>
    %143 = arith.addf %136, %142 : vector<16x40xf32>
    %144 = vector.extract_strided_slice %143 {offsets = [0, 14], sizes = [16, 1], strides = [1, 1]} : vector<16x40xf32> to vector<16x1xf32>
    %145 = math.tanh %144 : vector<16x1xf32>
    %c14 = arith.constant 14 : index
    %c0_44 = arith.constant 0 : index
    %146 = vector.load %arg17[%c14, %c0_44] : memref<20x40xf32, #tpu.memory_space<vmem>>, vector<1x40xf32>
    %147 = vector.broadcast %145 : vector<16x1xf32> to vector<16x40xf32>
    %148 = vector.broadcast %146 : vector<1x40xf32> to vector<16x40xf32>
    %149 = arith.mulf %147, %148 : vector<16x40xf32>
    %150 = arith.addf %143, %149 : vector<16x40xf32>
    %151 = vector.extract_strided_slice %150 {offsets = [0, 15], sizes = [16, 1], strides = [1, 1]} : vector<16x40xf32> to vector<16x1xf32>
    %152 = math.tanh %151 : vector<16x1xf32>
    %c15 = arith.constant 15 : index
    %c0_45 = arith.constant 0 : index
    %153 = vector.load %arg17[%c15, %c0_45] : memref<20x40xf32, #tpu.memory_space<vmem>>, vector<1x40xf32>
    %154 = vector.broadcast %152 : vector<16x1xf32> to vector<16x40xf32>
    %155 = vector.broadcast %153 : vector<1x40xf32> to vector<16x40xf32>
    %156 = arith.mulf %154, %155 : vector<16x40xf32>
    %157 = arith.addf %150, %156 : vector<16x40xf32>
    %158 = vector.extract_strided_slice %157 {offsets = [0, 16], sizes = [16, 1], strides = [1, 1]} : vector<16x40xf32> to vector<16x1xf32>
    %159 = math.tanh %158 : vector<16x1xf32>
    %c16 = arith.constant 16 : index
    %c0_46 = arith.constant 0 : index
    %160 = vector.load %arg17[%c16, %c0_46] : memref<20x40xf32, #tpu.memory_space<vmem>>, vector<1x40xf32>
    %161 = vector.broadcast %159 : vector<16x1xf32> to vector<16x40xf32>
    %162 = vector.broadcast %160 : vector<1x40xf32> to vector<16x40xf32>
    %163 = arith.mulf %161, %162 : vector<16x40xf32>
    %164 = arith.addf %157, %163 : vector<16x40xf32>
    %165 = vector.extract_strided_slice %164 {offsets = [0, 17], sizes = [16, 1], strides = [1, 1]} : vector<16x40xf32> to vector<16x1xf32>
    %166 = math.tanh %165 : vector<16x1xf32>
    %c17 = arith.constant 17 : index
    %c0_47 = arith.constant 0 : index
    %167 = vector.load %arg17[%c17, %c0_47] : memref<20x40xf32, #tpu.memory_space<vmem>>, vector<1x40xf32>
    %168 = vector.broadcast %166 : vector<16x1xf32> to vector<16x40xf32>
    %169 = vector.broadcast %167 : vector<1x40xf32> to vector<16x40xf32>
    %170 = arith.mulf %168, %169 : vector<16x40xf32>
    %171 = arith.addf %164, %170 : vector<16x40xf32>
    %172 = vector.extract_strided_slice %171 {offsets = [0, 18], sizes = [16, 1], strides = [1, 1]} : vector<16x40xf32> to vector<16x1xf32>
    %173 = math.tanh %172 : vector<16x1xf32>
    %c18 = arith.constant 18 : index
    %c0_48 = arith.constant 0 : index
    %174 = vector.load %arg17[%c18, %c0_48] : memref<20x40xf32, #tpu.memory_space<vmem>>, vector<1x40xf32>
    %175 = vector.broadcast %173 : vector<16x1xf32> to vector<16x40xf32>
    %176 = vector.broadcast %174 : vector<1x40xf32> to vector<16x40xf32>
    %177 = arith.mulf %175, %176 : vector<16x40xf32>
    %178 = arith.addf %171, %177 : vector<16x40xf32>
    %179 = vector.extract_strided_slice %178 {offsets = [0, 19], sizes = [16, 1], strides = [1, 1]} : vector<16x40xf32> to vector<16x1xf32>
    %180 = math.tanh %179 : vector<16x1xf32>
    %c19 = arith.constant 19 : index
    %c0_49 = arith.constant 0 : index
    %181 = vector.load %arg17[%c19, %c0_49] : memref<20x40xf32, #tpu.memory_space<vmem>>, vector<1x40xf32>
    %182 = vector.broadcast %180 : vector<16x1xf32> to vector<16x40xf32>
    %183 = vector.broadcast %181 : vector<1x40xf32> to vector<16x40xf32>
    %184 = arith.mulf %182, %183 : vector<16x40xf32>
    %185 = arith.addf %178, %184 : vector<16x40xf32>
    %186 = vector.extract_strided_slice %185 {offsets = [0, 20], sizes = [16, 20], strides = [1, 1]} : vector<16x40xf32> to vector<16x20xf32>
    %c0_50 = arith.constant 0 : index
    %c0_51 = arith.constant 0 : index
    %187 = vector.load %arg19[%c0_50, %c0_51] : memref<20x20xf32, #tpu.memory_space<vmem>>, vector<20x20xf32>
    %cst_52 = arith.constant dense<0.000000e+00> : vector<16x20xf32>
    %188 = tpu.matmul %186, %187, %cst_52 {dimension_numbers = #tpu.dot_dimension_numbers<[1], [0], [0], [1], [0, 0, 1, 1], [], []>} : vector<16x20xf32>, vector<20x20xf32>, vector<16x20xf32> -> vector<16x20xf32>
    %189 = arith.addf %30, %188 : vector<16x20xf32>
    %190 = arith.mulf %186, %186 : vector<16x20xf32>
    %cst_53 = arith.constant 1.000000e+00 : f32
    %191 = vector.broadcast %cst_53 : f32 to vector<16x20xf32>
    %192 = arith.subf %191, %190 : vector<16x20xf32>
    %c0_54 = arith.constant 0 : index
    %c0_55 = arith.constant 0 : index
    %193 = vector.load %arg18[%c0_54, %c0_55] : memref<1x20xf32, #tpu.memory_space<vmem>>, vector<1x20xf32>
    %194 = vector.broadcast %193 : vector<1x20xf32> to vector<16x20xf32>
    %195 = arith.mulf %192, %194 : vector<16x20xf32>
    %cst_56 = arith.constant 1.000000e+00 : f32
    %196 = vector.broadcast %cst_56 : f32 to vector<16x20xf32>
    %197 = arith.addf %196, %195 : vector<16x20xf32>
    %198 = math.absf %197 : vector<16x20xf32>
    %cst_57 = arith.constant 9.99999993E-9 : f32
    %199 = vector.broadcast %cst_57 : f32 to vector<16x20xf32>
    %200 = arith.addf %198, %199 : vector<16x20xf32>
    %201 = math.log %200 : vector<16x20xf32>
    %cst_58 = arith.constant dense<0.000000e+00> : vector<16xf32>
    %202 = vector.multi_reduction <add>, %201, %cst_58 [1] : vector<16x20xf32> to vector<16xf32>
    %203 = vector.shape_cast %202 : vector<16xf32> to vector<16x1xf32>
    %204 = arith.mulf %189, %189 : vector<16x20xf32>
    %cst_59 = arith.constant 5.000000e-01 : f32
    %205 = vector.broadcast %cst_59 : f32 to vector<16x20xf32>
    %206 = arith.mulf %205, %204 : vector<16x20xf32>
    %cst_60 = arith.constant -0.918938517 : f32
    %207 = vector.broadcast %cst_60 : f32 to vector<16x20xf32>
    %208 = arith.subf %207, %206 : vector<16x20xf32>
    %cst_61 = arith.constant dense<0.000000e+00> : vector<16xf32>
    %209 = vector.multi_reduction <add>, %208, %cst_61 [1] : vector<16x20xf32> to vector<16xf32>
    %210 = vector.shape_cast %209 : vector<16xf32> to vector<16x1xf32>
    %211 = arith.subf %40, %203 : vector<16x1xf32>
    %212 = arith.subf %211, %210 : vector<16x1xf32>
    %c0_62 = arith.constant 0 : index
    %c0_63 = arith.constant 0 : index
    %213 = vector.load %arg21[%c0_62, %c0_63] : memref<16x1xf32, #tpu.memory_space<vmem>>, vector<16x1xf32>
    tpu.vector_store %arg21[%c0_62, %c0_63], %212 {strides = array<i32>} : memref<16x1xf32, #tpu.memory_space<vmem>>, vector<16x1xf32>,
    %214 = arith.truncf %189 : vector<16x20xf32> to vector<16x20xbf16>
    %c0_64 = arith.constant 0 : index
    %c0_65 = arith.constant 0 : index
    %215 = vector.load %arg9[%c0_64, %c0_65] : memref<20x256xbf16, #tpu.memory_space<vmem>>, vector<20x256xbf16>
    %cst_66 = arith.constant dense<0.000000e+00> : vector<16x256xf32>
    %216 = tpu.matmul %214, %215, %cst_66 {dimension_numbers = #tpu.dot_dimension_numbers<[1], [0], [0], [1], [0, 0, 1, 1], [], []>} : vector<16x20xbf16>, vector<20x256xbf16>, vector<16x256xf32> -> vector<16x256xf32>
    %c0_67 = arith.constant 0 : index
    %c0_68 = arith.constant 0 : index
    %217 = vector.load %arg10[%c0_67, %c0_68] : memref<1x256xf32, #tpu.memory_space<vmem>>, vector<1x256xf32>
    %218 = vector.broadcast %217 : vector<1x256xf32> to vector<16x256xf32>
    %219 = arith.addf %216, %218 : vector<16x256xf32>
    %cst_69 = arith.constant 0.000000e+00 : f32
    %220 = vector.broadcast %cst_69 : f32 to vector<16x256xf32>
    %221 = arith.maximumf %219, %220 : vector<16x256xf32>
    %222 = arith.truncf %221 : vector<16x256xf32> to vector<16x256xbf16>
    %c0_70 = arith.constant 0 : index
    %c0_71 = arith.constant 0 : index
    %223 = vector.load %arg11[%c0_70, %c0_71] : memref<256x512xbf16, #tpu.memory_space<vmem>>, vector<256x512xbf16>
    %cst_72 = arith.constant dense<0.000000e+00> : vector<16x512xf32>
    %224 = tpu.matmul %222, %223, %cst_72 {dimension_numbers = #tpu.dot_dimension_numbers<[1], [0], [0], [1], [0, 0, 1, 1], [], []>} : vector<16x256xbf16>, vector<256x512xbf16>, vector<16x512xf32> -> vector<16x512xf32>
    %c0_73 = arith.constant 0 : index
    %c0_74 = arith.constant 0 : index
    %225 = vector.load %arg12[%c0_73, %c0_74] : memref<1x512xf32, #tpu.memory_space<vmem>>, vector<1x512xf32>
    %226 = vector.broadcast %225 : vector<1x512xf32> to vector<16x512xf32>
    %227 = arith.addf %224, %226 : vector<16x512xf32>
    %cst_75 = arith.constant 0.000000e+00 : f32
    %228 = vector.broadcast %cst_75 : f32 to vector<16x512xf32>
    %229 = arith.maximumf %227, %228 : vector<16x512xf32>
    %230 = arith.truncf %229 : vector<16x512xf32> to vector<16x512xbf16>
    %c0_76 = arith.constant 0 : index
    %c0_77 = arith.constant 0 : index
    %231 = vector.load %arg13[%c0_76, %c0_77] : memref<512x784xbf16, #tpu.memory_space<vmem>>, vector<512x784xbf16>
    %cst_78 = arith.constant dense<0.000000e+00> : vector<16x784xf32>
    %232 = tpu.matmul %230, %231, %cst_78 {dimension_numbers = #tpu.dot_dimension_numbers<[1], [0], [0], [1], [0, 0, 1, 1], [], []>} : vector<16x512xbf16>, vector<512x784xbf16>, vector<16x784xf32> -> vector<16x784xf32>
    %c0_79 = arith.constant 0 : index
    %c0_80 = arith.constant 0 : index
    %233 = vector.load %arg14[%c0_79, %c0_80] : memref<1x784xf32, #tpu.memory_space<vmem>>, vector<1x784xf32>
    %234 = vector.broadcast %233 : vector<1x784xf32> to vector<16x784xf32>
    %235 = arith.addf %232, %234 : vector<16x784xf32>
    %cst_81 = arith.constant 0.000000e+00 : f32
    %236 = vector.broadcast %cst_81 : f32 to vector<16x784xf32>
    %237 = arith.subf %236, %235 : vector<16x784xf32>
    %238 = math.exp %237 : vector<16x784xf32>
    %cst_82 = arith.constant 1.000000e+00 : f32
    %239 = vector.broadcast %cst_82 : f32 to vector<16x784xf32>
    %240 = arith.addf %239, %238 : vector<16x784xf32>
    %241 = tpu.reciprocal %240 {approx = true} : vector<16x784xf32> -> vector<16x784xf32>
    %242 = arith.truncf %241 : vector<16x784xf32> to vector<16x784xbf16>
    %c0_83 = arith.constant 0 : index
    %c0_84 = arith.constant 0 : index
    %243 = vector.load %arg20[%c0_83, %c0_84] : memref<16x784xbf16, #tpu.memory_space<vmem>>, vector<16x784xbf16>
    tpu.vector_store %arg20[%c0_83, %c0_84], %242 {strides = array<i32>} : memref<16x784xbf16, #tpu.memory_space<vmem>>, vector<16x784xbf16>,
    return
  }
  func.func @transform_0(%arg0: i32) -> (i32, i32) {
    %c0_i32 = arith.constant 0 : i32
    %c0_i32_0 = arith.constant 0 : i32
    return %arg0, %c0_i32 : i32, i32
  }
  func.func @transform_1(%arg0: i32) -> (i32, i32) {
    %c0_i32 = arith.constant 0 : i32
    %c0_i32_0 = arith.constant 0 : i32
    return %arg0, %c0_i32 : i32, i32
  }
  func.func @transform_2(%arg0: i32) -> (i32, i32) {
    %c0_i32 = arith.constant 0 : i32
    %c0_i32_0 = arith.constant 0 : i32
    %c0_i32_1 = arith.constant 0 : i32
    return %c0_i32, %c0_i32_0 : i32, i32
  }
  func.func @transform_3(%arg0: i32) -> (i32, i32) {
    %c0_i32 = arith.constant 0 : i32
    %c0_i32_0 = arith.constant 0 : i32
    %c0_i32_1 = arith.constant 0 : i32
    return %c0_i32, %c0_i32_0 : i32, i32
  }
  func.func @transform_4(%arg0: i32) -> (i32, i32) {
    %c0_i32 = arith.constant 0 : i32
    %c0_i32_0 = arith.constant 0 : i32
    %c0_i32_1 = arith.constant 0 : i32
    return %c0_i32, %c0_i32_0 : i32, i32
  }
  func.func @transform_5(%arg0: i32) -> (i32, i32) {
    %c0_i32 = arith.constant 0 : i32
    %c0_i32_0 = arith.constant 0 : i32
    %c0_i32_1 = arith.constant 0 : i32
    return %c0_i32, %c0_i32_0 : i32, i32
  }
  func.func @transform_6(%arg0: i32) -> (i32, i32) {
    %c0_i32 = arith.constant 0 : i32
    %c0_i32_0 = arith.constant 0 : i32
    %c0_i32_1 = arith.constant 0 : i32
    return %c0_i32, %c0_i32_0 : i32, i32
  }
  func.func @transform_7(%arg0: i32) -> (i32, i32) {
    %c0_i32 = arith.constant 0 : i32
    %c0_i32_0 = arith.constant 0 : i32
    %c0_i32_1 = arith.constant 0 : i32
    return %c0_i32, %c0_i32_0 : i32, i32
  }
  func.func @transform_8(%arg0: i32) -> (i32, i32) {
    %c0_i32 = arith.constant 0 : i32
    %c0_i32_0 = arith.constant 0 : i32
    %c0_i32_1 = arith.constant 0 : i32
    return %c0_i32, %c0_i32_0 : i32, i32
  }
  func.func @transform_9(%arg0: i32) -> (i32, i32) {
    %c0_i32 = arith.constant 0 : i32
    %c0_i32_0 = arith.constant 0 : i32
    %c0_i32_1 = arith.constant 0 : i32
    return %c0_i32, %c0_i32_0 : i32, i32
  }
  func.func @transform_10(%arg0: i32) -> (i32, i32) {
    %c0_i32 = arith.constant 0 : i32
    %c0_i32_0 = arith.constant 0 : i32
    %c0_i32_1 = arith.constant 0 : i32
    return %c0_i32, %c0_i32_0 : i32, i32
  }
  func.func @transform_11(%arg0: i32) -> (i32, i32) {
    %c0_i32 = arith.constant 0 : i32
    %c0_i32_0 = arith.constant 0 : i32
    %c0_i32_1 = arith.constant 0 : i32
    return %c0_i32, %c0_i32_0 : i32, i32
  }
  func.func @transform_12(%arg0: i32) -> (i32, i32) {
    %c0_i32 = arith.constant 0 : i32
    %c0_i32_0 = arith.constant 0 : i32
    %c0_i32_1 = arith.constant 0 : i32
    return %c0_i32, %c0_i32_0 : i32, i32
  }
  func.func @transform_13(%arg0: i32) -> (i32, i32) {
    %c0_i32 = arith.constant 0 : i32
    %c0_i32_0 = arith.constant 0 : i32
    %c0_i32_1 = arith.constant 0 : i32
    return %c0_i32, %c0_i32_0 : i32, i32
  }
  func.func @transform_14(%arg0: i32) -> (i32, i32) {
    %c0_i32 = arith.constant 0 : i32
    %c0_i32_0 = arith.constant 0 : i32
    %c0_i32_1 = arith.constant 0 : i32
    return %c0_i32, %c0_i32_0 : i32, i32
  }
  func.func @transform_15(%arg0: i32) -> (i32, i32) {
    %c0_i32 = arith.constant 0 : i32
    %c0_i32_0 = arith.constant 0 : i32
    %c0_i32_1 = arith.constant 0 : i32
    return %c0_i32, %c0_i32_0 : i32, i32
  }
  func.func @transform_16(%arg0: i32) -> (i32, i32) {
    %c0_i32 = arith.constant 0 : i32
    %c0_i32_0 = arith.constant 0 : i32
    %c0_i32_1 = arith.constant 0 : i32
    return %c0_i32, %c0_i32_0 : i32, i32
  }
  func.func @transform_17(%arg0: i32) -> (i32, i32) {
    %c0_i32 = arith.constant 0 : i32
    %c0_i32_0 = arith.constant 0 : i32
    %c0_i32_1 = arith.constant 0 : i32
    return %c0_i32, %c0_i32_0 : i32, i32
  }
  func.func @transform_18(%arg0: i32) -> (i32, i32) {
    %c0_i32 = arith.constant 0 : i32
    %c0_i32_0 = arith.constant 0 : i32
    %c0_i32_1 = arith.constant 0 : i32
    return %c0_i32, %c0_i32_0 : i32, i32
  }
  func.func @transform_19(%arg0: i32) -> (i32, i32) {
    %c0_i32 = arith.constant 0 : i32
    %c0_i32_0 = arith.constant 0 : i32
    return %arg0, %c0_i32 : i32, i32
  }
  func.func @transform_20(%arg0: i32) -> (i32, i32) {
    %c0_i32 = arith.constant 0 : i32
    %c0_i32_0 = arith.constant 0 : i32
    return %arg0, %c0_i32 : i32, i32
  }
}

</mosaic_0001>

<bundles_post_ra>
// kernel: vae_forward.1
= control target key start
LH: loop header
LB: loop body
LE: loop exit
PB: predicated region body
PF: predicated region fallthrough
CT: control target
= control target key end

     0   :  { %vm1272_vm0 = vcmask 130048   ;;  %vm2414_vm1 = vcmask 1043456   ;;  %s8466_s21 = smov 108   ;;  %vm2394_vm2 = vcmask 162816   ;;  %vm2925_vm3 = vcmask 1041408   ;;  %s12298_s2 = inlined_call_operand.vmem [shape: bf16[784,512], index: 2, kind: input, shape index: {}]   ;;  %s12299_s0 = inlined_call_operand.vmem [shape: f32[16,784], index: 0, kind: input, shape index: {}]   ;;  %s12300_s3 = inlined_call_operand.vmem [shape: f32[1,512], index: 3, kind: input, shape index: {}]   ;;  %s12301_s4 = inlined_call_operand.vmem [shape: bf16[512,256], index: 4, kind: input, shape index: {}]   ;;  %s12302_s7 = inlined_call_operand.vmem [shape: f32[1,40], index: 7, kind: input, shape index: {}]   ;;  %s12303_s6 = inlined_call_operand.vmem [shape: bf16[256,40], index: 6, kind: input, shape index: {}]   ;;  %s12304_s5 = inlined_call_operand.vmem [shape: f32[1,256], index: 5, kind: input, shape index: {}]   ;;  %s12305_s14 = inlined_call_operand.vmem [shape: f32[20,40], index: 14, kind: input, shape index: {}]   ;;  %s12306_s15 = inlined_call_operand.vmem [shape: f32[1,40], index: 15, kind: input, shape index: {}]   ;;  %s12307_s1 = inlined_call_operand.vmem [shape: f32[16,20], index: 1, kind: input, shape index: {}]   ;;  %s12308_s16 = inlined_call_operand.vmem [shape: f32[20,40], index: 16, kind: input, shape index: {}]   ;;  %s12309_s17 = inlined_call_operand.vmem [shape: f32[1,20], index: 17, kind: input, shape index: {}]   ;;  %s12310_s18 = inlined_call_operand.vmem [shape: f32[20,20], index: 18, kind: input, shape index: {}]   ;;  %s12311_s8 = inlined_call_operand.vmem [shape: bf16[20,256], index: 8, kind: input, shape index: {}]   ;;  %s12312_s10 = inlined_call_operand.vmem [shape: bf16[256,512], index: 10, kind: input, shape index: {}]   ;;  %s12313_s20 = inlined_call_operand.vmem [shape: f32[16,1], index: 20, kind: output, shape index: {1}]   ;;  %s12314_s9 = inlined_call_operand.vmem [shape: f32[1,256], index: 9, kind: input, shape index: {}]   ;;  %s12315_s12 = inlined_call_operand.vmem [shape: bf16[512,784], index: 12, kind: input, shape index: {}]   ;;  %s12316_s11 = inlined_call_operand.vmem [shape: f32[1,512], index: 11, kind: input, shape index: {}]   ;;  %s12317_s13 = inlined_call_operand.vmem [shape: f32[1,784], index: 13, kind: input, shape index: {}]   ;;  %s12318_s19 = inlined_call_operand.vmem [shape: bf16[16,784], index: 19, kind: output, shape index: {0}]  }
   0x1   :  { %12322 = sst [smem:[#allocation2_spill]] %s12298_s2  ;;  %vm2894_vm4 = vcmask 7168   ;;  %vm5381_vm5 = vcmask 125952  }
   0x2   :  { %12323 = sst [smem:[#allocation3_spill]] %s12299_s0 }
   0x3   :  { %12324 = sst [smem:[#allocation4_spill]] %s12300_s3 }
   0x4   :  { %12325 = sst [smem:[#allocation5_spill]] %s12301_s4 }
   0x5   :  { %12326 = sst [smem:[#allocation6_spill]] %s12302_s7 }
   0x6   :  { %s12327_s23 = sld [smem:[#allocation2_spill]] }
   0x7   :  { %s12328_s24 = sld [smem:[#allocation3_spill]] }
   0x8   :  { %s12330_s26 = sld [smem:[#allocation5_spill]] }
   0xc   :  { %v5509_v0 = vld [vmem:[%s12327_s23 + $0xe0] sm:$0xf]  ;;  %v7703_v1 = vld [vmem:[%s12327_s23 + $0xec] sm:$0xf0] }
   0xd   :  { %v5637_v2 = vld [vmem:[%s12327_s23 + $0x1e0] sm:$0xf]  ;;  %v5510_v3 = vor.u32 %v7703_v1, %v5509_v0  ;;  %v7735_v4 = vld [vmem:[%s12327_s23 + $0x1ec] sm:$0xf0] }
   0xe   :  { %v5765_v5 = vld [vmem:[%s12327_s23 + $0x2e0] sm:$0xf]  ;;  %v7767_v6 = vld [vmem:[%s12327_s23 + $0x2ec] sm:$0xf0]  ;;  %v5638_v7 = vor.u32 %v7735_v4, %v5637_v2 }
   0xf   :  { %v5766_v8 = vor.u32 %v7767_v6, %v5765_v5  ;;  %v5893_v9 = vld [vmem:[%s12327_s23 + $0x3e0] sm:$0xf]  ;;  %v7799_v10 = vld [vmem:[%s12327_s23 + $0x3ec] sm:$0xf0]  ;;  %1276 = vmatpush.bf16.msra.mxu0 %v5510_v3 }
  0x10   :  { %v5493_v11 = vld [vmem:[%s12327_s23 + $0xc0] sm:$0xf]  ;;  %v5894_v12 = vor.u32 %v7799_v10, %v5893_v9  ;;  %v7699_v13 = vld [vmem:[%s12327_s23 + $0xcc] sm:$0xf0]  ;;  %1290 = vmatpush.bf16.msra.mxu1 %v5638_v7 }
  0x11   :  { %v5621_v14 = vld [vmem:[%s12327_s23 + $0x1c0] sm:$0xf]  ;;  %v7731_v15 = vld [vmem:[%s12327_s23 + $0x1cc] sm:$0xf0]  ;;  %1304 = vmatpush.bf16.msra.mxu2 %v5766_v8  ;;  %v5494_v16 = vor.u32 %v7699_v13, %v5493_v11 }
  0x12   :  { %v5622_v17 = vor.u32 %v7731_v15, %v5621_v14  ;;  %v5749_v18 = vld [vmem:[%s12327_s23 + $0x2c0] sm:$0xf]  ;;  %v7763_v19 = vld [vmem:[%s12327_s23 + $0x2cc] sm:$0xf0]  ;;  %1318 = vmatpush.bf16.msra.mxu3 %v5894_v12 }
  0x13   :  { %v5877_v20 = vld [vmem:[%s12327_s23 + $0x3c0] sm:$0xf]  ;;  %v5750_v21 = vor.u32 %v7763_v19, %v5749_v18  ;;  %v7795_v22 = vld [vmem:[%s12327_s23 + $0x3cc] sm:$0xf0]  ;;  %1277 = vmatpush.bf16.msra.mxu0 %v5494_v16 }
  0x14   :  { %v5477_v23 = vld [vmem:[%s12327_s23 + $0xa0] sm:$0xf]  ;;  %v7695_v24 = vld [vmem:[%s12327_s23 + $0xac] sm:$0xf0]  ;;  %v5878_v25 = vor.u32 %v7795_v22, %v5877_v20  ;;  %1291 = vmatpush.bf16.msra.mxu1 %v5622_v17 }
  0x15   :  { %v5605_v26 = vld [vmem:[%s12327_s23 + $0x1a0] sm:$0xf]  ;;  %v7727_v27 = vld [vmem:[%s12327_s23 + $0x1ac] sm:$0xf0]  ;;  %v5478_v29 = vor.u32 %v7695_v24, %v5477_v23  ;;  %1305 = vmatpush.bf16.msra.mxu2 %v5750_v21 }
  0x16   :  { %v5733_v28 = vld [vmem:[%s12327_s23 + $0x2a0] sm:$0xf]  ;;  %v7759_v30 = vld [vmem:[%s12327_s23 + $0x2ac] sm:$0xf0]  ;;  %v5606_v33 = vor.u32 %v7727_v27, %v5605_v26  ;;  %1319 = vmatpush.bf16.msra.mxu3 %v5878_v25 }
  0x17   :  { %v5861_v31 = vld [vmem:[%s12327_s23 + $0x3a0] sm:$0xf]  ;;  %v7791_v32 = vld [vmem:[%s12327_s23 + $0x3ac] sm:$0xf0]  ;;  %v5734_v34 = vor.u32 %v7759_v30, %v5733_v28  ;;  %1278 = vmatpush.bf16.msra.mxu0 %v5478_v29 }
  0x18   :  { %v5461_v35 = vld [vmem:[%s12327_s23 + $0x80] sm:$0xf]  ;;  %v7691_v36 = vld [vmem:[%s12327_s23 + $0x8c] sm:$0xf0]  ;;  %v5862_v38 = vor.u32 %v7791_v32, %v5861_v31  ;;  %1292 = vmatpush.bf16.msra.mxu1 %v5606_v33  ;;  %v7701_v32 = vld [vmem:[%s12327_s23 + $0xe4] sm:$0xf] }
  0x19   :  { %v5589_v37 = vld [vmem:[%s12327_s23 + $0x180] sm:$0xf]  ;;  %v7723_v39 = vld [vmem:[%s12327_s23 + $0x18c] sm:$0xf0]  ;;  %v5462_v44 = vor.u32 %v7691_v36, %v5461_v35  ;;  %1306 = vmatpush.bf16.msra.mxu2 %v5734_v34  ;;  %v5511_v33 = vld [vmem:[%s12327_s23 + $0xf0] sm:$0xf0] }
  0x1a   :  { %v5717_v40 = vld [vmem:[%s12327_s23 + $0x280] sm:$0xf]  ;;  %v7755_v41 = vld [vmem:[%s12327_s23 + $0x28c] sm:$0xf0]  ;;  %v5590_v45 = vor.u32 %v7723_v39, %v5589_v37  ;;  %1320 = vmatpush.bf16.msra.mxu3 %v5862_v38  ;;  %v74_v36 = vld [vmem:[%s12328_s24 + $0x48] sm:$0xff] }
  0x1b   :  { %v5845_v42 = vld [vmem:[%s12327_s23 + $0x380] sm:$0xf]  ;;  %v7787_v43 = vld [vmem:[%s12327_s23 + $0x38c] sm:$0xf0]  ;;  %v5718_v46 = vor.u32 %v7755_v41, %v5717_v40  ;;  %1279 = vmatpush.bf16.msra.mxu0 %v5462_v44  ;;  %v7733_v41 = vld [vmem:[%s12327_s23 + $0x1e4] sm:$0xf] }
  0x1c   :  { %v5445_v47 = vld [vmem:[%s12327_s23 + $0x60] sm:$0xf]  ;;  %v7687_v48 = vld [vmem:[%s12327_s23 + $0x6c] sm:$0xf0]  ;;  %v5846_v50 = vor.u32 %v7787_v43, %v5845_v42  ;;  %1293 = vmatpush.bf16.msra.mxu1 %v5590_v45  ;;  %v72_v43 = vld [vmem:[%s12328_s24 + $0x38] sm:$0xff] }
  0x1d   :  { %v5573_v49 = vld [vmem:[%s12327_s23 + $0x160] sm:$0xf]  ;;  %v7719_v51 = vld [vmem:[%s12327_s23 + $0x16c] sm:$0xf0]  ;;  %v5446_v56 = vor.u32 %v7687_v48, %v5445_v47  ;;  %1307 = vmatpush.bf16.msra.mxu2 %v5718_v46  ;;  %v5639_v46 = vld [vmem:[%s12327_s23 + $0x1f0] sm:$0xf0] }
  0x1e   :  { %v5701_v52 = vld [vmem:[%s12327_s23 + $0x260] sm:$0xf]  ;;  %v7751_v53 = vld [vmem:[%s12327_s23 + $0x26c] sm:$0xf0]  ;;  %v5574_v57 = vor.u32 %v7719_v51, %v5573_v49  ;;  %1321 = vmatpush.bf16.msra.mxu3 %v5846_v50  ;;  %v68_v47 = vld [vmem:[%s12328_s24 + $0x18] sm:$0xff]  ;;  %v5514_v50 = vor.u32 %v7701_v32, %v5511_v33 }
  0x1f   :  { %v5829_v54 = vld [vmem:[%s12327_s23 + $0x360] sm:$0xf]  ;;  %v7783_v55 = vld [vmem:[%s12327_s23 + $0x36c] sm:$0xf0]  ;;  %v5702_v58 = vor.u32 %v7751_v53, %v5701_v52  ;;  %1280 = vmatpush.bf16.msra.mxu0 %v5446_v56 }
  0x20   :  { %v5429_v59 = vld [vmem:[%s12327_s23 + $0x40] sm:$0xf]  ;;  %v7683_v60 = vld [vmem:[%s12327_s23 + $0x4c] sm:$0xf0]  ;;  %v5830_v62 = vor.u32 %v7783_v55, %v5829_v54  ;;  %1294 = vmatpush.bf16.msra.mxu1 %v5574_v57  ;;  %v7697_v57 = vld [vmem:[%s12327_s23 + $0xc4] sm:$0xf] }
  0x21   :  { %v5557_v61 = vld [vmem:[%s12327_s23 + $0x140] sm:$0xf]  ;;  %v7715_v63 = vld [vmem:[%s12327_s23 + $0x14c] sm:$0xf0]  ;;  %v5430_v4 = vor.u32 %v7683_v60, %v5429_v59  ;;  %1308 = vmatpush.bf16.msra.mxu2 %v5702_v58  ;;  %v5495_v58 = vld [vmem:[%s12327_s23 + $0xd0] sm:$0xf0] }
  0x22   :  { %v5685_v0 = vld [vmem:[%s12327_s23 + $0x240] sm:$0xf]  ;;  %v7747_v1 = vld [vmem:[%s12327_s23 + $0x24c] sm:$0xf0]  ;;  %v5558_v6 = vor.u32 %v7715_v63, %v5557_v61  ;;  %1322 = vmatpush.bf16.msra.mxu3 %v5830_v62  ;;  %v66_v61 = vld [vmem:[%s12328_s24 + $0x8] sm:$0xff]  ;;  %v5642_v63 = vor.u32 %v7733_v41, %v5639_v46 }
  0x23   :  { %v5813_v2 = vld [vmem:[%s12327_s23 + $0x340] sm:$0xf]  ;;  %v7779_v3 = vld [vmem:[%s12327_s23 + $0x34c] sm:$0xf0]  ;;  %v5686_v7 = vor.u32 %v7747_v1, %v5685_v0  ;;  %1281 = vmatpush.bf16.msra.mxu0 %v5430_v4  ;;  %v7729_v1 = vld [vmem:[%s12327_s23 + $0x1c4] sm:$0xf]  ;;  %v5498_v4 = vor.u32 %v7697_v57, %v5495_v58 }
  0x24   :  { %v5413_v5 = vld [vmem:[%s12327_s23 + $0x20] sm:$0xf]  ;;  %v7679_v8 = vld [vmem:[%s12327_s23 + $0x2c] sm:$0xf0]  ;;  %v5814_v11 = vor.u32 %v7779_v3, %v5813_v2  ;;  %1295 = vmatpush.bf16.msra.mxu1 %v5558_v6  ;;  %v5623_v2 = vld [vmem:[%s12327_s23 + $0x1d0] sm:$0xf0] }
  0x25   :  { %v5541_v9 = vld [vmem:[%s12327_s23 + $0x120] sm:$0xf]  ;;  %v7711_v10 = vld [vmem:[%s12327_s23 + $0x12c] sm:$0xf0]  ;;  %v5414_v18 = vor.u32 %v7679_v8, %v5413_v5  ;;  %1309 = vmatpush.bf16.msra.mxu2 %v5686_v7  ;;  %v5575_v41 = vld [vmem:[%s12327_s23 + $0x170] sm:$0xf0] }
  0x26   :  { %v5669_v12 = vld [vmem:[%s12327_s23 + $0x220] sm:$0xf]  ;;  %v7743_v13 = vld [vmem:[%s12327_s23 + $0x22c] sm:$0xf0]  ;;  %v5542_v23 = vor.u32 %v7711_v10, %v5541_v9  ;;  %1323 = vmatpush.bf16.msra.mxu3 %v5814_v11  ;;  %v7693_v10 = vld [vmem:[%s12327_s23 + $0xa4] sm:$0xf] }
  0x27   :  { %v5797_v14 = vld [vmem:[%s12327_s23 + $0x320] sm:$0xf]  ;;  %v7775_v15 = vld [vmem:[%s12327_s23 + $0x32c] sm:$0xf0]  ;;  %v5670_v24 = vor.u32 %v7743_v13, %v5669_v12  ;;  %1282 = vmatpush.bf16.msra.mxu0 %v5414_v18  ;;  %v5479_v11 = vld [vmem:[%s12327_s23 + $0xb0] sm:$0xf0]  ;;  %v5626_v12 = vor.u32 %v7729_v1, %v5623_v2 }
  0x28   :  { %v5397_v16 = vld [vmem:[%s12327_s23] sm:$0xf]  ;;  %v7675_v17 = vld [vmem:[%s12327_s23 + $0xc] sm:$0xf0]  ;;  %v5798_v28 = vor.u32 %v7775_v15, %v5797_v14  ;;  %1296 = vmatpush.bf16.msra.mxu1 %v5542_v23  ;;  %v7725_v14 = vld [vmem:[%s12327_s23 + $0x1a4] sm:$0xf] }
  0x29   :  { %v5525_v19 = vld [vmem:[%s12327_s23 + $0x100] sm:$0xf]  ;;  %v7707_v20 = vld [vmem:[%s12327_s23 + $0x10c] sm:$0xf0]  ;;  %v5398_v35 = vor.u32 %v7675_v17, %v5397_v16  ;;  %1310 = vmatpush.bf16.msra.mxu2 %v5670_v24  ;;  %v5607_v15 = vld [vmem:[%s12327_s23 + $0x1b0] sm:$0xf0]  ;;  %v5482_v17 = vor.u32 %v7693_v10, %v5479_v11 }
  0x2a   :  { %v5653_v21 = vld [vmem:[%s12327_s23 + $0x200] sm:$0xf]  ;;  %v7739_v22 = vld [vmem:[%s12327_s23 + $0x20c] sm:$0xf0]  ;;  %v5526_v39 = vor.u32 %v7707_v20, %v5525_v19  ;;  %1324 = vmatpush.bf16.msra.mxu3 %v5798_v28  ;;  %v5463_v23 = vld [vmem:[%s12327_s23 + $0x90] sm:$0xf0]  ;;  %v5610_v24 = vor.u32 %v7725_v14, %v5607_v15 }
  0x2b   :  { %v5781_v25 = vld [vmem:[%s12327_s23 + $0x300] sm:$0xf]  ;;  %v7771_v26 = vld [vmem:[%s12327_s23 + $0x30c] sm:$0xf0]  ;;  %v5654_v40 = vor.u32 %v7739_v22, %v5653_v21  ;;  %1283 = vmatpush.bf16.msra.mxu0 %v5398_v35  ;;  %v7689_v22 = vld [vmem:[%s12327_s23 + $0x84] sm:$0xf] }
  0x2c   :  { %v6021_v27 = vld [vmem:[%s12327_s23 + $0x4e0] sm:$0xf]  ;;  %v7831_v29 = vld [vmem:[%s12327_s23 + $0x4ec] sm:$0xf0]  ;;  %v5782_v44 = vor.u32 %v7771_v26, %v5781_v25  ;;  %1297 = vmatpush.bf16.msra.mxu1 %v5526_v39  ;;  %v7721_v26 = vld [vmem:[%s12327_s23 + $0x184] sm:$0xf] }
  0x2d   :  { %v6149_v30 = vld [vmem:[%s12327_s23 + $0x5e0] sm:$0xf]  ;;  %v7863_v31 = vld [vmem:[%s12327_s23 + $0x5ec] sm:$0xf0]  ;;  %v6022_v45 = vor.u32 %v7831_v29, %v6021_v27  ;;  %1311 = vmatpush.bf16.msra.mxu2 %v5654_v40  ;;  %v5591_v27 = vld [vmem:[%s12327_s23 + $0x190] sm:$0xf0]  ;;  %v5466_v29 = vor.u32 %v7689_v22, %v5463_v23 }
  0x2e   :  { %v67_v34 = vld [vmem:[%s12328_s24 + $0x10] sm:$0xff]  ;;  %v6165_v37 = vld [vmem:[%s12327_s23 + $0x600] sm:$0xf]  ;;  %v6150_v49 = vor.u32 %v7863_v31, %v6149_v30  ;;  %1325 = vmatpush.bf16.msra.mxu3 %v5782_v44  ;;  %v7717_v40 = vld [vmem:[%s12327_s23 + $0x164] sm:$0xf] }
  0x2f   :  { %v7867_v38 = vld [vmem:[%s12327_s23 + $0x60c] sm:$0xf0]  ;;  %v65_v42 = vld [vmem:[%s12328_s24] sm:$0xff]  ;;  %v8842_v54 = vpack.c.bf16 %v74_v36, %v67_v34  ;;  %1332 = vmatpush.bf16.msrb.mxu0 %v6022_v45  ;;  %v5447_v35 = vld [vmem:[%s12327_s23 + $0x70] sm:$0xf0] }
  0x30   :  { %v75_v48 = vld [vmem:[%s12328_s24 + $0x50] sm:$0xff]  ;;  %v6005_v51 = vld [vmem:[%s12327_s23 + $0x4c0] sm:$0xf]  ;;  %v8844_v55 = vpack.c.bf16 %v72_v43, %v65_v42  ;;  %v6166_v59 = vor.u32 %v7867_v38, %v6165_v37  ;;  %1346 = vmatpush.bf16.msrb.mxu1 %v6150_v49  ;;  %v7685_v34 = vld [vmem:[%s12327_s23 + $0x64] sm:$0xf]  ;;  %v5594_v38 = vor.u32 %v7721_v26, %v5591_v27 }
  0x31   :  { %v7827_v52 = vld [vmem:[%s12327_s23 + $0x4cc] sm:$0xf0]  ;;  %v6133_v53 = vld [vmem:[%s12327_s23 + $0x5c0] sm:$0xf]  ;;  %v8855_v60 = vpack.c.bf16 %v75_v48, %v68_v47  ;;  %1312 = vmatmul.bf16.vlgmr.msra.gmra.mxu2 %v8842_v54  ;;  %v78_v37 = vld [vmem:[%s12328_s24 + $0x68] sm:$0xff]  ;;  %v5450_v43 = vor.u32 %v7685_v34, %v5447_v35 }
  0x32   :  { %v7859_v56 = vld [vmem:[%s12327_s23 + $0x5cc] sm:$0xf0]  ;;  %v73_v62 = vld [vmem:[%s12328_s24 + $0x40] sm:$0xff]  ;;  %v6006_v0 = vor.u32 %v7827_v52, %v6005_v51  ;;  %1374 = vmatpush.bf16.msrb.mxu3 %v5514_v50  ;;  %1284 = vmatmul.bf16.vlgmr.msra.gmra.mxu0 %v8844_v55  ;;  %v5431_v49 = vld [vmem:[%s12327_s23 + $0x50] sm:$0xf0]  ;;  %v5578_v51 = vor.u32 %v7717_v40, %v5575_v41 }
  0x33   :  { %v6134_v3 = vor.u32 %v7859_v56, %v6133_v53  ;;  %v5989_v5 = vld [vmem:[%s12327_s23 + $0x4a0] sm:$0xf]  ;;  %v7823_v6 = vld [vmem:[%s12327_s23 + $0x4ac] sm:$0xf0]  ;;  %v8880_v8 = vpack.c.bf16 %v73_v62, %v66_v61  ;;  %1367 = vmatpush.bf16.msrb.mxu2 %v6166_v59  ;;  %1326 = vmatmul.bf16.vlgmr.msra.gmra.mxu3 %v8855_v60  ;;  %v7681_v48 = vld [vmem:[%s12327_s23 + $0x44] sm:$0xf] }
  0x34   :  { %v6117_v7 = vld [vmem:[%s12327_s23 + $0x5a0] sm:$0xf]  ;;  %v7855_v9 = vld [vmem:[%s12327_s23 + $0x5ac] sm:$0xf0]  ;;  %1333 = vmatpush.bf16.msrb.mxu0 %v6006_v0  ;;  %v5990_v13 = vor.u32 %v7823_v6, %v5989_v5  ;;  %v7713_v53 = vld [vmem:[%s12327_s23 + $0x144] sm:$0xf]  ;;  %v5434_v58 = vor.u32 %v7681_v48, %v5431_v49 }
  0x35   :  { %1347 = vmatpush.bf16.msrb.mxu1 %v6134_v3  ;;  %v6118_v16 = vor.u32 %v7855_v9, %v6117_v7  ;;  %v5973_v18 = vld [vmem:[%s12327_s23 + $0x480] sm:$0xf]  ;;  %v7819_v19 = vld [vmem:[%s12327_s23 + $0x48c] sm:$0xf0]  ;;  %v5559_v56 = vld [vmem:[%s12327_s23 + $0x150] sm:$0xf0] }
  0x36   :  { %1375 = vmatpush.bf16.msrb.mxu3 %v5498_v4  ;;  %v6101_v20 = vld [vmem:[%s12327_s23 + $0x580] sm:$0xf]  ;;  %1298 = vmatmul.bf16.vlgmr.msra.gmra.mxu1 %v8880_v8  ;;  %v7851_v21 = vld [vmem:[%s12327_s23 + $0x58c] sm:$0xf0]  ;;  %v5974_v25 = vor.u32 %v7819_v19, %v5973_v18  ;;  %v7677_v0 = vld [vmem:[%s12327_s23 + $0x24] sm:$0xf]  ;;  %v5562_v4 = vor.u32 %v7713_v53, %v5559_v56 }
  0x37   :  { %1388 = vmatpush.bf16.msra.mxu2 %v5642_v63  ;;  %v6102_v28 = vor.u32 %v7851_v21, %v6101_v20  ;;  %v5957_v30 = vld [vmem:[%s12327_s23 + $0x460] sm:$0xf]  ;;  %v7815_v31 = vld [vmem:[%s12327_s23 + $0x46c] sm:$0xf0]  ;;  %v5415_v1 = vld [vmem:[%s12327_s23 + $0x30] sm:$0xf0] }
  0x38   :  { %1334 = vmatpush.bf16.msrb.mxu0 %v5990_v13  ;;  %v6085_v32 = vld [vmem:[%s12327_s23 + $0x560] sm:$0xf]  ;;  %v7847_v33 = vld [vmem:[%s12327_s23 + $0x56c] sm:$0xf0]  ;;  %v5958_v39 = vor.u32 %v7815_v31, %v5957_v30  ;;  %v7709_v2 = vld [vmem:[%s12327_s23 + $0x124] sm:$0xf]  ;;  %v5418_v11 = vor.u32 %v7677_v0, %v5415_v1 }
  0x39   :  { %1348 = vmatpush.bf16.msrb.mxu1 %v6118_v16  ;;  %v71_v36 = vld [vmem:[%s12328_s24 + $0x30] sm:$0xff]  ;;  %v6086_v42 = vor.u32 %v7847_v33, %v6085_v32  ;;  %v5941_v44 = vld [vmem:[%s12327_s23 + $0x440] sm:$0xf]  ;;  %v7673_v13 = vld [vmem:[%s12327_s23 + $0x4] sm:$0xf] }
  0x3a   :  { %1376 = vmatpush.bf16.msrb.mxu3 %v5482_v17  ;;  %v7811_v45 = vld [vmem:[%s12327_s23 + $0x44c] sm:$0xf0]  ;;  %v6069_v46 = vld [vmem:[%s12327_s23 + $0x540] sm:$0xf]  ;;  %v8971_v50 = vpack.c.bf16 %v78_v37, %v71_v36  ;;  %v5543_v3 = vld [vmem:[%s12327_s23 + $0x130] sm:$0xf0] }
  0x3b   :  { %1389 = vmatpush.bf16.msra.mxu2 %v5626_v12  ;;  %v7843_v47 = vld [vmem:[%s12327_s23 + $0x54c] sm:$0xf0]  ;;  %v5942_v52 = vor.u32 %v7811_v45, %v5941_v44  ;;  %v5925_v59 = vld [vmem:[%s12327_s23 + $0x420] sm:$0xf]  ;;  %v5399_v14 = vld [vmem:[%s12327_s23 + $0x10] sm:$0xf0]  ;;  %v5546_v21 = vor.u32 %v7709_v2, %v5543_v3 }
  0x3c   :  { %1335 = vmatpush.bf16.msrb.mxu0 %v5974_v25  ;;  %v6070_v57 = vor.u32 %v7843_v47, %v6069_v46  ;;  %v7807_v61 = vld [vmem:[%s12327_s23 + $0x42c] sm:$0xf0]  ;;  %v6053_v62 = vld [vmem:[%s12327_s23 + $0x520] sm:$0xf]  ;;  %v7765_v15 = vld [vmem:[%s12327_s23 + $0x2e4] sm:$0xf]  ;;  %v5402_v27 = vor.u32 %v7673_v13, %v5399_v14 }
  0x3d   :  { %1349 = vmatpush.bf16.msrb.mxu1 %v6102_v28  ;;  %v7839_v63 = vld [vmem:[%s12327_s23 + $0x52c] sm:$0xf0]  ;;  %v5926_v5 = vor.u32 %v7807_v61, %v5925_v59  ;;  %v5909_v6 = vld [vmem:[%s12327_s23 + $0x400] sm:$0xf]  ;;  %v5767_v16 = vld [vmem:[%s12327_s23 + $0x2f0] sm:$0xf0] }
  0x3e   :  { %1377 = vmatpush.bf16.msrb.mxu3 %v5466_v29  ;;  %v7803_v7 = vld [vmem:[%s12327_s23 + $0x40c] sm:$0xf0]  ;;  %v6037_v9 = vld [vmem:[%s12327_s23 + $0x500] sm:$0xf]  ;;  %v6054_v10 = vor.u32 %v7839_v63, %v6053_v62  ;;  %v7797_v17 = vld [vmem:[%s12327_s23 + $0x3e4] sm:$0xf]  ;;  %v5770_v31 = vor.u32 %v7765_v15, %v5767_v16 }
  0x3f   :  { %1390 = vmatpush.bf16.msra.mxu2 %v5610_v24  ;;  %v7835_v12 = vld [vmem:[%s12327_s23 + $0x50c] sm:$0xf0]  ;;  %v5895_v18 = vld [vmem:[%s12327_s23 + $0x3f0] sm:$0xf0]  ;;  %v7829_v19 = vld [vmem:[%s12327_s23 + $0x4e4] sm:$0xf]  ;;  %v5910_v22 = vor.u32 %v7803_v7, %v5909_v6 }
  0x40   :  { %1336 = vmatpush.bf16.msrb.mxu0 %v5958_v39  ;;  %v6023_v20 = vld [vmem:[%s12327_s23 + $0x4f0] sm:$0xf0]  ;;  %v69_v23 = vld [vmem:[%s12328_s24 + $0x20] sm:$0xff]  ;;  %v76_v24 = vld [vmem:[%s12328_s24 + $0x58] sm:$0xff]  ;;  %v6038_v26 = vor.u32 %v7835_v12, %v6037_v9  ;;  %v5898_v32 = vor.u32 %v7797_v17, %v5895_v18 }
  0x41   :  { %1350 = vmatpush.bf16.msrb.mxu1 %v6086_v42  ;;  %6179 = vmatmul.msk.bf16.vlgmr.msrb.gmra.mxu2 %vm1272_vm0, %v8971_v50  ;;  %v7705_v25 = vld [vmem:[%s12327_s23 + $0x104] sm:$0xf]  ;;  %v5527_v28 = vld [vmem:[%s12327_s23 + $0x110] sm:$0xf0]  ;;  %v70_v29 = vld [vmem:[%s12328_s24 + $0x28] sm:$0xff]  ;;  %v6026_v36 = vor.u32 %v7829_v19, %v6023_v20  ;;  %v9068_v37 = vpack.c.bf16 %v76_v24, %v69_v23 }
  0x42   :  { %1378 = vmatpush.bf16.msrb.mxu3 %v5450_v43  ;;  %v77_v30 = vld [vmem:[%s12328_s24 + $0x60] sm:$0xff]  ;;  %v6151_v34 = vld [vmem:[%s12327_s23 + $0x5f0] sm:$0xf0]  ;;  %v5530_v41 = vor.u32 %v7705_v25, %v5527_v28  ;;  %s12329_s24 = sld [smem:[#allocation4_spill]] }
  0x43   :  { %1391 = vmatpush.bf16.msra.mxu2 %v5594_v38  ;;  %v7861_v33 = vld [vmem:[%s12327_s23 + $0x5e4] sm:$0xf]  ;;  %v5751_v38 = vld [vmem:[%s12327_s23 + $0x2d0] sm:$0xf0]  ;;  %v9079_v42 = vpack.c.bf16 %v77_v30, %v70_v29 }
  0x44   :  { %1337 = vmatpush.bf16.msrb.mxu0 %v5942_v52  ;;  %v7761_v35 = vld [vmem:[%s12327_s23 + $0x2c4] sm:$0xf]  ;;  %v5879_v40 = vld [vmem:[%s12327_s23 + $0x3d0] sm:$0xf0]  ;;  %v6154_v45 = vor.u32 %v7861_v33, %v6151_v34 }
  0x45   :  { %1351 = vmatpush.bf16.msrb.mxu1 %v6070_v57  ;;  %v7793_v39 = vld [vmem:[%s12327_s23 + $0x3c4] sm:$0xf]  ;;  %v6007_v44 = vld [vmem:[%s12327_s23 + $0x4d0] sm:$0xf0]  ;;  %v5754_v46 = vor.u32 %v7761_v35, %v5751_v38 }
  0x46   :  { %1379 = vmatpush.bf16.msrb.mxu3 %v5434_v58  ;;  %v7825_v43 = vld [vmem:[%s12327_s23 + $0x4c4] sm:$0xf]  ;;  %v5882_v47 = vor.u32 %v7793_v39, %v5879_v40  ;;  %v6135_v49 = vld [vmem:[%s12327_s23 + $0x5d0] sm:$0xf0] }
  0x47   :  { %1392 = vmatpush.bf16.msra.mxu2 %v5578_v51  ;;  %v7857_v48 = vld [vmem:[%s12327_s23 + $0x5c4] sm:$0xf]  ;;  %v6010_v52 = vor.u32 %v7825_v43, %v6007_v44  ;;  %v5735_v53 = vld [vmem:[%s12327_s23 + $0x2b0] sm:$0xf0] }
  0x48   :  { %1338 = vmatpush.bf16.msrb.mxu0 %v5926_v5  ;;  %v7757_v51 = vld [vmem:[%s12327_s23 + $0x2a4] sm:$0xf]  ;;  %v5863_v57 = vld [vmem:[%s12327_s23 + $0x3b0] sm:$0xf0]  ;;  %v6138_v61 = vor.u32 %v7857_v48, %v6135_v49 }
  0x49   :  { %1352 = vmatpush.bf16.msrb.mxu1 %v6054_v10  ;;  %v7789_v56 = vld [vmem:[%s12327_s23 + $0x3a4] sm:$0xf]  ;;  %v5991_v59 = vld [vmem:[%s12327_s23 + $0x4b0] sm:$0xf0]  ;;  %v5738_v62 = vor.u32 %v7757_v51, %v5735_v53 }
  0x4a   :  { %1380 = vmatpush.bf16.msrb.mxu3 %v5418_v11  ;;  %v7821_v58 = vld [vmem:[%s12327_s23 + $0x4a4] sm:$0xf]  ;;  %v5866_v63 = vor.u32 %v7789_v56, %v5863_v57  ;;  %v6119_v1 = vld [vmem:[%s12327_s23 + $0x5b0] sm:$0xf0] }
  0x4b   :  { %1393 = vmatpush.bf16.msra.mxu2 %v5562_v4  ;;  %v7853_v0 = vld [vmem:[%s12327_s23 + $0x5a4] sm:$0xf]  ;;  %v5994_v3 = vor.u32 %v7821_v58, %v5991_v59  ;;  %v5719_v4 = vld [vmem:[%s12327_s23 + $0x290] sm:$0xf0] }
  0x4c   :  { %1339 = vmatpush.bf16.msrb.mxu0 %v5910_v22  ;;  %v7753_v2 = vld [vmem:[%s12327_s23 + $0x284] sm:$0xf]  ;;  %v5847_v6 = vld [vmem:[%s12327_s23 + $0x390] sm:$0xf0]  ;;  %v6122_v10 = vor.u32 %v7853_v0, %v6119_v1  ;;  %v5517_v0 = vld [vmem:[%s12327_s23 + $0xe8] sm:$0xf] }
  0x4d   :  { %1353 = vmatpush.bf16.msrb.mxu1 %v6038_v26  ;;  %v7785_v5 = vld [vmem:[%s12327_s23 + $0x384] sm:$0xf]  ;;  %v5975_v9 = vld [vmem:[%s12327_s23 + $0x490] sm:$0xf0]  ;;  %v5722_v11 = vor.u32 %v7753_v2, %v5719_v4  ;;  %v7704_v1 = vld [vmem:[%s12327_s23 + $0xf4] sm:$0xf0] }
  0x4e   :  { %1381 = vmatpush.bf16.msrb.mxu3 %v5402_v27  ;;  %v7817_v7 = vld [vmem:[%s12327_s23 + $0x484] sm:$0xf]  ;;  %v5850_v12 = vor.u32 %v7785_v5, %v5847_v6  ;;  %v6103_v14 = vld [vmem:[%s12327_s23 + $0x590] sm:$0xf0]  ;;  %v5645_v2 = vld [vmem:[%s12327_s23 + $0x1e8] sm:$0xf] }
  0x4f   :  { %1394 = vmatpush.bf16.msra.mxu2 %v5546_v21  ;;  %1340 = vmatmul.bf16.vlgmr.msrb.gmra.mxu0 %v9068_v37  ;;  %v7849_v13 = vld [vmem:[%s12327_s23 + $0x584] sm:$0xf]  ;;  %v5978_v16 = vor.u32 %v7817_v7, %v5975_v9  ;;  %v5703_v17 = vld [vmem:[%s12327_s23 + $0x270] sm:$0xf0]  ;;  %v7736_v4 = vld [vmem:[%s12327_s23 + $0x1f4] sm:$0xf0] }
  0x50   :  { %1402 = vmatpush.bf16.msra.mxu0 %v5770_v31  ;;  %1354 = vmatmul.bf16.vlgmr.msrb.gmra.mxu1 %v9079_v42  ;;  %v7749_v15 = vld [vmem:[%s12327_s23 + $0x264] sm:$0xf]  ;;  %v5831_v19 = vld [vmem:[%s12327_s23 + $0x370] sm:$0xf0]  ;;  %v6106_v22 = vor.u32 %v7849_v13, %v6103_v14  ;;  %v5518_v13 = vor.u32 %v7704_v1, %v5517_v0  ;;  %v5773_v14 = vld [vmem:[%s12327_s23 + $0x2e8] sm:$0xf] }
  0x51   :  { %1416 = vmatpush.bf16.msra.mxu1 %v5898_v32  ;;  %1382 = vmatmul.bf16.vlgmr.msrb.gmra.mxu3 %v8844_v55  ;;  %v7781_v18 = vld [vmem:[%s12327_s23 + $0x364] sm:$0xf]  ;;  %v5959_v21 = vld [vmem:[%s12327_s23 + $0x470] sm:$0xf0]  ;;  %v5706_v23 = vor.u32 %v7749_v15, %v5703_v17  ;;  %v7768_v15 = vld [vmem:[%s12327_s23 + $0x2f4] sm:$0xf0]  ;;  %v5646_v17 = vor.u32 %v7736_v4, %v5645_v2 }
  0x52   :  { %1430 = vmatpush.bf16.msra.mxu3 %v6026_v36  ;;  %v7813_v20 = vld [vmem:[%s12327_s23 + $0x464] sm:$0xf]  ;;  %v5834_v24 = vor.u32 %v7781_v18, %v5831_v19  ;;  %v6087_v26 = vld [vmem:[%s12327_s23 + $0x570] sm:$0xf0]  ;;  %v7800_v19 = vld [vmem:[%s12327_s23 + $0x3f4] sm:$0xf0] }
  0x53   :  { %1395 = vmatpush.bf16.msra.mxu2 %v5530_v41  ;;  %v7845_v25 = vld [vmem:[%s12327_s23 + $0x564] sm:$0xf]  ;;  %v5962_v28 = vor.u32 %v7813_v20, %v5959_v21  ;;  %v5687_v29 = vld [vmem:[%s12327_s23 + $0x250] sm:$0xf0]  ;;  %v5501_v20 = vld [vmem:[%s12327_s23 + $0xc8] sm:$0xf] }
  0x54   :  { %1403 = vmatpush.bf16.msra.mxu0 %v5754_v46  ;;  %v7745_v27 = vld [vmem:[%s12327_s23 + $0x244] sm:$0xf]  ;;  %v5815_v31 = vld [vmem:[%s12327_s23 + $0x350] sm:$0xf0]  ;;  %v6090_v34 = vor.u32 %v7845_v25, %v6087_v26  ;;  %v7700_v21 = vld [vmem:[%s12327_s23 + $0xd4] sm:$0xf0]  ;;  %v5774_v25 = vor.u32 %v7768_v15, %v5773_v14 }
  0x55   :  { %1417 = vmatpush.bf16.msra.mxu1 %v5882_v47  ;;  %v7777_v30 = vld [vmem:[%s12327_s23 + $0x344] sm:$0xf]  ;;  %v5943_v33 = vld [vmem:[%s12327_s23 + $0x450] sm:$0xf0]  ;;  %v5690_v35 = vor.u32 %v7745_v27, %v5687_v29  ;;  %v5502_v27 = vor.u32 %v7700_v21, %v5501_v20  ;;  %v7764_v29 = vld [vmem:[%s12327_s23 + $0x2d4] sm:$0xf0] }
  0x56   :  { %1431 = vmatpush.bf16.msra.mxu3 %v6010_v52  ;;  %1396 = vmatmul.bf16.vlgmr.msra.gmra.mxu2 %v8880_v8  ;;  %v7809_v32 = vld [vmem:[%s12327_s23 + $0x444] sm:$0xf]  ;;  %v5818_v36 = vor.u32 %v7777_v30, %v5815_v31  ;;  %v6071_v39 = vld [vmem:[%s12327_s23 + $0x550] sm:$0xf0]  ;;  %v5885_v30 = vld [vmem:[%s12327_s23 + $0x3c8] sm:$0xf] }
  0x57   :  { %1444 = vmatpush.bf16.msrb.mxu2 %v6154_v45  ;;  %v7841_v38 = vld [vmem:[%s12327_s23 + $0x544] sm:$0xf]  ;;  %v5946_v41 = vor.u32 %v7809_v32, %v5943_v33  ;;  %v5671_v43 = vld [vmem:[%s12327_s23 + $0x230] sm:$0xf0]  ;;  %v7796_v32 = vld [vmem:[%s12327_s23 + $0x3d4] sm:$0xf0] }
  0x58   :  { %1404 = vmatpush.bf16.msra.mxu0 %v5738_v62  ;;  %v7741_v40 = vld [vmem:[%s12327_s23 + $0x224] sm:$0xf]  ;;  %v5799_v45 = vld [vmem:[%s12327_s23 + $0x330] sm:$0xf0]  ;;  %v6074_v48 = vor.u32 %v7841_v38, %v6071_v39  ;;  %v5485_v33 = vld [vmem:[%s12327_s23 + $0xa8] sm:$0xf]  ;;  %v5886_v39 = vor.u32 %v7796_v32, %v5885_v30 }
  0x59   :  { %1418 = vmatpush.bf16.msra.mxu1 %v5866_v63  ;;  %v7773_v44 = vld [vmem:[%s12327_s23 + $0x324] sm:$0xf]  ;;  %v5927_v47 = vld [vmem:[%s12327_s23 + $0x430] sm:$0xf0]  ;;  %v5674_v52 = vor.u32 %v7741_v40, %v5671_v43  ;;  %v7760_v43 = vld [vmem:[%s12327_s23 + $0x2b4] sm:$0xf0] }
  0x5a   :  { %1432 = vmatpush.bf16.msra.mxu3 %v5994_v3  ;;  %v7805_v46 = vld [vmem:[%s12327_s23 + $0x424] sm:$0xf]  ;;  %v6055_v51 = vld [vmem:[%s12327_s23 + $0x530] sm:$0xf0]  ;;  %v5802_v53 = vor.u32 %v7773_v44, %v5799_v45  ;;  %v5869_v44 = vld [vmem:[%s12327_s23 + $0x3a8] sm:$0xf] }
  0x5b   :  { %1445 = vmatpush.bf16.msrb.mxu2 %v6138_v61  ;;  %v7837_v49 = vld [vmem:[%s12327_s23 + $0x524] sm:$0xf]  ;;  %v5655_v57 = vld [vmem:[%s12327_s23 + $0x210] sm:$0xf0]  ;;  %v5930_v59 = vor.u32 %v7805_v46, %v5927_v47  ;;  %v7792_v46 = vld [vmem:[%s12327_s23 + $0x3b4] sm:$0xf0] }
  0x5c   :  { %1405 = vmatpush.bf16.msra.mxu0 %v5722_v11  ;;  %v7737_v56 = vld [vmem:[%s12327_s23 + $0x204] sm:$0xf]  ;;  %v5783_v61 = vld [vmem:[%s12327_s23 + $0x310] sm:$0xf0]  ;;  %v6058_v3 = vor.u32 %v7837_v49, %v6055_v51  ;;  %v5469_v47 = vld [vmem:[%s12327_s23 + $0x88] sm:$0xf] }
  0x5d   :  { %1419 = vmatpush.bf16.msra.mxu1 %v5850_v12  ;;  %v7769_v58 = vld [vmem:[%s12327_s23 + $0x304] sm:$0xf]  ;;  %v5911_v63 = vld [vmem:[%s12327_s23 + $0x410] sm:$0xf0]  ;;  %v5658_v7 = vor.u32 %v7737_v56, %v5655_v57  ;;  %v5597_v49 = vld [vmem:[%s12327_s23 + $0x188] sm:$0xf] }
  0x5e   :  { %1433 = vmatpush.bf16.msra.mxu3 %v5978_v16  ;;  %v7801_v62 = vld [vmem:[%s12327_s23 + $0x404] sm:$0xf]  ;;  %v6167_v6 = vld [vmem:[%s12327_s23 + $0x610] sm:$0xf0]  ;;  %v5786_v9 = vor.u32 %v7769_v58, %v5783_v61  ;;  %v5901_v16 = vld [vmem:[%s12327_s23 + $0x3e8] sm:$0xf] }
  0x5f   :  { %1446 = vmatpush.bf16.msrb.mxu2 %v6122_v10  ;;  %v7865_v5 = vld [vmem:[%s12327_s23 + $0x604] sm:$0xf]  ;;  %v6039_v11 = vld [vmem:[%s12327_s23 + $0x510] sm:$0xf0]  ;;  %v5914_v12 = vor.u32 %v7801_v62, %v5911_v63  ;;  %v5902_v26 = vor.u32 %v7800_v19, %v5901_v16  ;;  %v7724_v51 = vld [vmem:[%s12327_s23 + $0x194] sm:$0xf0] }
  0x60   :  { %1406 = vmatpush.bf16.msra.mxu0 %v5706_v23  ;;  %v7833_v10 = vld [vmem:[%s12327_s23 + $0x504] sm:$0xf]  ;;  %v6170_v18 = vor.u32 %v7865_v5, %v6167_v6  ;;  %v5629_v23 = vld [vmem:[%s12327_s23 + $0x1c8] sm:$0xf]  ;;  %v7756_v58 = vld [vmem:[%s12327_s23 + $0x294] sm:$0xf0]  ;;  %v5598_v61 = vor.u32 %v7724_v51, %v5597_v49 }
  0x61   :  { %1420 = vmatpush.bf16.msra.mxu1 %v5834_v24  ;;  %v7732_v24 = vld [vmem:[%s12327_s23 + $0x1d4] sm:$0xf0]  ;;  %v5725_v57 = vld [vmem:[%s12327_s23 + $0x288] sm:$0xf] }
  0x62   :  { %1434 = vmatpush.bf16.msra.mxu3 %v5962_v28  ;;  %v5757_v28 = vld [vmem:[%s12327_s23 + $0x2c8] sm:$0xf]  ;;  %v5630_v31 = vor.u32 %v7732_v24, %v5629_v23  ;;  %v7788_v62 = vld [vmem:[%s12327_s23 + $0x394] sm:$0xf0] }
  0x63   :  { %1447 = vmatpush.bf16.msrb.mxu2 %v6106_v22  ;;  %v6042_v22 = vor.u32 %v7833_v10, %v6039_v11  ;;  %v5758_v38 = vor.u32 %v7764_v29, %v5757_v28  ;;  %v5453_v63 = vld [vmem:[%s12327_s23 + $0x68] sm:$0xf]  ;;  %v7688_v0 = vld [vmem:[%s12327_s23 + $0x74] sm:$0xf0] }
  0x64   :  { %1407 = vmatpush.bf16.msra.mxu0 %v5690_v35  ;;  %v5613_v35 = vld [vmem:[%s12327_s23 + $0x1a8] sm:$0xf]  ;;  %v7720_v2 = vld [vmem:[%s12327_s23 + $0x174] sm:$0xf0]  ;;  %v5454_v5 = vor.u32 %v7688_v0, %v5453_v63 }
  0x65   :  { %1421 = vmatpush.bf16.msra.mxu1 %v5818_v36  ;;  %v7728_v36 = vld [vmem:[%s12327_s23 + $0x1b4] sm:$0xf0]  ;;  %v5581_v1 = vld [vmem:[%s12327_s23 + $0x168] sm:$0xf] }
  0x66   :  { %1435 = vmatpush.bf16.msra.mxu3 %v5946_v41  ;;  %v5741_v41 = vld [vmem:[%s12327_s23 + $0x2a8] sm:$0xf]  ;;  %v5614_v45 = vor.u32 %v7728_v36, %v5613_v35  ;;  %v5582_v10 = vor.u32 %v7720_v2, %v5581_v1  ;;  %v7784_v11 = vld [vmem:[%s12327_s23 + $0x374] sm:$0xf0] }
  0x67   :  { %1448 = vmatpush.bf16.msrb.mxu2 %v6090_v34  ;;  %v7696_v34 = vld [vmem:[%s12327_s23 + $0xb4] sm:$0xf0]  ;;  %v5709_v6 = vld [vmem:[%s12327_s23 + $0x268] sm:$0xf] }
  0x68   :  { %1408 = vmatpush.bf16.msra.mxu0 %v5674_v52  ;;  %v5486_v40 = vor.u32 %v7696_v34, %v5485_v33  ;;  %v5742_v52 = vor.u32 %v7760_v43, %v5741_v41  ;;  %v5565_v14 = vld [vmem:[%s12327_s23 + $0x148] sm:$0xf]  ;;  %v7716_v15 = vld [vmem:[%s12327_s23 + $0x154] sm:$0xf0] }
  0x69   :  { %1422 = vmatpush.bf16.msra.mxu1 %v5802_v53  ;;  %v5870_v53 = vor.u32 %v7792_v46, %v5869_v44  ;;  %v5693_v19 = vld [vmem:[%s12327_s23 + $0x248] sm:$0xf]  ;;  %v7748_v20 = vld [vmem:[%s12327_s23 + $0x254] sm:$0xf0] }
  0x6a   :  { %1436 = vmatpush.bf16.msra.mxu3 %v5930_v59  ;;  %v5853_v59 = vld [vmem:[%s12327_s23 + $0x388] sm:$0xf]  ;;  %v7780_v23 = vld [vmem:[%s12327_s23 + $0x354] sm:$0xf0]  ;;  %v5694_v28 = vor.u32 %v7748_v20, %v5693_v19 }
  0x6b   :  { %1449 = vmatpush.bf16.msrb.mxu2 %v6074_v48  ;;  %v7692_v48 = vld [vmem:[%s12327_s23 + $0x94] sm:$0xf0]  ;;  %v5854_v4 = vor.u32 %v7788_v62, %v5853_v59  ;;  %v5821_v21 = vld [vmem:[%s12327_s23 + $0x348] sm:$0xf]  ;;  %v5519_v59 = vld [vmem:[%s12327_s23 + $0xf8] sm:$0xf0] }
  0x6c   :  { %1409 = vmatpush.bf16.msra.mxu0 %v5658_v7  ;;  %v5470_v56 = vor.u32 %v7692_v48, %v5469_v47  ;;  %v7752_v7 = vld [vmem:[%s12327_s23 + $0x274] sm:$0xf0]  ;;  %v5421_v24 = vld [vmem:[%s12327_s23 + $0x28] sm:$0xf]  ;;  %v5822_v30 = vor.u32 %v7780_v23, %v5821_v21  ;;  %v5631_v23 = vld [vmem:[%s12327_s23 + $0x1d8] sm:$0xf0] }
  0x6d   :  { %1423 = vmatpush.bf16.msra.mxu1 %v5786_v9  ;;  %v5837_v9 = vld [vmem:[%s12327_s23 + $0x368] sm:$0xf]  ;;  %v5710_v16 = vor.u32 %v7752_v7, %v5709_v6  ;;  %v7744_v32 = vld [vmem:[%s12327_s23 + $0x234] sm:$0xf0] }
  0x6e   :  { %1437 = vmatpush.bf16.msra.mxu3 %v5914_v12  ;;  %v5437_v12 = vld [vmem:[%s12327_s23 + $0x48] sm:$0xf]  ;;  %v7776_v34 = vld [vmem:[%s12327_s23 + $0x334] sm:$0xf0] }
  0x6f   :  { %1450 = vmatpush.bf16.msrb.mxu2 %v6058_v3  ;;  %1410 = vmatmul.bf16.vlgmr.msra.gmra.mxu0 %v8842_v54  ;;  %v5726_v3 = vor.u32 %v7756_v58, %v5725_v57  ;;  %v5677_v29 = vld [vmem:[%s12327_s23 + $0x228] sm:$0xf]  ;;  %v7832_v43 = vld [vmem:[%s12327_s23 + $0x4f4] sm:$0xf0]  ;;  %v7702_v58 = vld [vmem:[%s12327_s23 + $0xec] sm:$0xf] }
  0x70   :  { %1465 = vmatpush.bf16.msrb.mxu0 %v6170_v18  ;;  %1424 = vmatmul.bf16.vlgmr.msra.gmra.mxu1 %v8855_v60  ;;  %v5805_v33 = vld [vmem:[%s12327_s23 + $0x328] sm:$0xf]  ;;  %v5678_v44 = vor.u32 %v7744_v32, %v5677_v29  ;;  %v7864_v46 = vld [vmem:[%s12327_s23 + $0x5f4] sm:$0xf0]  ;;  %v5522_v6 = vor.u32 %v7702_v58, %v5519_v59 }
  0x71   :  { %1472 = vmatpush.bf16.msrb.mxu1 %v5518_v13  ;;  %1438 = vmatmul.bf16.vlgmr.msra.gmra.mxu3 %v9068_v37  ;;  %v7684_v13 = vld [vmem:[%s12327_s23 + $0x54] sm:$0xf0]  ;;  %v5405_v36 = vld [vmem:[%s12327_s23 + $0x8] sm:$0xf]  ;;  %v5806_v47 = vor.u32 %v7776_v34, %v5805_v33  ;;  %v7726_v34 = vld [vmem:[%s12327_s23 + $0x1ac] sm:$0xf] }
  0x72   :  { %1486 = vmatpush.bf16.msrb.mxu3 %v5646_v17  ;;  %v5838_v17 = vor.u32 %v7784_v11, %v5837_v9  ;;  %v5438_v18 = vor.u32 %v7684_v13, %v5437_v12  ;;  %v6029_v41 = vld [vmem:[%s12327_s23 + $0x4e8] sm:$0xf]  ;;  %v7740_v51 = vld [vmem:[%s12327_s23 + $0x214] sm:$0xf0]  ;;  %v7734_v9 = vld [vmem:[%s12327_s23 + $0x1ec] sm:$0xf] }
  0x73   :  { %1451 = vmatpush.bf16.msrb.mxu2 %v6042_v22  ;;  %v5566_v22 = vor.u32 %v7716_v15, %v5565_v14  ;;  %v5661_v49 = vld [vmem:[%s12327_s23 + $0x208] sm:$0xf]  ;;  %v7772_v57 = vld [vmem:[%s12327_s23 + $0x314] sm:$0xf0]  ;;  %v7698_v11 = vld [vmem:[%s12327_s23 + $0xcc] sm:$0xf] }
  0x74   :  { %1500 = vmatpush.bf16.msra.mxu0 %v5774_v25  ;;  %v7680_v25 = vld [vmem:[%s12327_s23 + $0x34] sm:$0xf0]  ;;  %v6013_v62 = vld [vmem:[%s12327_s23 + $0x4c8] sm:$0xf]  ;;  %v5662_v1 = vor.u32 %v7740_v51, %v5661_v49  ;;  %v5503_v14 = vld [vmem:[%s12327_s23 + $0xd8] sm:$0xf0] }
  0x75   :  { %1473 = vmatpush.bf16.msrb.mxu1 %v5502_v27  ;;  %v7712_v27 = vld [vmem:[%s12327_s23 + $0x134] sm:$0xf0]  ;;  %v6141_v0 = vld [vmem:[%s12327_s23 + $0x5c8] sm:$0xf]  ;;  %v5506_v20 = vor.u32 %v7698_v11, %v5503_v14  ;;  %v5599_v49 = vld [vmem:[%s12327_s23 + $0x198] sm:$0xf0] }
  0x76   :  { %1487 = vmatpush.bf16.msrb.mxu3 %v5630_v31  ;;  %1452 = vmatmul.bf16.vlgmr.msrb.gmra.mxu2 %v9079_v42  ;;  %v5422_v31 = vor.u32 %v7680_v25, %v5421_v24  ;;  %v7828_v63 = vld [vmem:[%s12327_s23 + $0x4d4] sm:$0xf0]  ;;  %v5997_v15 = vld [vmem:[%s12327_s23 + $0x4a8] sm:$0xf]  ;;  %v7694_v24 = vld [vmem:[%s12327_s23 + $0xac] sm:$0xf] }
  0x77   :  { %1514 = vmatpush.bf16.msra.mxu2 %v5902_v26  ;;  %v5549_v26 = vld [vmem:[%s12327_s23 + $0x128] sm:$0xf]  ;;  %v7860_v2 = vld [vmem:[%s12327_s23 + $0x5d4] sm:$0xf0]  ;;  %v6014_v7 = vor.u32 %v7828_v63, %v6013_v62  ;;  %v7686_v51 = vld [vmem:[%s12327_s23 + $0x6c] sm:$0xf] }
  0x78   :  { %1501 = vmatpush.bf16.msra.mxu0 %v5758_v38  ;;  %v5550_v35 = vor.u32 %v7712_v27, %v5549_v26  ;;  %v7676_v38 = vld [vmem:[%s12327_s23 + $0x14] sm:$0xf0]  ;;  %v6142_v12 = vor.u32 %v7860_v2, %v6141_v0  ;;  %v5487_v26 = vld [vmem:[%s12327_s23 + $0xb8] sm:$0xf0]  ;;  %v5981_v27 = vld [vmem:[%s12327_s23 + $0x488] sm:$0xf] }
  0x79   :  { %1474 = vmatpush.bf16.msrb.mxu1 %v5486_v40  ;;  %v7708_v40 = vld [vmem:[%s12327_s23 + $0x114] sm:$0xf0]  ;;  %v5406_v48 = vor.u32 %v7676_v38, %v5405_v36  ;;  %v6109_v29 = vld [vmem:[%s12327_s23 + $0x588] sm:$0xf]  ;;  %v5490_v32 = vor.u32 %v7694_v24, %v5487_v26  ;;  %v7690_v36 = vld [vmem:[%s12327_s23 + $0x8c] sm:$0xf] }
  0x7a   :  { %1488 = vmatpush.bf16.msrb.mxu3 %v5614_v45  ;;  %v6157_v45 = vld [vmem:[%s12327_s23 + $0x5e8] sm:$0xf]  ;;  %v7844_v59 = vld [vmem:[%s12327_s23 + $0x554] sm:$0xf0]  ;;  %v7718_v0 = vld [vmem:[%s12327_s23 + $0x16c] sm:$0xf] }
  0x7b   :  { %1515 = vmatpush.bf16.msra.mxu2 %v5886_v39  ;;  %v5533_v39 = vld [vmem:[%s12327_s23 + $0x108] sm:$0xf]  ;;  %v7682_v2 = vld [vmem:[%s12327_s23 + $0x4c] sm:$0xf]  ;;  %v5567_v14 = vld [vmem:[%s12327_s23 + $0x158] sm:$0xf0] }
  0x7c   :  { %1502 = vmatpush.bf16.msra.mxu0 %v5742_v52  ;;  %v5789_v52 = vld [vmem:[%s12327_s23 + $0x308] sm:$0xf]  ;;  %v7714_v11 = vld [vmem:[%s12327_s23 + $0x14c] sm:$0xf]  ;;  %v5903_v26 = vld [vmem:[%s12327_s23 + $0x3f8] sm:$0xf0] }
  0x7d   :  { %1475 = vmatpush.bf16.msrb.mxu1 %v5470_v56  ;;  %v6030_v56 = vor.u32 %v7832_v43, %v6029_v41  ;;  %v7816_v41 = vld [vmem:[%s12327_s23 + $0x474] sm:$0xf0]  ;;  %v6093_v43 = vld [vmem:[%s12327_s23 + $0x568] sm:$0xf]  ;;  %v5570_v24 = vor.u32 %v7714_v11, %v5567_v14  ;;  %v7786_v11 = vld [vmem:[%s12327_s23 + $0x38c] sm:$0xf] }
  0x7e   :  { %1489 = vmatpush.bf16.msrb.mxu3 %v5598_v61  ;;  %v6158_v61 = vor.u32 %v7864_v46, %v6157_v45  ;;  %v6077_v58 = vld [vmem:[%s12327_s23 + $0x548] sm:$0xf] }
  0x7f   :  { %1516 = vmatpush.bf16.msra.mxu2 %v5870_v53  ;;  %6180 = vmatmul.msk.bf16.vlgmr.msrb.gmra.mxu0 %vm1272_vm0, %v8971_v50  ;;  %v5534_v53 = vor.u32 %v7708_v40, %v5533_v39  ;;  %v5471_v39 = vld [vmem:[%s12327_s23 + $0x98] sm:$0xf0]  ;;  %v5965_v40 = vld [vmem:[%s12327_s23 + $0x468] sm:$0xf] }
  0x80   :  { %1503 = vmatpush.bf16.msra.mxu0 %v5726_v3  ;;  %v6173_v3 = vld [vmem:[%s12327_s23 + $0x608] sm:$0xf]  ;;  %v5474_v46 = vor.u32 %v7690_v36, %v5471_v39  ;;  %v7762_v39 = vld [vmem:[%s12327_s23 + $0x2cc] sm:$0xf] }
  0x81   :  { %1476 = vmatpush.bf16.msrb.mxu1 %v5454_v5  ;;  %v5790_v5 = vor.u32 %v7772_v57, %v5789_v52  ;;  %v7812_v57 = vld [vmem:[%s12327_s23 + $0x454] sm:$0xf0] }
  0x82   :  { %1490 = vmatpush.bf16.msrb.mxu3 %v5582_v10  ;;  %v5647_v10 = vld [vmem:[%s12327_s23 + $0x1f8] sm:$0xf0] }
  0x83   :  { %1517 = vmatpush.bf16.msra.mxu2 %v5854_v4  ;;  %v7868_v4 = vld [vmem:[%s12327_s23 + $0x614] sm:$0xf0]  ;;  %v5650_v19 = vor.u32 %v7734_v9, %v5647_v10 }
  0x84   :  { %1504 = vmatpush.bf16.msra.mxu0 %v5710_v16  ;;  %v6174_v13 = vor.u32 %v7868_v4, %v6173_v3  ;;  %v7824_v16 = vld [vmem:[%s12327_s23 + $0x4b4] sm:$0xf0]  ;;  %v6078_v3 = vor.u32 %v7844_v59, %v6077_v58  ;;  %v5439_v4 = vld [vmem:[%s12327_s23 + $0x58] sm:$0xf0]  ;;  %v7758_v58 = vld [vmem:[%s12327_s23 + $0x2ac] sm:$0xf] }
  0x85   :  { %1477 = vmatpush.bf16.msrb.mxu1 %v5438_v18  ;;  %v7856_v18 = vld [vmem:[%s12327_s23 + $0x5b4] sm:$0xf0]  ;;  %v5998_v21 = vor.u32 %v7824_v16, %v5997_v15  ;;  %v7678_v15 = vld [vmem:[%s12327_s23 + $0x2c] sm:$0xf]  ;;  %v5423_v16 = vld [vmem:[%s12327_s23 + $0x38] sm:$0xf0] }
  0x86   :  { %1491 = vmatpush.bf16.msrb.mxu3 %v5566_v22  ;;  %v7730_v22 = vld [vmem:[%s12327_s23 + $0x1cc] sm:$0xf]  ;;  %v7840_v9 = vld [vmem:[%s12327_s23 + $0x534] sm:$0xf0]  ;;  %v5743_v59 = vld [vmem:[%s12327_s23 + $0x2b8] sm:$0xf0] }
  0x87   :  { %1518 = vmatpush.bf16.msra.mxu2 %v5838_v17  ;;  %v6125_v17 = vld [vmem:[%s12327_s23 + $0x5a8] sm:$0xf] }
  0x88   :  { %1505 = vmatpush.bf16.msra.mxu0 %v5694_v28  ;;  %v6126_v25 = vor.u32 %v7856_v18, %v6125_v17  ;;  %v7820_v28 = vld [vmem:[%s12327_s23 + $0x494] sm:$0xf0]  ;;  %v5917_v18 = vld [vmem:[%s12327_s23 + $0x408] sm:$0xf] }
  0x89   :  { %1478 = vmatpush.bf16.msrb.mxu1 %v5422_v31  ;;  %v5634_v31 = vor.u32 %v7730_v22, %v5631_v23  ;;  %v5982_v33 = vor.u32 %v7820_v28, %v5981_v27  ;;  %v7766_v22 = vld [vmem:[%s12327_s23 + $0x2ec] sm:$0xf]  ;;  %v5775_v23 = vld [vmem:[%s12327_s23 + $0x2f8] sm:$0xf0]  ;;  %v5426_v27 = vor.u32 %v7678_v15, %v5423_v16 }
  0x8a   :  { %1492 = vmatpush.bf16.msrb.mxu3 %v5550_v35  ;;  %v5615_v35 = vld [vmem:[%s12327_s23 + $0x1b8] sm:$0xf0]  ;;  %v7854_v16 = vld [vmem:[%s12327_s23 + $0x5ac] sm:$0xf] }
  0x8b   :  { %1519 = vmatpush.bf16.msra.mxu2 %v5822_v30  ;;  %v7852_v30 = vld [vmem:[%s12327_s23 + $0x594] sm:$0xf0]  ;;  %v5618_v45 = vor.u32 %v7726_v34, %v5615_v35  ;;  %v5407_v34 = vld [vmem:[%s12327_s23 + $0x18] sm:$0xf0]  ;;  %v7830_v35 = vld [vmem:[%s12327_s23 + $0x4ec] sm:$0xf] }
  0x8c   :  { %1506 = vmatpush.bf16.msra.mxu0 %v5678_v44  ;;  %v6110_v38 = vor.u32 %v7852_v30, %v6109_v29  ;;  %v7848_v44 = vld [vmem:[%s12327_s23 + $0x574] sm:$0xf0]  ;;  %v7710_v29 = vld [vmem:[%s12327_s23 + $0x12c] sm:$0xf]  ;;  %v5551_v30 = vld [vmem:[%s12327_s23 + $0x138] sm:$0xf0] }
  0x8d   :  { %1479 = vmatpush.bf16.msrb.mxu1 %v5406_v48  ;;  %v7722_v48 = vld [vmem:[%s12327_s23 + $0x18c] sm:$0xf]  ;;  %v6094_v52 = vor.u32 %v7848_v44, %v6093_v43  ;;  %v5887_v44 = vld [vmem:[%s12327_s23 + $0x3d8] sm:$0xf0] }
  0x8e   :  { %1493 = vmatpush.bf16.msrb.mxu3 %v5534_v53  ;;  %v5455_v53 = vld [vmem:[%s12327_s23 + $0x78] sm:$0xf0]  ;;  %v7794_v43 = vld [vmem:[%s12327_s23 + $0x3cc] sm:$0xf] }
  0x8f   :  { %1520 = vmatpush.bf16.msra.mxu2 %v5806_v47  ;;  %v5966_v47 = vor.u32 %v7816_v41, %v5965_v40  ;;  %v5458_v62 = vor.u32 %v7686_v51, %v5455_v53  ;;  %v5759_v40 = vld [vmem:[%s12327_s23 + $0x2d8] sm:$0xf0]  ;;  %v5554_v41 = vor.u32 %v7710_v29, %v5551_v30  ;;  %v7862_v51 = vld [vmem:[%s12327_s23 + $0x5ec] sm:$0xf] }
  0x90   :  { %1507 = vmatpush.bf16.msra.mxu0 %v5662_v1  ;;  %1480 = vmatmul.bf16.vlgmr.msrb.gmra.mxu1 %v8844_v55  ;;  %v5583_v1 = vld [vmem:[%s12327_s23 + $0x178] sm:$0xf0]  ;;  %v7826_v53 = vld [vmem:[%s12327_s23 + $0x4cc] sm:$0xf] }
  0x91   :  { %1528 = vmatpush.bf16.msra.mxu1 %v6030_v56  ;;  %1494 = vmatmul.bf16.vlgmr.msrb.gmra.mxu3 %v8880_v8  ;;  %v5949_v56 = vld [vmem:[%s12327_s23 + $0x448] sm:$0xf]  ;;  %v5586_v10 = vor.u32 %v7718_v0, %v5583_v1  ;;  %v5967_v30 = vld [vmem:[%s12327_s23 + $0x478] sm:$0xf0] }
  0x92   :  { %1542 = vmatpush.bf16.msra.mxu3 %v6158_v61  ;;  %v5602_v61 = vor.u32 %v7722_v48, %v5599_v49  ;;  %v5950_v63 = vor.u32 %v7812_v57, %v5949_v56  ;;  %v5762_v49 = vor.u32 %v7762_v39, %v5759_v40  ;;  %v5890_v56 = vor.u32 %v7794_v43, %v5887_v44  ;;  %v6015_v57 = vld [vmem:[%s12327_s23 + $0x4d8] sm:$0xf0]  ;;  %v7846_v39 = vld [vmem:[%s12327_s23 + $0x56c] sm:$0xf] }
  0x93   :  { %1521 = vmatpush.bf16.msra.mxu2 %v5790_v5  ;;  %1508 = vmatmul.bf16.vlgmr.msra.gmra.mxu0 %v8842_v54  ;;  %v5933_v5 = vld [vmem:[%s12327_s23 + $0x428] sm:$0xf]  ;;  %v6018_v1 = vor.u32 %v7826_v53, %v6015_v57  ;;  %v6095_v40 = vld [vmem:[%s12327_s23 + $0x578] sm:$0xf0] }
  0x94   :  { %1563 = vmatpush.bf16.msrb.mxu0 %v6174_v13  ;;  %v5951_v44 = vld [vmem:[%s12327_s23 + $0x458] sm:$0xf0] }
  0x95   :  { %1529 = vmatpush.bf16.msra.mxu1 %v6014_v7  ;;  %v6061_v7 = vld [vmem:[%s12327_s23 + $0x528] sm:$0xf]  ;;  %v6079_v57 = vld [vmem:[%s12327_s23 + $0x558] sm:$0xf0] }
  0x96   :  { %1543 = vmatpush.bf16.msra.mxu3 %v6142_v12  ;;  %1522 = vmatmul.bf16.vlgmr.msra.gmra.mxu2 %v8855_v60  ;;  %v5442_v12 = vor.u32 %v7682_v2, %v5439_v4  ;;  %v6062_v17 = vor.u32 %v7840_v9, %v6061_v7  ;;  %v5746_v2 = vor.u32 %v7758_v58, %v5743_v59  ;;  %v6143_v4 = vld [vmem:[%s12327_s23 + $0x5d8] sm:$0xf0]  ;;  %v7754_v9 = vld [vmem:[%s12327_s23 + $0x28c] sm:$0xf] }
  0x97   :  { %1570 = vmatpush.bf16.msrb.mxu2 %v5522_v6  ;;  %v7808_v6 = vld [vmem:[%s12327_s23 + $0x434] sm:$0xf0]  ;;  %v5999_v7 = vld [vmem:[%s12327_s23 + $0x4b8] sm:$0xf0]  ;;  %v7806_v58 = vld [vmem:[%s12327_s23 + $0x42c] sm:$0xf] }
  0x98   :  { %1584 = vmatpush.bf16.msra.mxu0 %v5650_v19  ;;  %v5934_v13 = vor.u32 %v7808_v6, %v5933_v5  ;;  %v7804_v19 = vld [vmem:[%s12327_s23 + $0x414] sm:$0xf0]  ;;  %v7822_v5 = vld [vmem:[%s12327_s23 + $0x4ac] sm:$0xf]  ;;  %v5935_v59 = vld [vmem:[%s12327_s23 + $0x438] sm:$0xf0] }
  0x99   :  { %1530 = vmatpush.bf16.msra.mxu1 %v5998_v21  ;;  %v7836_v21 = vld [vmem:[%s12327_s23 + $0x514] sm:$0xf0]  ;;  %v5918_v28 = vor.u32 %v7804_v19, %v5917_v18  ;;  %v6002_v14 = vor.u32 %v7822_v5, %v5999_v7  ;;  %v7818_v18 = vld [vmem:[%s12327_s23 + $0x48c] sm:$0xf]  ;;  %v5983_v19 = vld [vmem:[%s12327_s23 + $0x498] sm:$0xf0] }
  0x9a   :  { %1544 = vmatpush.bf16.msra.mxu3 %v6126_v25  ;;  %v7798_v25 = vld [vmem:[%s12327_s23 + $0x3ec] sm:$0xf]  ;;  %v6175_v5 = vld [vmem:[%s12327_s23 + $0x618] sm:$0xf0] }
  0x9b   :  { %1571 = vmatpush.bf16.msrb.mxu2 %v5506_v20  ;;  %v6045_v20 = vld [vmem:[%s12327_s23 + $0x508] sm:$0xf]  ;;  %v5906_v36 = vor.u32 %v7798_v25, %v5903_v26  ;;  %v5986_v25 = vor.u32 %v7818_v18, %v5983_v19  ;;  %v5919_v18 = vld [vmem:[%s12327_s23 + $0x418] sm:$0xf0] }
  0x9c   :  { %1585 = vmatpush.bf16.msra.mxu0 %v5634_v31  ;;  %v6046_v31 = vor.u32 %v7836_v21, %v6045_v20  ;;  %v7750_v20 = vld [vmem:[%s12327_s23 + $0x26c] sm:$0xf]  ;;  %v5711_v21 = vld [vmem:[%s12327_s23 + $0x278] sm:$0xf0] }
  0x9d   :  { %1531 = vmatpush.bf16.msra.mxu1 %v5982_v33  ;;  %v7674_v33 = vld [vmem:[%s12327_s23 + $0xc] sm:$0xf]  ;;  %v5714_v26 = vor.u32 %v7750_v20, %v5711_v21  ;;  %v6305_v20 = vld [vmem:[%s12330_s26 + $0xf0] sm:$0xf]  ;;  %v7900_v21 = vld [vmem:[%s12330_s26 + $0xf4] sm:$0xf0] }
  0x9e   :  { %1545 = vmatpush.bf16.msra.mxu3 %v6110_v38  ;;  %v6031_v38 = vld [vmem:[%s12327_s23 + $0x4f8] sm:$0xf0] }
  0x9f   :  { %1572 = vmatpush.bf16.msrb.mxu2 %v5490_v32  ;;  %v5778_v32 = vor.u32 %v7766_v22, %v5775_v23  ;;  %v6034_v48 = vor.u32 %v7830_v35, %v6031_v38  ;;  %v7782_v22 = vld [vmem:[%s12327_s23 + $0x36c] sm:$0xf]  ;;  %v5839_v23 = vld [vmem:[%s12327_s23 + $0x378] sm:$0xf0] }
  0xa0   :  { %1586 = vmatpush.bf16.msra.mxu0 %v5618_v45  ;;  %v5410_v45 = vor.u32 %v7674_v33, %v5407_v34  ;;  %v5842_v29 = vor.u32 %v7782_v22, %v5839_v23  ;;  %v7778_v33 = vld [vmem:[%s12327_s23 + $0x34c] sm:$0xf]  ;;  %v5823_v34 = vld [vmem:[%s12327_s23 + $0x358] sm:$0xf0]  ;;  %v6233_v23 = vld [vmem:[%s12330_s26 + $0x60] sm:$0xf] }
  0xa1   :  { %1532 = vmatpush.bf16.msra.mxu1 %v5966_v47  ;;  %v5535_v47 = vld [vmem:[%s12327_s23 + $0x118] sm:$0xf0]  ;;  %v5826_v43 = vor.u32 %v7778_v33, %v5823_v34  ;;  %v6225_v34 = vld [vmem:[%s12330_s26 + $0x50] sm:$0xf] }
  0xa2   :  { %1546 = vmatpush.bf16.msra.mxu3 %v6094_v52  ;;  %v6159_v52 = vld [vmem:[%s12327_s23 + $0x5f8] sm:$0xf0] }
  0xa3   :  { %1573 = vmatpush.bf16.msrb.mxu2 %v5474_v46  ;;  %6181 = vmatmul.msk.bf16.vlgmr.msrb.gmra.mxu0 %vm1272_vm0, %v8971_v50  ;;  %v7706_v46 = vld [vmem:[%s12327_s23 + $0x10c] sm:$0xf]  ;;  %v6162_v0 = vor.u32 %v7862_v51, %v6159_v52  ;;  %v9809_v52 = vld [vmem:[%s12329_s24] sm:$0xf]  ;;  %s12331_s24 = sld [smem:[#allocation6_spill]] }
  0xa4   :  { %1587 = vmatpush.bf16.msra.mxu0 %v5602_v61  ;;  %v5538_v61 = vor.u32 %v7706_v46, %v5535_v47  ;;  %v5679_v46 = vld [vmem:[%s12327_s23 + $0x238] sm:$0xf0]  ;;  %v7774_v47 = vld [vmem:[%s12327_s23 + $0x32c] sm:$0xf] }
  0xa5   :  { %1533 = vmatpush.bf16.msra.mxu1 %v5950_v63  ;;  %v5871_v63 = vld [vmem:[%s12327_s23 + $0x3b8] sm:$0xf0]  ;;  %v7842_v51 = vld [vmem:[%s12327_s23 + $0x54c] sm:$0xf] }
  0xa6   :  { %1547 = vmatpush.bf16.msra.mxu3 %v6078_v3  ;;  %v7858_v3 = vld [vmem:[%s12327_s23 + $0x5cc] sm:$0xf]  ;;  %v6082_v7 = vor.u32 %v7842_v51, %v6079_v57  ;;  %v6209_v57 = vld [vmem:[%s12330_s26 + $0x30] sm:$0xf] }
  0xa7   :  { %1574 = vmatpush.bf16.msrb.mxu2 %v5458_v62  ;;  %v7790_v62 = vld [vmem:[%s12327_s23 + $0x3ac] sm:$0xf] }
  0xa8   :  { %1588 = vmatpush.bf16.msra.mxu0 %v5586_v10  ;;  %v5874_v6 = vor.u32 %v7790_v62, %v5871_v63  ;;  %v5727_v10 = vld [vmem:[%s12327_s23 + $0x298] sm:$0xf0]  ;;  %v7738_v63 = vld [vmem:[%s12327_s23 + $0x20c] sm:$0xf] }
  0xa9   :  { %1534 = vmatpush.bf16.msra.mxu1 %v5934_v13  ;;  %v6146_v13 = vor.u32 %v7858_v3, %v6143_v4  ;;  %v5730_v15 = vor.u32 %v7754_v9, %v5727_v10  ;;  %v5791_v3 = vld [vmem:[%s12327_s23 + $0x318] sm:$0xf0]  ;;  %v7866_v4 = vld [vmem:[%s12327_s23 + $0x60c] sm:$0xf]  ;;  %v6241_v9 = vld [vmem:[%s12330_s26 + $0x70] sm:$0xf] }
  0xaa   :  { %1548 = vmatpush.bf16.msra.mxu3 %v6062_v17  ;;  %v6127_v17 = vld [vmem:[%s12327_s23 + $0x5b8] sm:$0xf0]  ;;  %v7884_v10 = vld [vmem:[%s12330_s26 + $0x74] sm:$0xf0] }
  0xab   :  { %1575 = vmatpush.bf16.msrb.mxu2 %v5442_v12  ;;  %v5855_v12 = vld [vmem:[%s12327_s23 + $0x398] sm:$0xf0]  ;;  %v6242_v19 = vor.u32 %v7884_v10, %v6241_v9 }
  0xac   :  { %1589 = vmatpush.bf16.msra.mxu0 %v5570_v24  ;;  %v6130_v24 = vor.u32 %v7854_v16, %v6127_v17  ;;  %v7802_v17 = vld [vmem:[%s12327_s23 + $0x40c] sm:$0xf] }
  0xad   :  { %1535 = vmatpush.bf16.msra.mxu1 %v5918_v28  ;;  %v7814_v28 = vld [vmem:[%s12327_s23 + $0x46c] sm:$0xf] }
  0xae   :  { %1549 = vmatpush.bf16.msra.mxu3 %v6046_v31  ;;  %v7746_v31 = vld [vmem:[%s12327_s23 + $0x24c] sm:$0xf] }
  0xaf   :  { %1576 = vmatpush.bf16.msrb.mxu2 %v5426_v27  ;;  %v7850_v27 = vld [vmem:[%s12327_s23 + $0x58c] sm:$0xf] }
  0xb0   :  { %1590 = vmatpush.bf16.msra.mxu0 %v5554_v41  ;;  %1536 = vmatmul.bf16.vlgmr.msra.gmra.mxu1 %v9068_v37  ;;  %v7810_v41 = vld [vmem:[%s12327_s23 + $0x44c] sm:$0xf] }
  0xb1   :  { %1598 = vmatpush.bf16.msrb.mxu1 %v5778_v32  ;;  %1550 = vmatmul.bf16.vlgmr.msra.gmra.mxu3 %v9079_v42  ;;  %v5695_v32 = vld [vmem:[%s12327_s23 + $0x258] sm:$0xf0]  ;;  %v5954_v53 = vor.u32 %v7810_v41, %v5951_v44  ;;  %v6289_v44 = vld [vmem:[%s12330_s26 + $0xd0] sm:$0xf] }
  0xb2   :  { %1612 = vmatpush.bf16.msrb.mxu3 %v5906_v36  ;;  %v5970_v36 = vor.u32 %v7814_v28, %v5967_v30  ;;  %v5698_v38 = vor.u32 %v7746_v31, %v5695_v32  ;;  %v6306_v28 = vor.u32 %v7900_v21, %v6305_v20  ;;  %v6297_v30 = vld [vmem:[%s12330_s26 + $0xe0] sm:$0xf]  ;;  %v7898_v31 = vld [vmem:[%s12330_s26 + $0xe4] sm:$0xf0]  ;;  %v7888_v21 = vld [vmem:[%s12330_s26 + $0x94] sm:$0xf0] }
  0xb3   :  { %1577 = vmatpush.bf16.msrb.mxu2 %v5410_v45  ;;  %v7742_v45 = vld [vmem:[%s12327_s23 + $0x22c] sm:$0xf]  ;;  %v6298_v41 = vor.u32 %v7898_v31, %v6297_v30  ;;  %v6249_v31 = vld [vmem:[%s12330_s26 + $0x80] sm:$0xf] }
  0xb4   :  { %1591 = vmatpush.bf16.msra.mxu0 %v5538_v61  ;;  %v1285_v61 = vpop.f32.mrf.mxu0 }
  0xb5   :  { %1599 = vmatpush.bf16.msrb.mxu1 %v5762_v49  ;;  %v6098_v49 = vor.u32 %v7846_v39, %v6095_v40 }
  0xb6   :  { %1613 = vmatpush.bf16.msrb.mxu3 %v5890_v56  ;;  %1578 = vmatmul.bf16.vlgmr.msrb.gmra.mxu2 %v8844_v55  ;;  %v5858_v55 = vor.u32 %v7786_v11, %v5855_v12  ;;  %v5682_v56 = vor.u32 %v7742_v45, %v5679_v46  ;;  %v5938_v11 = vor.u32 %v7806_v58, %v5935_v59  ;;  %v1327_v39 = vpop.f32.mrf.mxu3  ;;  %v7896_v45 = vld [vmem:[%s12330_s26 + $0xd4] sm:$0xf0]  ;;  %v7878_v46 = vld [vmem:[%s12330_s26 + $0x44] sm:$0xf0] }
  0xb7   :  { %1626 = vmatpush.bf16.msra.mxu2 %v6034_v48  ;;  %1592 = vmatmul.bf16.vlgmr.msra.gmra.mxu0 %v8880_v8  ;;  %v6111_v8 = vld [vmem:[%s12327_s23 + $0x598] sm:$0xf0]  ;;  %v7876_v58 = vld [vmem:[%s12330_s26 + $0x34] sm:$0xf0] }
  0xb8   :  { %1640 = vmatpush.bf16.msrb.mxu0 %v6162_v0  ;;  %v6114_v35 = vor.u32 %v7850_v27, %v6111_v8  ;;  %v5807_v48 = vld [vmem:[%s12327_s23 + $0x338] sm:$0xf0] }
  0xb9   :  { %1600 = vmatpush.bf16.msrb.mxu1 %v5746_v2  ;;  %v5810_v62 = vor.u32 %v7774_v47, %v5807_v48  ;;  %v5663_v0 = vld [vmem:[%s12327_s23 + $0x218] sm:$0xf0]  ;;  %v1299_v2 = vpop.f32.mrf.mxu1  ;;  %v6290_v48 = vor.u32 %v7896_v45, %v6289_v44 }
  0xba   :  { %1614 = vmatpush.bf16.msrb.mxu3 %v5874_v6  ;;  %v1313_v6 = vpop.f32.mrf.mxu2  ;;  %v5666_v12 = vor.u32 %v7738_v63, %v5663_v0  ;;  %v6047_v27 = vld [vmem:[%s12327_s23 + $0x518] sm:$0xf0]  ;;  %v6210_v0 = vor.u32 %v7876_v58, %v6209_v57  ;;  %v7877_v57 = vld [vmem:[%s12330_s26 + $0x44] sm:$0xf]  ;;  %v6219_v58 = vld [vmem:[%s12330_s26 + $0x48] sm:$0xf0] }
  0xbb   :  { %1627 = vmatpush.bf16.msra.mxu2 %v6018_v1  ;;  %v7770_v1 = vld [vmem:[%s12327_s23 + $0x30c] sm:$0xf] }
  0xbc   :  { %1641 = vmatpush.bf16.msrb.mxu0 %v6146_v13  ;;  %v7838_v13 = vld [vmem:[%s12327_s23 + $0x52c] sm:$0xf]  ;;  %v5794_v16 = vor.u32 %v7770_v1, %v5791_v3  ;;  %v1287_v32 = vpop.f32.mrf.mxu0  ;;  %v6273_v1 = vld [vmem:[%s12330_s26 + $0xb0] sm:$0xf] }
  0xbd   :  { %1601 = vmatpush.bf16.msrb.mxu1 %v5730_v15  ;;  %v284_v15 = vperm.slane %v9809_v52, 0 }
  0xbe   :  { %1615 = vmatpush.bf16.msrb.mxu3 %v5858_v55  ;;  %v6178_v55 = vor.u32 %v7866_v4, %v6175_v5  ;;  %v1329_v3 = vpop.f32.mrf.mxu3  ;;  %v6201_v5 = vld [vmem:[%s12330_s26 + $0x20] sm:$0xf] }
  0xbf   :  { %1628 = vmatpush.bf16.msra.mxu2 %v6002_v14  ;;  %v6063_v14 = vld [vmem:[%s12327_s23 + $0x538] sm:$0xf0]  ;;  %v1286_v8 = vadd.f32 %v1285_v61, %v284_v15 }
  0xc0   :  { %1642 = vmatpush.bf16.msrb.mxu0 %v6130_v24  ;;  %v6066_v22 = vor.u32 %v7838_v13, %v6063_v14  ;;  %v7882_v24 = vld [vmem:[%s12330_s26 + $0x64] sm:$0xf0] }
  0xc1   :  { %1602 = vmatpush.bf16.msrb.mxu1 %v5714_v26  ;;  %v7834_v26 = vld [vmem:[%s12327_s23 + $0x50c] sm:$0xf] }
  0xc2   :  { %1616 = vmatpush.bf16.msrb.mxu3 %v5842_v29  ;;  %v6234_v29 = vor.u32 %v7882_v24, %v6233_v23  ;;  %v6050_v33 = vor.u32 %v7834_v26, %v6047_v27  ;;  %v1315_v40 = vpop.f32.mrf.mxu2  ;;  %v6185_v24 = vld [vmem:[%s12330_s26] sm:$0xf]  ;;  %v7883_v27 = vld [vmem:[%s12330_s26 + $0x74] sm:$0xf] }
  0xc3   :  { %1629 = vmatpush.bf16.msra.mxu2 %v5986_v25  ;;  %v5922_v25 = vor.u32 %v7802_v17, %v5919_v18 }
  0xc4   :  { %1643 = vmatpush.bf16.msrb.mxu0 %v6114_v35  ;;  %v7880_v35 = vld [vmem:[%s12330_s26 + $0x54] sm:$0xf0] }
  0xc5   :  { %1603 = vmatpush.bf16.msrb.mxu1 %v5698_v38  ;;  %v1300_v38 = vadd.f32 %v1299_v2, %v1286_v8  ;;  %v7892_v2 = vld [vmem:[%s12330_s26 + $0xb4] sm:$0xf0]  ;;  %v6243_v8 = vld [vmem:[%s12330_s26 + $0x78] sm:$0xf0] }
  0xc6   :  { %1617 = vmatpush.bf16.msrb.mxu3 %v5826_v43  ;;  %v1288_v43 = vadd.f32 %v1287_v32, %v284_v15  ;;  %v6193_v15 = vld [vmem:[%s12330_s26 + $0x10] sm:$0xf]  ;;  %v7886_v32 = vld [vmem:[%s12330_s26 + $0x84] sm:$0xf0] }
  0xc7   :  { %1630 = vmatpush.bf16.msra.mxu2 %v5970_v36  ;;  %v1301_v36 = vpop.f32.mrf.mxu1  ;;  %v1314_v47 = vadd.f32 %v1313_v6, %v1300_v38  ;;  %v7874_v6 = vld [vmem:[%s12330_s26 + $0x24] sm:$0xf0] }
  0xc8   :  { %1644 = vmatpush.bf16.msrb.mxu0 %v6098_v49  ;;  %v1302_v49 = vadd.f32 %v1301_v36, %v1288_v43  ;;  %v6202_v10 = vor.u32 %v7874_v6, %v6201_v5  ;;  %v6307_v36 = vld [vmem:[%s12330_s26 + $0xf8] sm:$0xf0]  ;;  %v6250_v43 = vor.u32 %v7886_v32, %v6249_v31  ;;  %v7869_v31 = vld [vmem:[%s12330_s26 + $0x4] sm:$0xf]  ;;  %v7887_v32 = vld [vmem:[%s12330_s26 + $0x94] sm:$0xf] }
  0xc9   :  { %1604 = vmatpush.bf16.msrb.mxu1 %v5682_v56  ;;  %v1328_v59 = vadd.f32 %v1327_v39, %v1314_v47  ;;  %v7881_v39 = vld [vmem:[%s12330_s26 + $0x64] sm:$0xf]  ;;  %v7879_v47 = vld [vmem:[%s12330_s26 + $0x54] sm:$0xf] }
  0xca   :  { %1618 = vmatpush.bf16.msrb.mxu3 %v5810_v62  ;;  %v1369_v61 = vpop.f32.mrf.mxu2  ;;  %v1316_v63 = vadd.f32 %v1315_v40, %v1302_v49  ;;  %v6235_v40 = vld [vmem:[%s12330_s26 + $0x68] sm:$0xf0] }
  0xcb   :  { %1631 = vmatpush.bf16.msra.mxu2 %v5954_v53  ;;  %v7894_v53 = vld [vmem:[%s12330_s26 + $0xc4] sm:$0xf0]  ;;  %v6238_v45 = vor.u32 %v7881_v39, %v6235_v40  ;;  %v7912_v39 = vld [vmem:[%s12330_s26 + $0x154] sm:$0xf0] }
  0xcc   :  { %1645 = vmatpush.bf16.msrb.mxu0 %v6082_v7  ;;  %v1341_v56 = vpop.f32.mrf.mxu0  ;;  %v6274_v7 = vor.u32 %v7892_v2, %v6273_v1  ;;  %v1330_v9 = vadd.f32 %v1329_v3, %v1316_v63  ;;  %v6283_v63 = vld [vmem:[%s12330_s26 + $0xc8] sm:$0xf0]  ;;  %v7875_v1 = vld [vmem:[%s12330_s26 + $0x34] sm:$0xf]  ;;  %v6211_v2 = vld [vmem:[%s12330_s26 + $0x38] sm:$0xf0] }
  0xcd   :  { %1605 = vmatpush.bf16.msrb.mxu1 %v5666_v12  ;;  %v1342_v4 = vadd.f32 %v1341_v56, %v1328_v59  ;;  %v7890_v12 = vld [vmem:[%s12330_s26 + $0xa4] sm:$0xf0]  ;;  %v285_v56 = vperm.slane %v9809_v52, 1  ;;  %v6214_v6 = vor.u32 %v7875_v1, %v6211_v2 }
  0xce   :  { %1619 = vmatpush.bf16.msrb.mxu3 %v5794_v16  ;;  %v7872_v16 = vld [vmem:[%s12330_s26 + $0x14] sm:$0xf0] }
  0xcf   :  { %1632 = vmatpush.bf16.msra.mxu2 %v5938_v11  ;;  %v6265_v11 = vld [vmem:[%s12330_s26 + $0xa0] sm:$0xf]  ;;  %v6194_v20 = vor.u32 %v7872_v16, %v6193_v15  ;;  %v6369_v15 = vld [vmem:[%s12330_s26 + $0x170] sm:$0xf]  ;;  %v7916_v16 = vld [vmem:[%s12330_s26 + $0x174] sm:$0xf0] }
  0xd0   :  { %1646 = vmatpush.bf16.msrb.mxu0 %v6066_v22  ;;  %1606 = vmatmul.bf16.vlgmr.msrb.gmra.mxu1 %v8842_v54  ;;  %v6226_v54 = vor.u32 %v7880_v35, %v6225_v34  ;;  %v6246_v34 = vor.u32 %v7883_v27, %v6243_v8  ;;  %v7899_v35 = vld [vmem:[%s12330_s26 + $0xf4] sm:$0xf] }
  0xd1   :  { %1661 = vmatpush.bf16.msra.mxu1 %v6178_v55  ;;  %1620 = vmatmul.bf16.vlgmr.msrb.gmra.mxu3 %v8855_v60  ;;  %v6217_v60 = vld [vmem:[%s12330_s26 + $0x40] sm:$0xf]  ;;  %v6266_v55 = vor.u32 %v7890_v12, %v6265_v11 }
  0xd2   :  { %2070 = vmatpush.bf16.msra.mxu3 %v6242_v19  ;;  %v6218_v51 = vor.u32 %v7878_v46, %v6217_v60  ;;  %v1371_v23 = vpop.f32.mrf.mxu2  ;;  %v7897_v60 = vld [vmem:[%s12330_s26 + $0xe4] sm:$0xf]  ;;  %v6299_v46 = vld [vmem:[%s12330_s26 + $0xe8] sm:$0xf0] }
  0xd3   :  { %1633 = vmatpush.bf16.msra.mxu2 %v5922_v25  ;;  %v7870_v25 = vld [vmem:[%s12330_s26 + $0x4] sm:$0xf0]  ;;  %v6302_v49 = vor.u32 %v7897_v60, %v6299_v46  ;;  %v6251_v60 = vld [vmem:[%s12330_s26 + $0x88] sm:$0xf0] }
  0xd4   :  { %1647 = vmatpush.bf16.msrb.mxu0 %v6050_v33  ;;  %v1343_v14 = vpop.f32.mrf.mxu0  ;;  %v6186_v30 = vor.u32 %v7870_v25, %v6185_v24  ;;  %v1383_v38 = vpop.f32.mrf.mxu3  ;;  %v6195_v24 = vld [vmem:[%s12330_s26 + $0x18] sm:$0xf0]  ;;  %v6361_v25 = vld [vmem:[%s12330_s26 + $0x160] sm:$0xf] }
  0xd5   :  { %2084 = vmatpush.bf16.msrb.mxu1 %v6306_v28  ;;  %v1344_v17 = vadd.f32 %v1343_v14, %v1330_v9  ;;  %v7891_v9 = vld [vmem:[%s12330_s26 + $0xb4] sm:$0xf]  ;;  %v6203_v14 = vld [vmem:[%s12330_s26 + $0x28] sm:$0xf0] }
  0xd6   :  { %2071 = vmatpush.bf16.msra.mxu3 %v6234_v29  ;;  %1634 = vmatmul.bf16.vlgmr.msra.gmra.mxu2 %v9068_v37  ;;  %v6281_v37 = vld [vmem:[%s12330_s26 + $0xc0] sm:$0xf] }
  0xd7   :  { %1648 = vmatmul.bf16.vlgmr.msrb.gmra.mxu0 %v9079_v42  ;;  %v1355_v42 = vpop.f32.mrf.mxu1  ;;  %v6282_v62 = vor.u32 %v7894_v53, %v6281_v37  ;;  %v7895_v37 = vld [vmem:[%s12330_s26 + $0xd4] sm:$0xf]  ;;  %v6291_v53 = vld [vmem:[%s12330_s26 + $0xd8] sm:$0xf0] }
  0xd8   :  { %v1356_v13 = vadd.f32 %v1355_v42, %v1342_v4  ;;  %v6294_v59 = vor.u32 %v7895_v37, %v6291_v53 }
  0xd9   :  { %2085 = vmatpush.bf16.msrb.mxu1 %v6298_v41 }
  0xda   :  { %2072 = vmatpush.bf16.msra.mxu3 %v6226_v54  ;;  %v1370_v22 = vadd.f32 %v1369_v61, %v1356_v13  ;;  %v6310_v54 = vor.u32 %v7899_v35, %v6307_v36  ;;  %v1397_v44 = vpop.f32.mrf.mxu2  ;;  %v6222_v61 = vor.u32 %v7877_v57, %v6219_v58  ;;  %v6187_v36 = vld [vmem:[%s12330_s26 + $0x8] sm:$0xf0]  ;;  %v6337_v57 = vld [vmem:[%s12330_s26 + $0x130] sm:$0xf]  ;;  %v7908_v58 = vld [vmem:[%s12330_s26 + $0x134] sm:$0xf0] }
  0xdc   :  { %v1668_v33 = vmax.f32 %v1370_v22, 0.0  ;;  %v1385_v42 = vpop.f32.mrf.mxu3 }
  0xdd   :  { %2086 = vmatpush.bf16.msrb.mxu1 %v6290_v48  ;;  %v6227_v48 = vld [vmem:[%s12330_s26 + $0x58] sm:$0xf0]  ;;  %v1386_v12 = vadd.f32 %v1385_v42, %v285_v56  ;;  %v6338_v42 = vor.u32 %v7908_v58, %v6337_v57 }
  0xde   :  { %2073 = vmatpush.bf16.msra.mxu3 %v6218_v51  ;;  %v6230_v51 = vor.u32 %v7879_v47, %v6227_v48  ;;  %v6345_v48 = vld [vmem:[%s12330_s26 + $0x140] sm:$0xf] }
  0xdf   :  { %v1357_v18 = vpop.f32.mrf.mxu1 }
  0xe0   :  { %6182 = vmatmul.msk.bf16.vlgmr.msra.gmra.mxu1 %vm1272_vm0, %v8971_v50  ;;  %v1358_v19 = vadd.f32 %v1357_v18, %v1344_v17  ;;  %v6257_v50 = vld [vmem:[%s12330_s26 + $0x90] sm:$0xf]  ;;  %v6370_v17 = vor.u32 %v7916_v16, %v6369_v15  ;;  %v7915_v15 = vld [vmem:[%s12330_s26 + $0x174] sm:$0xf]  ;;  %v6371_v16 = vld [vmem:[%s12330_s26 + $0x178] sm:$0xf0] }
  0xe1   :  { %2087 = vmatpush.bf16.msrb.mxu1 %v6282_v62  ;;  %v6258_v28 = vor.u32 %v7888_v21, %v6257_v50  ;;  %v7893_v62 = vld [vmem:[%s12330_s26 + $0xc4] sm:$0xf]  ;;  %v6267_v50 = vld [vmem:[%s12330_s26 + $0xa8] sm:$0xf0] }
  0xe2   :  { %2074 = vmatpush.bf16.msra.mxu3 %v6210_v0  ;;  %v1372_v26 = vadd.f32 %v1371_v23, %v1358_v19  ;;  %v1384_v0 = vadd.f32 %v1383_v38, %v285_v56  ;;  %v1399_v4 = vpop.f32.mrf.mxu2  ;;  %v6286_v5 = vor.u32 %v7893_v62, %v6283_v63  ;;  %v7871_v19 = vld [vmem:[%s12330_s26 + $0x14] sm:$0xf]  ;;  %2098 = vmatpush.bf16.msrb.mxu2 %v6370_v17  ;;  %v6353_v38 = vld [vmem:[%s12330_s26 + $0x150] sm:$0xf]  ;;  %v6329_v62 = vld [vmem:[%s12330_s26 + $0x120] sm:$0xf] }
  0xe3   :  { %v1400_v22 = vadd.f32 %v1399_v4, %v1386_v12  ;;  %v7906_v63 = vld [vmem:[%s12330_s26 + $0x124] sm:$0xf0]  ;;  %v6313_v12 = vld [vmem:[%s12330_s26 + $0x100] sm:$0xf]  ;;  %v6374_v17 = vor.u32 %v7915_v15, %v6371_v16 }
  0xe4   :  { %v1672_v29 = vmax.f32 %v1372_v26, 0.0  ;;  %v1398_v11 = vadd.f32 %v1397_v44, %v1384_v0  ;;  %v7914_v26 = vld [vmem:[%s12330_s26 + $0x164] sm:$0xf0]  ;;  %v6190_v44 = vor.u32 %v7869_v31, %v6187_v36  ;;  %v6330_v1 = vor.u32 %v7906_v63, %v6329_v62 }
  0xe5   :  { %2088 = vmatpush.bf16.msrb.mxu1 %v6274_v7  ;;  %v7873_v7 = vld [vmem:[%s12330_s26 + $0x24] sm:$0xf]  ;;  %v6362_v8 = vor.u32 %v7914_v26, %v6361_v25  ;;  %v6355_v25 = vld [vmem:[%s12330_s26 + $0x158] sm:$0xf0] }
  0xe6   :  { %2075 = vmatpush.bf16.msra.mxu3 %v6202_v10  ;;  %v9977_v41 = vpack.c.bf16 %v1672_v29, %v1668_v33  ;;  %v6275_v10 = vld [vmem:[%s12330_s26 + $0xb8] sm:$0xf0] }
  0xe7   :  { %v6278_v18 = vor.u32 %v7891_v9, %v6275_v10  ;;  %v6259_v33 = vld [vmem:[%s12330_s26 + $0x98] sm:$0xf0]  ;;  %2099 = vmatpush.bf16.msrb.mxu2 %v6362_v8  ;;  %v6321_v9 = vld [vmem:[%s12330_s26 + $0x110] sm:$0xf]  ;;  %v7904_v10 = vld [vmem:[%s12330_s26 + $0x114] sm:$0xf0] }
  0xe8   :  { %v7930_v8 = vld [vmem:[%s12330_s26 + $0x1e4] sm:$0xf0] }
  0xe9   :  { %2089 = vmatpush.bf16.msrb.mxu1 %v6266_v55  ;;  %v6206_v55 = vor.u32 %v7873_v7, %v6203_v14 }
  0xea   :  { %2076 = vmatpush.bf16.msra.mxu3 %v6194_v20  ;;  %v7889_v20 = vld [vmem:[%s12330_s26 + $0xa4] sm:$0xf] }
  0xec   :  { %v1411_v3 = vpop.f32.mrf.mxu0 }
  0xed   :  { %2090 = vmatpush.bf16.msrb.mxu1 %v6258_v28  ;;  %v1425_v13 = vpop.f32.mrf.mxu1  ;;  %v1412_v21 = vadd.f32 %v1411_v3, %v1398_v11  ;;  %v6270_v28 = vor.u32 %v7889_v20, %v6267_v50  ;;  %v6322_v11 = vor.u32 %v7904_v10, %v6321_v9  ;;  %v6433_v20 = vld [vmem:[%s12330_s26 + $0x1f0] sm:$0xf]  ;;  %v7932_v50 = vld [vmem:[%s12330_s26 + $0x1f4] sm:$0xf0] }
  0xee   :  { %2077 = vmatpush.bf16.msra.mxu3 %v6186_v30  ;;  %v6198_v30 = vor.u32 %v7871_v19, %v6195_v24  ;;  %v6434_v24 = vor.u32 %v7932_v50, %v6433_v20  ;;  %v6385_v10 = vld [vmem:[%s12330_s26 + $0x190] sm:$0xf]  ;;  %v7931_v50 = vld [vmem:[%s12330_s26 + $0x1f4] sm:$0xf] }
  0xf0   :  { %2112 = vmatpush.bf16.msra.mxu0 %v6434_v24 }
  0xf1   :  { %2078 = vmatmul.bf16.vlgmr.msra.gmra.mxu3 %v9977_v41  ;;  %2091 = vmatpush.bf16.msrb.mxu1 %v6250_v43  ;;  %v6354_v43 = vor.u32 %v7912_v39, %v6353_v38  ;;  %v7907_v38 = vld [vmem:[%s12330_s26 + $0x134] sm:$0xf]  ;;  %v6339_v39 = vld [vmem:[%s12330_s26 + $0x138] sm:$0xf0] }
  0xf2   :  { %2126 = vmatpush.bf16.msrb.mxu3 %v6246_v34  ;;  %v1426_v34 = vadd.f32 %v1425_v13, %v1412_v21  ;;  %v7902_v13 = vld [vmem:[%s12330_s26 + $0x104] sm:$0xf0]  ;;  %v7911_v21 = vld [vmem:[%s12330_s26 + $0x154] sm:$0xf] }
  0xf3   :  { %2100 = vmatpush.bf16.msrb.mxu2 %v6354_v43  ;;  %v6314_v14 = vor.u32 %v7902_v13, %v6313_v12  ;;  %v6358_v26 = vor.u32 %v7911_v21, %v6355_v25  ;;  %v6409_v43 = vld [vmem:[%s12330_s26 + $0x1c0] sm:$0xf]  ;;  %v6435_v21 = vld [vmem:[%s12330_s26 + $0x1f8] sm:$0xf0] }
  0xf4   :  { %v1439_v23 = vpop.f32.mrf.mxu3  ;;  %v1413_v27 = vpop.f32.mrf.mxu0  ;;  %v6438_v24 = vor.u32 %v7931_v50, %v6435_v21 }
  0xf5   :  { %2140 = vmatpush.bf16.msra.mxu1 %v6310_v54  ;;  %v1414_v35 = vadd.f32 %v1413_v27, %v1400_v22  ;;  %v1427_v40 = vpop.f32.mrf.mxu1  ;;  %v6262_v54 = vor.u32 %v7887_v32, %v6259_v33  ;;  %v1440_v46 = vadd.f32 %v1439_v23, %v1426_v34  ;;  %v6425_v27 = vld [vmem:[%s12330_s26 + $0x1e0] sm:$0xf]  ;;  %v6417_v33 = vld [vmem:[%s12330_s26 + $0x1d0] sm:$0xf]  ;;  %v7928_v34 = vld [vmem:[%s12330_s26 + $0x1d4] sm:$0xf0] }
  0xf6   :  { %2127 = vmatpush.bf16.msrb.mxu3 %v6238_v45  ;;  %v7885_v45 = vld [vmem:[%s12330_s26 + $0x84] sm:$0xf]  ;;  %v6418_v36 = vor.u32 %v7928_v34, %v6417_v33  ;;  %v6419_v33 = vld [vmem:[%s12330_s26 + $0x1d8] sm:$0xf0] }
  0xf7   :  { %v1428_v47 = vadd.f32 %v1427_v40, %v1414_v35  ;;  %v6254_v56 = vor.u32 %v7885_v45, %v6251_v60  ;;  %v286_v35 = vperm.slane %v9809_v52, 2  ;;  %v6342_v40 = vor.u32 %v7907_v38, %v6339_v39 }
  0xf9   :  { %2141 = vmatpush.bf16.msra.mxu1 %v6302_v49  ;;  %v1453_v29 = vpop.f32.mrf.mxu2  ;;  %v7910_v49 = vld [vmem:[%s12330_s26 + $0x144] sm:$0xf0] }
  0xfa   :  { %2128 = vmatpush.bf16.msrb.mxu3 %v6230_v51  ;;  %v6346_v53 = vor.u32 %v7910_v49, %v6345_v48 }
  0xfc   :  { %v1441_v51 = vpop.f32.mrf.mxu3  ;;  %v1467_v37 = vpop.f32.mrf.mxu0  ;;  %2101 = vmatpush.bf16.msrb.mxu2 %v6346_v53  ;;  %v7903_v53 = vld [vmem:[%s12330_s26 + $0x114] sm:$0xf] }
  0xfd   :  { %2142 = vmatpush.bf16.msra.mxu1 %v6294_v59  ;;  %v1454_v59 = vadd.f32 %v1453_v29, %v1440_v46  ;;  %v6426_v29 = vor.u32 %v7930_v8, %v6425_v27  ;;  %v7929_v27 = vld [vmem:[%s12330_s26 + $0x1e4] sm:$0xf]  ;;  %v6427_v8 = vld [vmem:[%s12330_s26 + $0x1e8] sm:$0xf0] }
  0xfe   :  { %2129 = vmatpush.bf16.msrb.mxu3 %v6222_v61  ;;  %v1442_v61 = vadd.f32 %v1441_v51, %v1428_v47  ;;  %v6331_v47 = vld [vmem:[%s12330_s26 + $0x128] sm:$0xf0]  ;;  %v6401_v51 = vld [vmem:[%s12330_s26 + $0x1b0] sm:$0xf] }
  0xff   :  { %v1468_v2 = vadd.f32 %v1467_v37, %v1454_v59  ;;  %2113 = vmatpush.bf16.msra.mxu0 %v6426_v29  ;;  %v7924_v37 = vld [vmem:[%s12330_s26 + $0x1b4] sm:$0xf0] }
 0x100   :  { %2102 = vmatpush.bf16.msrb.mxu2 %v6338_v42  ;;  %v6402_v58 = vor.u32 %v7924_v37, %v6401_v51  ;;  %v6323_v42 = vld [vmem:[%s12330_s26 + $0x118] sm:$0xf0]  ;;  %v7921_v37 = vld [vmem:[%s12330_s26 + $0x1a4] sm:$0xf] }
 0x101   :  { %2143 = vmatpush.bf16.msra.mxu1 %v6286_v5  ;;  %v1455_v0 = vpop.f32.mrf.mxu2  ;;  %v6326_v62 = vor.u32 %v7903_v53, %v6323_v42  ;;  %v6395_v53 = vld [vmem:[%s12330_s26 + $0x1a8] sm:$0xf0] }
 0x102   :  { %2130 = vmatpush.bf16.msrb.mxu3 %v6214_v6  ;;  %v1456_v3 = vadd.f32 %v1455_v0, %v1442_v61  ;;  %v1669_v6 = vmax.f32 %v1468_v2, 0.0  ;;  %v7922_v2 = vld [vmem:[%s12330_s26 + $0x1a4] sm:$0xf0] }
 0x103   :  { %2114 = vmatpush.bf16.msra.mxu0 %v6418_v36 }
 0x104   :  { %v1469_v4 = vpop.f32.mrf.mxu0  ;;  %2103 = vmatpush.bf16.msrb.mxu2 %v6330_v1  ;;  %v6393_v1 = vld [vmem:[%s12330_s26 + $0x1a0] sm:$0xf] }
 0x105   :  { %2144 = vmatpush.bf16.msra.mxu1 %v6278_v18  ;;  %v1470_v5 = vadd.f32 %v1469_v4, %v1456_v3  ;;  %v7913_v18 = vld [vmem:[%s12330_s26 + $0x164] sm:$0xf]  ;;  %v6394_v4 = vor.u32 %v7922_v2, %v6393_v1  ;;  %v6379_v2 = vld [vmem:[%s12330_s26 + $0x188] sm:$0xf0] }
 0x106   :  { %2131 = vmatpush.bf16.msrb.mxu3 %v6206_v55  ;;  %v6363_v55 = vld [vmem:[%s12330_s26 + $0x168] sm:$0xf0]  ;;  %v7901_v3 = vld [vmem:[%s12330_s26 + $0x104] sm:$0xf] }
 0x107   :  { %v1673_v7 = vmax.f32 %v1470_v5, 0.0  ;;  %v6366_v19 = vor.u32 %v7913_v18, %v6363_v55  ;;  %v6315_v5 = vld [vmem:[%s12330_s26 + $0x108] sm:$0xf0]  ;;  %v7918_v18 = vld [vmem:[%s12330_s26 + $0x184] sm:$0xf0] }
 0x108   :  { %2104 = vmatpush.bf16.msrb.mxu2 %v6322_v11  ;;  %v6318_v9 = vor.u32 %v7901_v3, %v6315_v5  ;;  %v7920_v11 = vld [vmem:[%s12330_s26 + $0x194] sm:$0xf0]  ;;  %v7917_v1 = vld [vmem:[%s12330_s26 + $0x184] sm:$0xf] }
 0x109   :  { %2145 = vmatpush.bf16.msra.mxu1 %v6270_v28  ;;  %v7909_v28 = vld [vmem:[%s12330_s26 + $0x144] sm:$0xf]  ;;  %v6386_v12 = vor.u32 %v7920_v11, %v6385_v10 }
 0x10a   :  { %2132 = vmatpush.bf16.msrb.mxu3 %v6198_v30  ;;  %v6347_v30 = vld [vmem:[%s12330_s26 + $0x148] sm:$0xf0] }
 0x10b   :  { %v6350_v31 = vor.u32 %v7909_v28, %v6347_v30  ;;  %v6430_v30 = vor.u32 %v7929_v27, %v6427_v8  ;;  %v7948_v27 = vld [vmem:[%s12303_s6 + $0x78] sm:$0xff]  ;;  %v7935_v8 = vld [vmem:[%s12303_s6 + $0x10] sm:$0xff] }
 0x10c   :  { %2105 = vmatpush.bf16.msrb.mxu2 %v6314_v14 }
 0x10d   :  { %2146 = vmatpush.bf16.msra.mxu1 %v6262_v54  ;;  %v1481_v22 = vpop.f32.mrf.mxu1  ;;  %v7926_v54 = vld [vmem:[%s12330_s26 + $0x1c4] sm:$0xf0] }
 0x10e   :  { %2133 = vmatpush.bf16.msrb.mxu3 %v6190_v44  ;;  %v7905_v44 = vld [vmem:[%s12330_s26 + $0x124] sm:$0xf]  ;;  %v6410_v46 = vor.u32 %v7926_v54, %v6409_v43  ;;  %v1482_v49 = vadd.f32 %v1481_v22, %v286_v35  ;;  %v6411_v54 = vld [vmem:[%s12330_s26 + $0x1c8] sm:$0xf0] }
 0x10f   :  { %v6334_v48 = vor.u32 %v7905_v44, %v6331_v47  ;;  %v7925_v43 = vld [vmem:[%s12330_s26 + $0x1c4] sm:$0xf] }
 0x110   :  { %2154 = vmatpush.bf16.msra.mxu2 %v6374_v17  ;;  %v1509_v23 = vpop.f32.mrf.mxu0  ;;  %2115 = vmatpush.bf16.msra.mxu0 %v6410_v46  ;;  %v6377_v17 = vld [vmem:[%s12330_s26 + $0x180] sm:$0xf]  ;;  %v6414_v44 = vor.u32 %v7925_v43, %v6411_v54  ;;  %v287_v46 = vperm.slane %v9809_v52, 3  ;;  %v7919_v52 = vld [vmem:[%s12330_s26 + $0x194] sm:$0xf] }
 0x111   :  { %2134 = vmatmul.bf16.vlgmr.msrb.gmra.mxu3 %v9977_v41  ;;  %2147 = vmatpush.bf16.msra.mxu1 %v6254_v56  ;;  %v1677_v41 = vpack.c.bf16 %v1673_v7, %v1669_v6  ;;  %v6378_v20 = vor.u32 %v7918_v18, %v6377_v17  ;;  %v7941_v43 = vld [vmem:[%s12303_s6 + $0x40] sm:$0xff] }
 0x113   :  { %2092 = vmatmul.bf16.vlgmr.msrb.gmra.mxu1 %v1677_v41 }
 0x114   :  { %2155 = vmatpush.bf16.msra.mxu2 %v6366_v19  ;;  %v1495_v32 = vpop.f32.mrf.mxu3  ;;  %2116 = vmatpush.bf16.msra.mxu0 %v6402_v58  ;;  %v6387_v58 = vld [vmem:[%s12330_s26 + $0x198] sm:$0xf0] }
 0x115   :  { %v1483_v45 = vpop.f32.mrf.mxu1  ;;  %v1496_v59 = vadd.f32 %v1495_v32, %v1482_v49  ;;  %v7927_v32 = vld [vmem:[%s12330_s26 + $0x1d4] sm:$0xf]  ;;  %v6390_v42 = vor.u32 %v7919_v52, %v6387_v58  ;;  %2334 = vmatpush.bf16.msrb.mxu1 %v7948_v27 }
 0x116   :  { %v1484_v61 = vadd.f32 %v1483_v45, %v286_v35  ;;  %v6422_v36 = vor.u32 %v7927_v32, %v6419_v33  ;;  %v7923_v45 = vld [vmem:[%s12330_s26 + $0x1b4] sm:$0xf]  ;;  %v7945_v32 = vld [vmem:[%s12303_s6 + $0x60] sm:$0xff]  ;;  %v7944_v33 = vld [vmem:[%s12303_s6 + $0x58] sm:$0xff] }
 0x117   :  { %v1510_v6 = vadd.f32 %v1509_v23, %v1496_v59 }
 0x118   :  { %2156 = vmatpush.bf16.msra.mxu2 %v6358_v26  ;;  %v1511_v60 = vpop.f32.mrf.mxu0  ;;  %2117 = vmatpush.bf16.msra.mxu0 %v6394_v4  ;;  %v6382_v4 = vor.u32 %v7917_v1, %v6379_v2 }
 0x119   :  { %v1523_v56 = vpop.f32.mrf.mxu2 }
 0x11a   :  { %v1524_v13 = vadd.f32 %v1523_v56, %v1510_v6 }
 0x11c   :  { %2157 = vmatpush.bf16.msra.mxu2 %v6350_v31  ;;  %v1497_v57 = vpop.f32.mrf.mxu3  ;;  %2118 = vmatpush.bf16.msra.mxu0 %v6386_v12 }
 0x11d   :  { %v1498_v7 = vadd.f32 %v1497_v57, %v1484_v61  ;;  %v6398_v57 = vor.u32 %v7921_v37, %v6395_v53 }
 0x11f   :  { %v1512_v14 = vadd.f32 %v1511_v60, %v1498_v7  ;;  %v6403_v60 = vld [vmem:[%s12330_s26 + $0x1b8] sm:$0xf0] }
 0x120   :  { %2158 = vmatpush.bf16.msra.mxu2 %v6342_v40  ;;  %v1565_v0 = vpop.f32.mrf.mxu0  ;;  %2119 = vmatpush.bf16.msra.mxu0 %v6378_v20  ;;  %v6406_v47 = vor.u32 %v7923_v45, %v6403_v60 }
 0x121   :  { %v1525_v15 = vpop.f32.mrf.mxu2 }
 0x122   :  { %v1526_v22 = vadd.f32 %v1525_v15, %v1512_v14 }
 0x123   :  { %2148 = vmatmul.bf16.vlgmr.msra.gmra.mxu1 %v1677_v41 }
 0x124   :  { %2159 = vmatpush.bf16.msra.mxu2 %v6334_v48  ;;  %2168 = vmatpush.bf16.msrb.mxu0 %v6438_v24  ;;  %v7938_v24 = vld [vmem:[%s12303_s6 + $0x28] sm:$0xff] }
 0x128   :  { %2160 = vmatpush.bf16.msra.mxu2 %v6326_v62  ;;  %v1567_v19 = vpop.f32.mrf.mxu0  ;;  %2169 = vmatpush.bf16.msrb.mxu0 %v6430_v30  ;;  %v7946_v30 = vld [vmem:[%s12303_s6 + $0x68] sm:$0xff] }
 0x12c   :  { %2161 = vmatpush.bf16.msra.mxu2 %v6318_v9  ;;  %2170 = vmatpush.bf16.msrb.mxu0 %v6422_v36 }
 0x12d   :  { %v1537_v63 = vpop.f32.mrf.mxu1 }
 0x12e   :  { %v1538_v16 = vadd.f32 %v1537_v63, %v1524_v13 }
 0x130   :  { %2171 = vmatpush.bf16.msrb.mxu0 %v6414_v44 }
 0x134   :  { %v1551_v41 = vpop.f32.mrf.mxu3  ;;  %v1593_v39 = vpop.f32.mrf.mxu0  ;;  %2172 = vmatpush.bf16.msrb.mxu0 %v6406_v47 }
 0x135   :  { %v1539_v55 = vpop.f32.mrf.mxu1  ;;  %v1552_v23 = vadd.f32 %v1551_v41, %v1538_v16 }
 0x136   :  { %v1540_v25 = vadd.f32 %v1539_v55, %v1526_v22  ;;  %v7940_v22 = vld [vmem:[%s12303_s6 + $0x38] sm:$0xff] }
 0x137   :  { %v1566_v28 = vadd.f32 %v1565_v0, %v1552_v23  ;;  %2320 = vmatpush.bf16.msra.mxu3 %v7940_v22  ;;  %v7939_v23 = vld [vmem:[%s12303_s6 + $0x30] sm:$0xff] }
 0x138   :  { %2173 = vmatpush.bf16.msrb.mxu0 %v6398_v57 }
 0x139   :  { %v1670_v34 = vmax.f32 %v1566_v28, 0.0  ;;  %v1579_v38 = vpop.f32.mrf.mxu2  ;;  %v7947_v28 = vld [vmem:[%s12303_s6 + $0x70] sm:$0xff] }
 0x13a   :  { %v1580_v56 = vadd.f32 %v1579_v38, %v287_v46  ;;  %2335 = vmatpush.bf16.msrb.mxu1 %v7947_v28 }
 0x13b   :  { %2321 = vmatpush.bf16.msra.mxu3 %v7939_v23 }
 0x13c   :  { %v1553_v26 = vpop.f32.mrf.mxu3  ;;  %v1595_v51 = vpop.f32.mrf.mxu0  ;;  %v1594_v59 = vadd.f32 %v1593_v39, %v1580_v56  ;;  %2174 = vmatpush.bf16.msrb.mxu0 %v6390_v42  ;;  %v7942_v39 = vld [vmem:[%s12303_s6 + $0x48] sm:$0xff] }
 0x13d   :  { %v1554_v29 = vadd.f32 %v1553_v26, %v1540_v25  ;;  %v7937_v25 = vld [vmem:[%s12303_s6 + $0x20] sm:$0xff]  ;;  %v7936_v26 = vld [vmem:[%s12303_s6 + $0x18] sm:$0xff] }
 0x13e   :  { %2336 = vmatpush.bf16.msrb.mxu1 %v7946_v30  ;;  %v2402_v30 = vld [vmem:[%s12305_s14 + $0x8] sm:$0xff] }
 0x13f   :  { %v1568_v31 = vadd.f32 %v1567_v19, %v1554_v29  ;;  %2322 = vmatpush.bf16.msra.mxu3 %v7938_v24  ;;  %v7934_v29 = vld [vmem:[%s12303_s6 + $0x8] sm:$0xff] }
 0x140   :  { %2175 = vmatpush.bf16.msrb.mxu0 %v6382_v4 }
 0x141   :  { %v1674_v35 = vmax.f32 %v1568_v31, 0.0  ;;  %v1581_v49 = vpop.f32.mrf.mxu2  ;;  %v7933_v31 = vld [vmem:[%s12303_s6] sm:$0xff] }
 0x142   :  { %v1582_v62 = vadd.f32 %v1581_v49, %v287_v46  ;;  %2337 = vmatpush.bf16.msrb.mxu1 %v7945_v32  ;;  %v10329_v32 = vld [vmem:[%s12307_s1] sm:$0xff] }
 0x143   :  { %v1678_v40 = vpack.c.bf16 %v1674_v35, %v1670_v34  ;;  %2323 = vmatpush.bf16.msra.mxu3 %v7937_v25  ;;  %v7943_v34 = vld [vmem:[%s12303_s6 + $0x50] sm:$0xff] }
 0x144   :  { %v1596_v5 = vadd.f32 %v1595_v51, %v1582_v62 }
 0x145   :  { %2106 = vmatmul.bf16.vlgmr.msrb.gmra.mxu2 %v1678_v40 }
 0x146   :  { %2338 = vmatpush.bf16.msrb.mxu1 %v7944_v33 }
 0x147   :  { %2324 = vmatpush.bf16.msra.mxu3 %v7936_v26 }
 0x14a   :  { %2339 = vmatpush.bf16.msrb.mxu1 %v7943_v34 }
 0x14b   :  { %2325 = vmatpush.bf16.msra.mxu3 %v7935_v8 }
 0x14d   :  { %v1607_v48 = vpop.f32.mrf.mxu1 }
 0x14e   :  { %v1608_v3 = vadd.f32 %v1607_v48, %v1594_v59  ;;  %2340 = vmatpush.bf16.msrb.mxu1 %v7942_v39 }
 0x14f   :  { %2326 = vmatpush.bf16.msra.mxu3 %v7934_v29 }
 0x152   :  { %2341 = vmatpush.bf16.msrb.mxu1 %v7941_v43  ;;  %v8467_v43 = vmov 0  }
 0x153   :  { %2327 = vmatpush.bf16.msra.mxu3 %v7933_v31  ;;  %v2401_v31 = vld [vmem:[%s12305_s14] sm:$0xff]  ;;  %8261 = vset.pattern.permute.xlu1 %v8467_v43  ;;  %v8473_v43 = vmov 6  }
 0x154   :  { %v1621_v61 = vpop.f32.mrf.mxu3  ;;  %v1649_v6 = vpop.f32.mrf.mxu0 }
 0x155   :  { %v1609_v63 = vpop.f32.mrf.mxu1  ;;  %2162 = vmatmul.bf16.vlgmr.msra.gmra.mxu2 %v1678_v40  ;;  %v1622_v7 = vadd.f32 %v1621_v61, %v1608_v3  ;;  %v1744_v40 = vld [vmem:[%s12304_s5] sm:$0x3] }
 0x156   :  { %v1610_v9 = vadd.f32 %v1609_v63, %v1596_v5  ;;  %v1746_v54 = vperm.slane %v1744_v40, 0  ;;  %v1747_v63 = vperm.slane %v1744_v40, 1 }
 0x159   :  { %v1635_v0 = vpop.f32.mrf.mxu2 }
 0x15a   :  { %v1636_v12 = vadd.f32 %v1635_v0, %v1622_v7 }
 0x15c   :  { %v1623_v10 = vpop.f32.mrf.mxu3  ;;  %v1650_v15 = vadd.f32 %v1649_v6, %v1636_v12  ;;  %v1651_v16 = vpop.f32.mrf.mxu0 }
 0x15d   :  { %v1624_v11 = vadd.f32 %v1623_v10, %v1610_v9  ;;  %v1663_v41 = vpop.f32.mrf.mxu1 }
 0x15e   :  { %v1664_v17 = vadd.f32 %v1663_v41, %v1650_v15 }
 0x160   :  { %v1671_v20 = vmax.f32 %v1664_v17, 0.0  ;;  %v2403_v17 = vld [vmem:[%s12305_s14 + $0x10] sm:$0xf] }
 0x161   :  { %v1637_v13 = vpop.f32.mrf.mxu2  ;;  %6505 = vmatpush.msk.msrb.mxu2 %vm2414_vm1, %v2403_v17  ;;  %v8471_v17 = vmov 4  }
 0x162   :  { %v1638_v14 = vadd.f32 %v1637_v13, %v1624_v11 }
 0x163   :  { %2432 = vmatpush.msrb.mxu2 %v2402_v30 }
 0x164   :  { %v1652_v18 = vadd.f32 %v1651_v16, %v1638_v14 }
 0x165   :  { %v1665_v55 = vpop.f32.mrf.mxu1  ;;  %2433 = vmatpush.msrb.mxu2 %v2401_v31 }
 0x166   :  { %v1666_v19 = vadd.f32 %v1665_v55, %v1652_v18  ;;  %v8299_v55 = vld [vmem:[%s12331_s24] ss:$0 sm:$0xff] }
 0x168   :  { %v1675_v50 = vmax.f32 %v1666_v19, 0.0 }
 0x16a   :  { %v1679_v21 = vpack.c.bf16 %v1675_v50, %v1671_v20 }
 0x16c   :  { %2120 = vmatmul.bf16.vlgmr.msra.gmra.mxu0 %v1679_v21 }
 0x174   :  { %v2079_v35 = vpop.f32.mrf.mxu3 }
 0x175   :  { %v2080_v47 = vadd.f32 %v2079_v35, %v1746_v54 }
 0x17c   :  { %2176 = vmatmul.bf16.vlgmr.msrb.gmra.mxu0 %v1679_v21  ;;  %v2081_v44 = vpop.f32.mrf.mxu3 }
 0x17d   :  { %v2082_v48 = vadd.f32 %v2081_v44, %v1746_v54  ;;  %v8300_v54 = vld [vmem:[%s12306_s15] ss:$0 sm:$0xff] }
 0x190   :  { %v2093_v36 = vpop.f32.mrf.mxu1 }
 0x191   :  { %v2094_v49 = vadd.f32 %v2093_v36, %v2080_v47  ;;  %v10340_v36 = vld [vmem:[%s12307_s1 + $0x8] sm:$0xff]  ;;  %s8487_s1 = smov 20  }
 0x194   :  { %v2135_v53 = vpop.f32.mrf.mxu3 }
 0x195   :  { %v2136_v3 = vadd.f32 %v2135_v53, %v1747_v63 }
 0x198   :  { %v2095_v45 = vpop.f32.mrf.mxu1 }
 0x199   :  { %v2096_v51 = vadd.f32 %v2095_v45, %v2082_v48 }
 0x19c   :  { %v2137_v1 = vpop.f32.mrf.mxu3 }
 0x19d   :  { %v2138_v5 = vadd.f32 %v2137_v1, %v1747_v63 }
 0x1a0   :  { %v2149_v52 = vpop.f32.mrf.mxu1 }
 0x1a1   :  { %v2150_v6 = vadd.f32 %v2149_v52, %v2136_v3 }
 0x1a8   :  { %v2151_v4 = vpop.f32.mrf.mxu1 }
 0x1a9   :  { %v2152_v9 = vadd.f32 %v2151_v4, %v2138_v5 }
 0x1c8   :  { %v2107_v38 = vpop.f32.mrf.mxu2 }
 0x1c9   :  { %v2108_v37 = vadd.f32 %v2107_v38, %v2094_v49  ;;  %v8468_v49 = vmov 1  }
 0x1ca   :  { %8262 = vset.pattern.permute.xlu2 %v8468_v49 }
 0x1d0   :  { %v2109_v60 = vpop.f32.mrf.mxu2 }
 0x1d1   :  { %v2110_v56 = vadd.f32 %v2109_v60, %v2096_v51  ;;  %v8301_v51 = vld [vmem:[%s12308_s16] ss:$0 sm:$0xff] }
 0x1d8   :  { %v2163_v59 = vpop.f32.mrf.mxu2 }
 0x1d9   :  { %v2164_v10 = vadd.f32 %v2163_v59, %v2150_v6 }
 0x1e0   :  { %v2165_v7 = vpop.f32.mrf.mxu2 }
 0x1e1   :  { %v2166_v11 = vadd.f32 %v2165_v7, %v2152_v9  ;;  %v8470_v7 = vmov 3   ;;  %v8303_v9 = vld [vmem:[%s12308_s16 + $0x2] ss:$0 sm:$0xff] }
 0x1e9   :  { %v2121_v46 = vpop.f32.mrf.mxu0 }
 0x1ea   :  { %v2122_v57 = vadd.f32 %v2121_v46, %v2108_v37 }
 0x1ec   :  { %v2182_v61 = vmax.f32 %v2122_v57, 0.0 }
 0x1f1   :  { %v2123_v58 = vpop.f32.mrf.mxu0 }
 0x1f2   :  { %v2124_v42 = vadd.f32 %v2123_v58, %v2110_v56 }
 0x1f4   :  { %v2184_v62 = vmax.f32 %v2124_v42, 0.0 }
 0x1f6   :  { %v2186_v0 = vpack.c.bf16 %v2184_v62, %v2182_v61  ;;  %v8469_v61 = vmov 2   ;;  %v8302_v62 = vld [vmem:[%s12308_s16 + $0x1] ss:$0 sm:$0xff] }
 0x1f7   :  { %8263 = vset.pattern.permute.xlu0 %v8469_v61 }
 0x1f8   :  { %2328 = vmatmul.bf16.vlgmr.msra.gmra.mxu3 %v2186_v0 }
 0x1f9   :  { %v2177_v2 = vpop.f32.mrf.mxu0 }
 0x1fa   :  { %v2178_v41 = vadd.f32 %v2177_v2, %v2164_v10 }
 0x1fc   :  { %v2183_v14 = vmax.f32 %v2178_v41, 0.0 }
 0x201   :  { %v2179_v12 = vpop.f32.mrf.mxu0 }
 0x202   :  { %v2180_v13 = vadd.f32 %v2179_v12, %v2166_v11 }
 0x204   :  { %v2185_v15 = vmax.f32 %v2180_v13, 0.0 }
 0x206   :  { %v2187_v16 = vpack.c.bf16 %v2185_v15, %v2183_v14 }
 0x208   :  { %2342 = vmatmul.bf16.vlgmr.msrb.gmra.mxu1 %v2187_v16 }
 0x27b   :  { %v2329_v18 = vpop.f32.mrf.mxu3 }
 0x27c   :  { %v2330_v19 = vadd.f32 %v8299_v55, %v2329_v18  ;;  %v8304_v18 = vld [vmem:[%s12308_s16 + $0x3] ss:$0 sm:$0xff] }
 0x283   :  { %v2331_v22 = vpop.f32.mrf.mxu3 }
 0x284   :  { %v2332_v24 = vadd.f32 %v8299_v55, %v2331_v22 }
 0x285   :  { %v2343_v20 = vpop.f32.mrf.mxu1 }
 0x286   :  { %v10312_v50 = vadd.f32 %v2343_v20, %v2330_v19 }
 0x288   :  { %v2350_v21 = vmul.f32 0.5, %v10312_v50 }
 0x28a   :  { %v2352_v23 = vmul.f32 1.442695, %v2350_v21 }
 0x28c   :  { %8322 = vpow2.f32 %v2352_v23 }
 0x28d   :  { %v2345_v25 = vpop.f32.mrf.mxu1 }
 0x28e   :  { %v10315_v26 = vadd.f32 %v2345_v25, %v2332_v24 }
 0x290   :  { %v2351_v27 = vmul.f32 0.5, %v10315_v26 }
 0x292   :  { %v8323_v8 = vpop.eup %8322  ;;  %v2354_v28 = vmul.f32 1.442695, %v2351_v27  ;;  %v8472_v27 = vmov 5  }
 0x293   :  { %2358 = vrot.lane.b32.xlu0 %v8323_v8, %s8466_s21  ;;  %v8305_v8 = vld [vmem:[%s12308_s16 + $0x4] ss:$0 sm:$0xff] }
 0x294   :  { %8324 = vpow2.f32 %v2354_v28 }
 0x29a   :  { %v8325_v29 = vpop.eup %8324 }
 0x29b   :  { %2360 = vrot.lane.b32.xlu0 %v8325_v29, %s8466_s21 }
 0x305   :  { %v2359_v33 = vpop.permute.xlu0 %2358 }
 0x306   :  { %v2364_v34 = vmul.f32 %v2359_v33, %v10329_v32 }
 0x308   :  { %v10333_v35 = vadd.f32 %v2364_v34, %v10312_v50 }
 0x30a   :  { %6506 = vmatmul.msk.f32.vlgmr.msrb.gmra.mxu2 %vm2394_vm2, %v10333_v35 }
 0x30d   :  { %v2361_v38 = vpop.permute.xlu0 %2360 }
 0x30e   :  { %v2365_v39 = vmul.f32 %v2361_v38, %v10340_v36 }
 0x310   :  { %v10344_v40 = vadd.f32 %v2365_v39, %v10315_v26 }
 0x312   :  { %6507 = vmatmul.msk.f32.gmra.mxu2 %vm2394_vm2, %v10344_v40 }
 0x38d   :  { %v2435_v44 = vpop.f32.mrf.mxu2 }
 0x38e   :  { %v2436_v45 = vadd.f32 %v8300_v54, %v2435_v44 }
 0x390   :  { %8326 = vtanh.f32 %v2436_v45 }
 0x395   :  { %v2438_v60 = vpop.f32.mrf.mxu2 }
 0x396   :  { %v8327_v46 = vpop.eup %8326  ;;  %v2439_v47 = vadd.f32 %v8300_v54, %v2438_v60  ;;  %v8306_v54 = vld [vmem:[%s12308_s16 + $0x5] ss:$0 sm:$0xff] }
 0x397   :  { %2446 = vperm.xlu1 %8261, %v8327_v46  }
 0x398   :  { %8328 = vtanh.f32 %v2439_v47 }
 0x39e   :  { %v8329_v48 = vpop.eup %8328 }
 0x39f   :  { %2451 = vperm.xlu1 %8261, %v8329_v48  }
 0x3a7   :  { %8264 = vset.pattern.permute.xlu1 %v8469_v61 }
 0x409   :  { %v2447_v37 = vpop.permute.xlu1 %2446 }
 0x40a   :  { %v2455_v53 = vmul.f32 %v8301_v51, %v2447_v37  ;;  %v8474_v37 = vmov 7  }
 0x40c   :  { %v2457_v56 = vadd.f32 %v2455_v53, %v2436_v45  ;;  %v8307_v53 = vld [vmem:[%s12308_s16 + $0x6] ss:$0 sm:$0xff] }
 0x40e   :  { %8330 = vtanh.f32 %v2457_v56 }
 0x411   :  { %v2452_v57 = vpop.permute.xlu1 %2451 }
 0x412   :  { %v2456_v52 = vmul.f32 %v8301_v51, %v2452_v57 }
 0x414   :  { %v8331_v58 = vpop.eup %8330  ;;  %v2458_v42 = vadd.f32 %v2456_v52, %v2439_v47 }
 0x415   :  { %2464 = vperm.xlu2 %8262, %v8331_v58  }
 0x416   :  { %8332 = vtanh.f32 %v2458_v42 }
 0x41c   :  { %v8333_v59 = vpop.eup %8332 }
 0x41d   :  { %2469 = vperm.xlu2 %8262, %v8333_v59  }
 0x425   :  { %8265 = vset.pattern.permute.xlu2 %v8470_v7 }
 0x46f   :  { %v2465_v63 = vpop.permute.xlu2 %2464 }
 0x470   :  { %v2473_v0 = vmul.f32 %v8302_v62, %v2465_v63  ;;  %v8475_v63 = vmov 8  }
 0x472   :  { %v2475_v1 = vadd.f32 %v2473_v0, %v2457_v56  ;;  %v8308_v0 = vld [vmem:[%s12308_s16 + $0x7] ss:$0 sm:$0xff] }
 0x474   :  { %8334 = vtanh.f32 %v2475_v1 }
 0x477   :  { %v2470_v2 = vpop.permute.xlu2 %2469 }
 0x478   :  { %v2474_v3 = vmul.f32 %v8302_v62, %v2470_v2 }
 0x47a   :  { %v8335_v4 = vpop.eup %8334  ;;  %v2476_v5 = vadd.f32 %v2474_v3, %v2458_v42 }
 0x47b   :  { %2482 = vperm.xlu0 %8263, %v8335_v4  }
 0x47c   :  { %8336 = vtanh.f32 %v2476_v5 }
 0x482   :  { %v8337_v6 = vpop.eup %8336 }
 0x483   :  { %2487 = vperm.xlu1 %8264, %v8337_v6   ;;  %8268 = vset.pattern.permute.xlu0 %v8471_v17 }
 0x48b   :  { %8266 = vset.pattern.permute.xlu1 %v8470_v7 }
 0x4ed   :  { %v2483_v10 = vpop.permute.xlu0 %2482 }
 0x4ee   :  { %v2491_v11 = vmul.f32 %v8303_v9, %v2483_v10  ;;  %v8476_v10 = vmov 9  }
 0x4f0   :  { %v2493_v41 = vadd.f32 %v2491_v11, %v2475_v1  ;;  %v8309_v11 = vld [vmem:[%s12308_s16 + $0x8] ss:$0 sm:$0xff] }
 0x4f2   :  { %8338 = vtanh.f32 %v2493_v41 }
 0x4f5   :  { %v2488_v12 = vpop.permute.xlu1 %2487 }
 0x4f6   :  { %v2492_v13 = vmul.f32 %v8303_v9, %v2488_v12 }
 0x4f8   :  { %v8339_v14 = vpop.eup %8338  ;;  %v2494_v15 = vadd.f32 %v2492_v13, %v2476_v5 }
 0x4f9   :  { %2500 = vperm.xlu2 %8265, %v8339_v14  }
 0x4fa   :  { %8340 = vtanh.f32 %v2494_v15 }
 0x500   :  { %v8341_v16 = vpop.eup %8340 }
 0x501   :  { %2505 = vperm.xlu1 %8266, %v8341_v16   ;;  %8267 = vset.pattern.permute.xlu2 %v8471_v17 }
 0x509   :  { %8269 = vset.pattern.permute.xlu1 %v8472_v27 }
 0x553   :  { %v2501_v55 = vpop.permute.xlu2 %2500 }
 0x554   :  { %v2509_v19 = vmul.f32 %v8304_v18, %v2501_v55  ;;  %v8477_v55 = vmov 10  }
 0x556   :  { %v2511_v20 = vadd.f32 %v2509_v19, %v2493_v41  ;;  %v8310_v19 = vld [vmem:[%s12308_s16 + $0x9] ss:$0 sm:$0xff] }
 0x558   :  { %8342 = vtanh.f32 %v2511_v20 }
 0x55e   :  { %v8343_v21 = vpop.eup %8342 }
 0x55f   :  { %2518 = vperm.xlu2 %8267, %v8343_v21  }
 0x567   :  { %8270 = vset.pattern.permute.xlu2 %v8472_v27 }
 0x573   :  { %v2506_v22 = vpop.permute.xlu1 %2505 }
 0x574   :  { %v2510_v23 = vmul.f32 %v8304_v18, %v2506_v22 }
 0x576   :  { %v2512_v24 = vadd.f32 %v2510_v23, %v2494_v15 }
 0x578   :  { %8344 = vtanh.f32 %v2512_v24 }
 0x57e   :  { %v8345_v25 = vpop.eup %8344 }
 0x57f   :  { %2523 = vperm.xlu0 %8268, %v8345_v25  }
 0x587   :  { %8273 = vset.pattern.permute.xlu0 %v8474_v37 }
 0x5b9   :  { %v2519_v28 = vpop.permute.xlu2 %2518 }
 0x5ba   :  { %v2527_v29 = vmul.f32 %v8305_v8, %v2519_v28  ;;  %v8478_v28 = vmov 11  }
 0x5bc   :  { %v2529_v30 = vadd.f32 %v2527_v29, %v2511_v20  ;;  %v8311_v29 = vld [vmem:[%s12308_s16 + $0xa] ss:$0 sm:$0xff] }
 0x5be   :  { %8346 = vtanh.f32 %v2529_v30 }
 0x5c4   :  { %v8347_v31 = vpop.eup %8346 }
 0x5c5   :  { %2536 = vperm.xlu1 %8269, %v8347_v31  }
 0x5cd   :  { %8271 = vset.pattern.permute.xlu1 %v8473_v43 }
 0x5f1   :  { %v2524_v33 = vpop.permute.xlu0 %2523 }
 0x5f2   :  { %v2528_v34 = vmul.f32 %v8305_v8, %v2524_v33 }
 0x5f4   :  { %v2530_v38 = vadd.f32 %v2528_v34, %v2512_v24 }
 0x5f6   :  { %8348 = vtanh.f32 %v2530_v38 }
 0x5fc   :  { %v8349_v39 = vpop.eup %8348 }
 0x5fd   :  { %2541 = vperm.xlu2 %8270, %v8349_v39  }
 0x605   :  { %8272 = vset.pattern.permute.xlu2 %v8473_v43 }
 0x637   :  { %v2537_v44 = vpop.permute.xlu1 %2536 }
 0x638   :  { %v2545_v45 = vmul.f32 %v8306_v54, %v2537_v44  ;;  %v8479_v44 = vmov 12  }
 0x63a   :  { %v2547_v60 = vadd.f32 %v2545_v45, %v2529_v30  ;;  %v8312_v45 = vld [vmem:[%s12308_s16 + $0xb] ss:$0 sm:$0xff] }
 0x63c   :  { %8350 = vtanh.f32 %v2547_v60 }
 0x642   :  { %v8351_v46 = vpop.eup %8350 }
 0x643   :  { %2554 = vperm.xlu1 %8271, %v8351_v46  }
 0x64b   :  { %8274 = vset.pattern.permute.xlu1 %v8474_v37 }
 0x657   :  { %v2542_v47 = vpop.permute.xlu2 %2541 }
 0x658   :  { %v2546_v48 = vmul.f32 %v8306_v54, %v2542_v47 }
 0x65a   :  { %v2548_v49 = vadd.f32 %v2546_v48, %v2530_v38 }
 0x65c   :  { %8352 = vtanh.f32 %v2548_v49 }
 0x662   :  { %v8353_v51 = vpop.eup %8352 }
 0x663   :  { %2559 = vperm.xlu2 %8272, %v8353_v51  }
 0x66b   :  { %8275 = vset.pattern.permute.xlu2 %v8475_v63 }
 0x6b5   :  { %v2555_v56 = vpop.permute.xlu1 %2554 }
 0x6b6   :  { %v2563_v57 = vmul.f32 %v8307_v53, %v2555_v56  ;;  %v8480_v56 = vmov 13  }
 0x6b8   :  { %v2565_v52 = vadd.f32 %v2563_v57, %v2547_v60  ;;  %v8313_v57 = vld [vmem:[%s12308_s16 + $0xc] ss:$0 sm:$0xff] }
 0x6ba   :  { %8354 = vtanh.f32 %v2565_v52 }
 0x6bd   :  { %v2560_v58 = vpop.permute.xlu2 %2559 }
 0x6be   :  { %v2564_v42 = vmul.f32 %v8307_v53, %v2560_v58 }
 0x6c0   :  { %v8355_v59 = vpop.eup %8354  ;;  %v2566_v61 = vadd.f32 %v2564_v42, %v2548_v49 }
 0x6c1   :  { %2572 = vperm.xlu0 %8273, %v8355_v59  }
 0x6c2   :  { %8356 = vtanh.f32 %v2566_v61 }
 0x6c8   :  { %v8357_v62 = vpop.eup %8356 }
 0x6c9   :  { %2577 = vperm.xlu1 %8274, %v8357_v62   ;;  %8278 = vset.pattern.permute.xlu0 %v8476_v10 }
 0x6d1   :  { %8276 = vset.pattern.permute.xlu1 %v8475_v63 }
 0x733   :  { %v2573_v1 = vpop.permute.xlu0 %2572 }
 0x734   :  { %v2581_v2 = vmul.f32 %v8308_v0, %v2573_v1  ;;  %v8481_v1 = vmov 14  }
 0x736   :  { %v2583_v3 = vadd.f32 %v2581_v2, %v2565_v52  ;;  %v8314_v2 = vld [vmem:[%s12308_s16 + $0xd] ss:$0 sm:$0xff] }
 0x738   :  { %8358 = vtanh.f32 %v2583_v3 }
 0x73b   :  { %v2578_v4 = vpop.permute.xlu1 %2577 }
 0x73c   :  { %v2582_v5 = vmul.f32 %v8308_v0, %v2578_v4 }
 0x73e   :  { %v8359_v6 = vpop.eup %8358  ;;  %v2584_v7 = vadd.f32 %v2582_v5, %v2566_v61 }
 0x73f   :  { %2590 = vperm.xlu2 %8275, %v8359_v6  }
 0x740   :  { %8360 = vtanh.f32 %v2584_v7 }
 0x746   :  { %v8361_v9 = vpop.eup %8360 }
 0x747   :  { %2595 = vperm.xlu1 %8276, %v8361_v9   ;;  %8277 = vset.pattern.permute.xlu2 %v8476_v10 }
 0x74f   :  { %8279 = vset.pattern.permute.xlu1 %v8477_v55 }
 0x799   :  { %v2591_v41 = vpop.permute.xlu2 %2590 }
 0x79a   :  { %v2599_v12 = vmul.f32 %v8309_v11, %v2591_v41  ;;  %v8482_v41 = vmov 15  }
 0x79c   :  { %v2601_v13 = vadd.f32 %v2599_v12, %v2583_v3  ;;  %v8315_v12 = vld [vmem:[%s12308_s16 + $0xe] ss:$0 sm:$0xff] }
 0x79e   :  { %8362 = vtanh.f32 %v2601_v13 }
 0x7a4   :  { %v8363_v14 = vpop.eup %8362 }
 0x7a5   :  { %2608 = vperm.xlu2 %8277, %v8363_v14  }
 0x7ad   :  { %8280 = vset.pattern.permute.xlu2 %v8477_v55 }
 0x7b9   :  { %v2596_v15 = vpop.permute.xlu1 %2595 }
 0x7ba   :  { %v2600_v16 = vmul.f32 %v8309_v11, %v2596_v15 }
 0x7bc   :  { %v2602_v17 = vadd.f32 %v2600_v16, %v2584_v7 }
 0x7be   :  { %8364 = vtanh.f32 %v2602_v17 }
 0x7c4   :  { %v8365_v18 = vpop.eup %8364 }
 0x7c5   :  { %2613 = vperm.xlu0 %8278, %v8365_v18  }
 0x7cd   :  { %8283 = vset.pattern.permute.xlu0 %v8479_v44 }
 0x7ff   :  { %v2609_v20 = vpop.permute.xlu2 %2608 }
 0x800   :  { %v2617_v21 = vmul.f32 %v8310_v19, %v2609_v20  ;;  %v8483_v20 = vmov 16  }
 0x802   :  { %v2619_v22 = vadd.f32 %v2617_v21, %v2601_v13  ;;  %v8316_v21 = vld [vmem:[%s12308_s16 + $0xf] ss:$0 sm:$0xff] }
 0x804   :  { %8366 = vtanh.f32 %v2619_v22 }
 0x80a   :  { %v8367_v23 = vpop.eup %8366 }
 0x80b   :  { %2626 = vperm.xlu1 %8279, %v8367_v23  }
 0x813   :  { %8281 = vset.pattern.permute.xlu1 %v8478_v28 }
 0x837   :  { %v2614_v24 = vpop.permute.xlu0 %2613 }
 0x838   :  { %v2618_v25 = vmul.f32 %v8310_v19, %v2614_v24 }
 0x83a   :  { %v2620_v27 = vadd.f32 %v2618_v25, %v2602_v17 }
 0x83c   :  { %8368 = vtanh.f32 %v2620_v27 }
 0x842   :  { %v8369_v8 = vpop.eup %8368 }
 0x843   :  { %2631 = vperm.xlu2 %8280, %v8369_v8  }
 0x84b   :  { %8282 = vset.pattern.permute.xlu2 %v8478_v28 }
 0x87d   :  { %v2627_v30 = vpop.permute.xlu1 %2626 }
 0x87e   :  { %v2635_v31 = vmul.f32 %v8311_v29, %v2627_v30  ;;  %v8484_v30 = vmov 17  }
 0x880   :  { %v2637_v33 = vadd.f32 %v2635_v31, %v2619_v22  ;;  %v8317_v31 = vld [vmem:[%s12308_s16 + $0x10] ss:$0 sm:$0xff] }
 0x882   :  { %8370 = vtanh.f32 %v2637_v33 }
 0x888   :  { %v8371_v34 = vpop.eup %8370 }
 0x889   :  { %2644 = vperm.xlu1 %8281, %v8371_v34  }
 0x891   :  { %8284 = vset.pattern.permute.xlu1 %v8479_v44 }
 0x89d   :  { %v2632_v38 = vpop.permute.xlu2 %2631 }
 0x89e   :  { %v2636_v39 = vmul.f32 %v8311_v29, %v2632_v38 }
 0x8a0   :  { %v2638_v43 = vadd.f32 %v2636_v39, %v2620_v27 }
 0x8a2   :  { %8372 = vtanh.f32 %v2638_v43 }
 0x8a8   :  { %v8373_v54 = vpop.eup %8372 }
 0x8a9   :  { %2649 = vperm.xlu2 %8282, %v8373_v54  }
 0x8b1   :  { %8285 = vset.pattern.permute.xlu2 %v8480_v56 }
 0x8fb   :  { %v2645_v60 = vpop.permute.xlu1 %2644 }
 0x8fc   :  { %v2653_v46 = vmul.f32 %v8312_v45, %v2645_v60  ;;  %v8485_v60 = vmov 18  }
 0x8fe   :  { %v2655_v47 = vadd.f32 %v2653_v46, %v2637_v33  ;;  %v8318_v46 = vld [vmem:[%s12308_s16 + $0x11] ss:$0 sm:$0xff] }
 0x900   :  { %8374 = vtanh.f32 %v2655_v47 }
 0x903   :  { %v2650_v48 = vpop.permute.xlu2 %2649 }
 0x904   :  { %v2654_v49 = vmul.f32 %v8312_v45, %v2650_v48 }
 0x906   :  { %v8375_v51 = vpop.eup %8374  ;;  %v2656_v37 = vadd.f32 %v2654_v49, %v2638_v43 }
 0x907   :  { %2662 = vperm.xlu0 %8283, %v8375_v51  }
 0x908   :  { %8376 = vtanh.f32 %v2656_v37 }
 0x90e   :  { %v8377_v53 = vpop.eup %8376 }
 0x90f   :  { %2667 = vperm.xlu1 %8284, %v8377_v53   ;;  %8288 = vset.pattern.permute.xlu0 %v8481_v1 }
 0x917   :  { %8286 = vset.pattern.permute.xlu1 %v8480_v56 }
 0x979   :  { %v2663_v52 = vpop.permute.xlu0 %2662 }
 0x97a   :  { %v2671_v58 = vmul.f32 %v8313_v57, %v2663_v52  ;;  %v8486_v52 = vmov 19  }
 0x97c   :  { %v2673_v42 = vadd.f32 %v2671_v58, %v2655_v47  ;;  %v8319_v58 = vld [vmem:[%s12308_s16 + $0x12] ss:$0 sm:$0xff] }
 0x97e   :  { %8378 = vtanh.f32 %v2673_v42 }
 0x981   :  { %v2668_v59 = vpop.permute.xlu1 %2667 }
 0x982   :  { %v2672_v61 = vmul.f32 %v8313_v57, %v2668_v59 }
 0x984   :  { %v8379_v62 = vpop.eup %8378  ;;  %v2674_v63 = vadd.f32 %v2672_v61, %v2656_v37 }
 0x985   :  { %2680 = vperm.xlu2 %8285, %v8379_v62  }
 0x986   :  { %8380 = vtanh.f32 %v2674_v63 }
 0x98c   :  { %v8381_v0 = vpop.eup %8380 }
 0x98d   :  { %2685 = vperm.xlu1 %8286, %v8381_v0   ;;  %8287 = vset.pattern.permute.xlu2 %v8481_v1 }
 0x995   :  { %8289 = vset.pattern.permute.xlu1 %v8482_v41 }
 0x9df   :  { %v2681_v3 = vpop.permute.xlu2 %2680 }
 0x9e0   :  { %v2689_v4 = vmul.f32 %v8314_v2, %v2681_v3  ;;  %v2373_v3 = vmul.f32 %v10340_v36, %v10340_v36  ;;  %v2803_v36 = vld [vmem:[%s12310_s18 + $0x10] sm:$0xf] }
 0x9e1   :  { %6508 = vmatpush.msk.msra.mxu0 %vm2414_vm1, %v2803_v36 }
 0x9e2   :  { %v2691_v5 = vadd.f32 %v2689_v4, %v2673_v42  ;;  %v2375_v4 = vmul.f32 0.5, %v2373_v3 }
 0x9e4   :  { %8382 = vtanh.f32 %v2691_v5 }
 0x9ea   :  { %v8383_v6 = vpop.eup %8382 }
 0x9eb   :  { %2698 = vperm.xlu2 %8287, %v8383_v6  }
 0x9f3   :  { %8290 = vset.pattern.permute.xlu2 %v8482_v41  ;;  %v2801_v41 = vld [vmem:[%s12310_s18] sm:$0xff] }
 0x9ff   :  { %v2686_v7 = vpop.permute.xlu1 %2685 }
 0xa00   :  { %v2690_v9 = vmul.f32 %v8314_v2, %v2686_v7 }
 0xa02   :  { %v2692_v10 = vadd.f32 %v2690_v9, %v2674_v63 }
 0xa04   :  { %8384 = vtanh.f32 %v2692_v10 }
 0xa0a   :  { %v8385_v11 = vpop.eup %8384 }
 0xa0b   :  { %2703 = vperm.xlu0 %8288, %v8385_v11   ;;  %v2802_v11 = vld [vmem:[%s12310_s18 + $0x8] sm:$0xff] }
 0xa0c   :  { %2831 = vmatpush.msra.mxu0 %v2802_v11 }
 0xa0e   :  { %2832 = vmatpush.msra.mxu0 %v2801_v41 }
 0xa13   :  { %8293 = vset.pattern.permute.xlu0 %v8484_v30 }
 0xa45   :  { %v2699_v13 = vpop.permute.xlu2 %2698 }
 0xa46   :  { %v2707_v14 = vmul.f32 %v8315_v12, %v2699_v13 }
 0xa48   :  { %v2709_v15 = vadd.f32 %v2707_v14, %v2691_v5  ;;  %v8320_v5 = vld [vmem:[%s12308_s16 + $0x13] ss:$0 sm:$0xff] }
 0xa4a   :  { %8386 = vtanh.f32 %v2709_v15 }
 0xa50   :  { %v8387_v16 = vpop.eup %8386 }
 0xa51   :  { %2716 = vperm.xlu1 %8289, %v8387_v16  }
 0xa59   :  { %8291 = vset.pattern.permute.xlu1 %v8483_v20 }
 0xa7d   :  { %v2704_v17 = vpop.permute.xlu0 %2703 }
 0xa7e   :  { %v2708_v18 = vmul.f32 %v8315_v12, %v2704_v17  ;;  %v2369_v17 = vmul.f32 -0.5, %v10315_v26 }
 0xa80   :  { %v2710_v55 = vadd.f32 %v2708_v18, %v2692_v10  ;;  %v8321_v10 = vld [vmem:[%s12309_s17] ss:$0 sm:$0xff] }
 0xa82   :  { %8388 = vtanh.f32 %v2710_v55 }
 0xa88   :  { %v8389_v19 = vpop.eup %8388 }
 0xa89   :  { %2721 = vperm.xlu2 %8290, %v8389_v19  }
 0xa91   :  { %8292 = vset.pattern.permute.xlu2 %v8483_v20 }
 0xac3   :  { %v2717_v22 = vpop.permute.xlu1 %2716 }
 0xac4   :  { %v2725_v23 = vmul.f32 %v8316_v21, %v2717_v22 }
 0xac6   :  { %v2727_v24 = vadd.f32 %v2725_v23, %v2709_v15  ;;  %v2372_v15 = vmul.f32 %v10329_v32, %v10329_v32 }
 0xac8   :  { %8390 = vtanh.f32 %v2727_v24  ;;  %v2374_v16 = vmul.f32 0.5, %v2372_v15  ;;  %v7981_v15 = vld [vmem:[%s12312_s10 + $0xec] sm:$0xf0] }
 0xace   :  { %v8391_v25 = vpop.eup %8390 }
 0xacf   :  { %2734 = vperm.xlu1 %8291, %v8391_v25  }
 0xad7   :  { %8294 = vset.pattern.permute.xlu1 %v8484_v30 }
 0xae3   :  { %v2722_v27 = vpop.permute.xlu2 %2721 }
 0xae4   :  { %v2726_v8 = vmul.f32 %v8316_v21, %v2722_v27 }
 0xae6   :  { %v2728_v28 = vadd.f32 %v2726_v8, %v2710_v55  ;;  %v6504_v55 = vadd.f32 -0.9189385, %v2369_v17 }
 0xae8   :  { %8392 = vtanh.f32 %v2728_v28 }
 0xaee   :  { %v8393_v29 = vpop.eup %8392 }
 0xaef   :  { %2739 = vperm.xlu2 %8292, %v8393_v29  }
 0xaf7   :  { %8295 = vset.pattern.permute.xlu2 %v8485_v60 }
 0xb41   :  { %v2735_v33 = vpop.permute.xlu1 %2734 }
 0xb42   :  { %v2743_v34 = vmul.f32 %v8317_v31, %v2735_v33 }
 0xb44   :  { %v2745_v38 = vadd.f32 %v2743_v34, %v2727_v24 }
 0xb46   :  { %8394 = vtanh.f32 %v2745_v38 }
 0xb49   :  { %v2740_v39 = vpop.permute.xlu2 %2739 }
 0xb4a   :  { %v2744_v43 = vmul.f32 %v8317_v31, %v2740_v39 }
 0xb4c   :  { %v8395_v54 = vpop.eup %8394  ;;  %v2746_v44 = vadd.f32 %v2744_v43, %v2728_v28 }
 0xb4d   :  { %2752 = vperm.xlu0 %8293, %v8395_v54  }
 0xb4e   :  { %8396 = vtanh.f32 %v2746_v44 }
 0xb54   :  { %v8397_v45 = vpop.eup %8396 }
 0xb55   :  { %2757 = vperm.xlu1 %8294, %v8397_v45   ;;  %8298 = vset.pattern.permute.xlu0 %v8486_v52 }
 0xb5d   :  { %8296 = vset.pattern.permute.xlu1 %v8485_v60 }
 0xbbf   :  { %v2753_v47 = vpop.permute.xlu0 %2752 }
 0xbc0   :  { %v2761_v48 = vmul.f32 %v8318_v46, %v2753_v47 }
 0xbc2   :  { %v2763_v49 = vadd.f32 %v2761_v48, %v2745_v38  ;;  %v2368_v38 = vmul.f32 -0.5, %v10312_v50  ;;  %v2900_v48 = vld [vmem:[%s12311_s8 + $0x10] sm:$0x33] }
 0xbc3   :  { %v2914_v50 = vunpack.c.l.b16 %v2900_v48 }
 0xbc4   :  { %8398 = vtanh.f32 %v2763_v49  ;;  %v6503_v43 = vadd.f32 -0.9189385, %v2368_v38  ;;  %v6603_v38 = vld [vmem:[%s12312_s10 + $0xa0] sm:$0xf] }
 0xbc7   :  { %v2758_v51 = vpop.permute.xlu1 %2757 }
 0xbc8   :  { %v2762_v37 = vmul.f32 %v8318_v46, %v2758_v51  ;;  %v2918_v51 = vpack.c.b16 %v2914_v50, %v2914_v50 }
 0xbca   :  { %v8399_v53 = vpop.eup %8398  ;;  %v2764_v56 = vadd.f32 %v2762_v37, %v2746_v44 }
 0xbcb   :  { %2770 = vperm.xlu2 %8295, %v8399_v53   ;;  %v2927_v53 = vsel %vm2925_vm3, %v2918_v51, 0 }
 0xbcc   :  { %8400 = vtanh.f32 %v2764_v56  ;;  %2938 = vmatpush.bf16.msra.mxu2 %v2927_v53  ;;  %v7969_v53 = vld [vmem:[%s12312_s10 + $0x8c] sm:$0xf0] }
 0xbd2   :  { %v8401_v57 = vpop.eup %8400 }
 0xbd3   :  { %2775 = vperm.xlu1 %8296, %v8401_v57   ;;  %8297 = vset.pattern.permute.xlu2 %v8486_v52  ;;  %v6513_v57 = vld [vmem:[%s12311_s8] sm:$0xf]  ;;  %v7950_v52 = vld [vmem:[%s12311_s8 + $0x4] sm:$0xf0] }
 0xc25   :  { %v2771_v42 = vpop.permute.xlu2 %2770 }
 0xc26   :  { %v2779_v59 = vmul.f32 %v8319_v58, %v2771_v42  ;;  %v6514_v42 = vor.u32 %v7950_v52, %v6513_v57  ;;  %v8001_v52 = vld [vmem:[%s12312_s10 + $0x18c] sm:$0xf0] }
 0xc28   :  { %v2781_v61 = vadd.f32 %v2779_v59, %v2763_v49  ;;  %v2915_v49 = vunpack.c.h.b16 %v2900_v48  ;;  %v6515_v59 = vld [vmem:[%s12311_s8 + $0x8] sm:$0xf0]  ;;  %2939 = vmatpush.bf16.msra.mxu2 %v6514_v42  ;;  %v6733_v48 = vld [vmem:[%s12312_s10 + $0x1b0] sm:$0xf0] }
 0xc29   :  { %v6589_v42 = vld [vmem:[%s12312_s10 + $0x90] sm:$0xf0] }
 0xc2a   :  { %8402 = vtanh.f32 %v2781_v61  ;;  %v2919_v37 = vpack.c.b16 %v2915_v49, %v2915_v49 }
 0xc30   :  { %v8403_v62 = vpop.eup %8402 }
 0xc31   :  { %2788 = vperm.xlu2 %8297, %v8403_v62  }
 0xc45   :  { %v2776_v63 = vpop.permute.xlu1 %2775 }
 0xc46   :  { %v2780_v0 = vmul.f32 %v8319_v58, %v2776_v63  ;;  %v7949_v58 = vld [vmem:[%s12311_s8 + $0x4] sm:$0xf] }
 0xc48   :  { %v2782_v1 = vadd.f32 %v2780_v0, %v2764_v56  ;;  %v2930_v56 = vsel %vm2925_vm3, %v2919_v37, 0  ;;  %v6587_v37 = vld [vmem:[%s12312_s10 + $0x80] sm:$0xf] }
 0xc49   :  { %2952 = vmatpush.bf16.msrb.mxu3 %v2930_v56  ;;  %v6715_v56 = vld [vmem:[%s12312_s10 + $0x180] sm:$0xf]  ;;  %v6588_v57 = vor.u32 %v7969_v53, %v6587_v37  ;;  %v8014_v37 = vld [vmem:[%s12312_s10 + $0x1f4] sm:$0xf0]  ;;  %v7980_v53 = vld [vmem:[%s12312_s10 + $0xec] sm:$0xf] }
 0xc4a   :  { %8404 = vtanh.f32 %v2782_v1 }
 0xc50   :  { %v8405_v2 = vpop.eup %8404 }
 0xc51   :  { %2793 = vperm.xlu0 %8298, %v8405_v2  }
 0xc59   :  { %2380 = vrot.lane.b32.xlu0 %v2375_v4, %s8487_s1 }
 0xc8b   :  { %v2789_v6 = vpop.permute.xlu2 %2788 }
 0xc8c   :  { %v2797_v7 = vmul.f32 %v8320_v5, %v2789_v6 }
 0xc8e   :  { %v2799_v9 = vadd.f32 %v2797_v7, %v2781_v61  ;;  %v6518_v61 = vor.u32 %v7949_v58, %v6515_v59  ;;  %v7967_v58 = vld [vmem:[%s12312_s10 + $0x84] sm:$0xf]  ;;  %v6716_v59 = vor.u32 %v8001_v52, %v6715_v56  ;;  %v8012_v52 = vld [vmem:[%s12312_s10 + $0x1ec] sm:$0xf] }
 0xc90   :  { %2806 = vrot.lane.b32.xlu1 %v2799_v9, %s8466_s21  ;;  %v2842_v21 = vmul.f32 %v2799_v9, %v2799_v9  ;;  %2953 = vmatpush.bf16.msrb.mxu3 %v6518_v61  ;;  %v6592_v61 = vor.u32 %v7967_v58, %v6589_v42  ;;  %v6773_v58 = vld [vmem:[%s12312_s10 + $0x1f8] sm:$0xf0] }
 0xc92   :  { %v2844_v22 = vsub.f32 1.0, %v2842_v21 }
 0xc98   :  { %2849 = vrot.lane.b32.xlu1 %v8321_v10, %s8487_s1 }
 0xcc3   :  { %v2794_v12 = vpop.permute.xlu0 %2793 }
 0xcc4   :  { %v2798_v13 = vmul.f32 %v8320_v5, %v2794_v12 }
 0xcc6   :  { %v2800_v14 = vadd.f32 %v2798_v13, %v2782_v1 }
 0xcc8   :  { %2808 = vrot.lane.b32.xlu2 %v2800_v14, %s8466_s21  ;;  %v2843_v8 = vmul.f32 %v2800_v14, %v2800_v14  ;;  %v6635_v14 = vld [vmem:[%s12312_s10 + $0xe0] sm:$0xf] }
 0xcc9   :  { %v6636_v17 = vor.u32 %v7981_v15, %v6635_v14  ;;  %v7993_v14 = vld [vmem:[%s12312_s10 + $0x14c] sm:$0xf0]  ;;  %v7959_v15 = vld [vmem:[%s12312_s10 + $0x44] sm:$0xf] }
 0xcca   :  { %v2845_v28 = vsub.f32 1.0, %v2843_v8  ;;  %v8009_v8 = vld [vmem:[%s12312_s10 + $0x1cc] sm:$0xf0] }
 0xccb   :  { %v2381_v18 = vpop.permute.xlu0 %2380  ;;  %3360 = vmatpush.bf16.msrb.mxu0 %v6636_v17  ;;  %v6557_v17 = vld [vmem:[%s12312_s10 + $0x50] sm:$0xf0] }
 0xccc   :  { %v2385_v19 = vsub.f32 %v6504_v55, %v2381_v18  ;;  %v8013_v18 = vld [vmem:[%s12312_s10 + $0x1ec] sm:$0xf0]  ;;  %v7979_v55 = vld [vmem:[%s12312_s10 + $0xe4] sm:$0xf] }
 0xcd0   :  { %2378 = vrot.lane.b32.xlu2 %v2374_v16, %s8487_s1  ;;  %v6763_v16 = vld [vmem:[%s12312_s10 + $0x1e0] sm:$0xf] }
 0xcd8   :  { %2390 = vrot.lane.b32.xlu2 %v2385_v19, %s8466_s21  ;;  %v6637_v19 = vld [vmem:[%s12312_s10 + $0xf0] sm:$0xf0] }
 0xcd9   :  { %v6640_v21 = vor.u32 %v7979_v55, %v6637_v19  ;;  %v6685_v55 = vld [vmem:[%s12312_s10 + $0x150] sm:$0xf0]  ;;  %v6560_v19 = vor.u32 %v7959_v15, %v6557_v17  ;;  %v6741_v15 = vld [vmem:[%s12312_s10 + $0x1b8] sm:$0xf0] }
 0xcdb   :  { %3388 = vmatpush.bf16.msrb.mxu2 %v6640_v21  ;;  %v6539_v21 = vld [vmem:[%s12312_s10 + $0x20] sm:$0xf] }
 0xd02   :  { %v2807_v20 = vpop.permute.xlu1 %2806 }
 0xd03   :  { %6509 = vmatmul.msk.f32.vlgmr.msra.gmra.mxu0 %vm2394_vm2, %v2807_v20  ;;  %v6764_v20 = vor.u32 %v8013_v18, %v6763_v16  ;;  %v7991_v18 = vld [vmem:[%s12312_s10 + $0x144] sm:$0xf] }
 0xd05   :  { %3374 = vmatpush.bf16.msra.mxu1 %v6764_v20  ;;  %v6688_v20 = vor.u32 %v7991_v18, %v6685_v55  ;;  %v6595_v18 = vld [vmem:[%s12312_s10 + $0x88] sm:$0xf]  ;;  %v7970_v55 = vld [vmem:[%s12312_s10 + $0x94] sm:$0xf0] }
 0xd0a   :  { %v2850_v23 = vpop.permute.xlu1 %2849 }
 0xd0b   :  { %v2852_v24 = vmul.f32 %v2850_v23, %v2844_v22  ;;  %v2853_v29 = vmul.f32 %v2850_v23, %v2845_v28  ;;  %v8011_v22 = vld [vmem:[%s12312_s10 + $0x1e4] sm:$0xf]  ;;  %v6765_v23 = vld [vmem:[%s12312_s10 + $0x1f0] sm:$0xf0] }
 0xd0d   :  { %v2854_v25 = vadd.f32 1.0, %v2852_v24  ;;  %v2855_v31 = vadd.f32 1.0, %v2853_v29  ;;  %v6619_v24 = vld [vmem:[%s12312_s10 + $0xc0] sm:$0xf]  ;;  %v7975_v29 = vld [vmem:[%s12312_s10 + $0xc4] sm:$0xf] }
 0xd0f   :  { %v2856_v32 = vand.u32 2147483647, %v2854_v25  ;;  %v2857_v33 = vand.u32 2147483647, %v2855_v31  ;;  %v6768_v25 = vor.u32 %v8011_v22, %v6765_v23  ;;  %v8007_v31 = vld [vmem:[%s12312_s10 + $0x1c4] sm:$0xf] }
 0xd10   :  { %v7957_v22 = vld [vmem:[%s12312_s10 + $0x2c] sm:$0xf0]  ;;  %v6667_v23 = vld [vmem:[%s12312_s10 + $0x120] sm:$0xf] }
 0xd11   :  { %v2858_v27 = vadd.f32 1e-08, %v2856_v32  ;;  %v2859_v39 = vadd.f32 1e-08, %v2857_v33  ;;  %v7977_v32 = vld [vmem:[%s12312_s10 + $0xcc] sm:$0xf0]  ;;  %3402 = vmatpush.bf16.msra.mxu3 %v6768_v25 }
 0xd12   :  { %v6620_v28 = vor.u32 %v7977_v32, %v6619_v24  ;;  %v6540_v24 = vor.u32 %v7957_v22, %v6539_v21  ;;  %v7989_v25 = vld [vmem:[%s12312_s10 + $0x12c] sm:$0xf0]  ;;  %v7955_v32 = vld [vmem:[%s12312_s10 + $0x24] sm:$0xf]  ;;  %v8002_v21 = vld [vmem:[%s12312_s10 + $0x194] sm:$0xf0] }
 0xd13   :  { %8406 = vlog2.f32 %v2858_v27  ;;  %v6747_v27 = vld [vmem:[%s12312_s10 + $0x1c0] sm:$0xf]  ;;  %v7968_v22 = vld [vmem:[%s12312_s10 + $0x8c] sm:$0xf] }
 0xd14   :  { %8408 = vlog2.f32 %v2859_v39  ;;  %v7973_v39 = vld [vmem:[%s12312_s10 + $0xac] sm:$0xf0]  ;;  %3361 = vmatpush.bf16.msrb.mxu0 %v6620_v28 }
 0xd19   :  { %v8407_v26 = vpop.eup %8406 }
 0xd1a   :  { %v2861_v30 = vmul.f32 0.6931472, %v8407_v26  ;;  %v8409_v45 = vpop.eup %8408  ;;  %v6748_v26 = vor.u32 %v8009_v8, %v6747_v27  ;;  %v6541_v27 = vld [vmem:[%s12312_s10 + $0x30] sm:$0xf0]  ;;  %v6668_v8 = vor.u32 %v7989_v25, %v6667_v23  ;;  %v6597_v23 = vld [vmem:[%s12312_s10 + $0x98] sm:$0xf0] }
 0xd1b   :  { %v2863_v60 = vmul.f32 0.6931472, %v8409_v45  ;;  %v7971_v45 = vld [vmem:[%s12312_s10 + $0xa4] sm:$0xf]  ;;  %v6544_v28 = vor.u32 %v7955_v32, %v6541_v27  ;;  %v8000_v32 = vld [vmem:[%s12312_s10 + $0x18c] sm:$0xf] }
 0xd1c   :  { %2866 = vrot.lane.b32.xlu0 %v2861_v30, %s8466_s21  ;;  %v6621_v30 = vld [vmem:[%s12312_s10 + $0xd0] sm:$0xf0]  ;;  %3375 = vmatpush.bf16.msra.mxu1 %v6748_v26  ;;  %v7987_v26 = vld [vmem:[%s12312_s10 + $0x124] sm:$0xf]  ;;  %v6725_v27 = vld [vmem:[%s12312_s10 + $0x198] sm:$0xf0] }
 0xd1d   :  { %v6624_v33 = vor.u32 %v7975_v29, %v6621_v30  ;;  %v6669_v29 = vld [vmem:[%s12312_s10 + $0x130] sm:$0xf0] }
 0xd1e   :  { %v6672_v30 = vor.u32 %v7987_v26, %v6669_v29  ;;  %v6728_v26 = vor.u32 %v8000_v32, %v6725_v27  ;;  %v6579_v29 = vld [vmem:[%s12312_s10 + $0x68] sm:$0xf] }
 0xd1f   :  { %3389 = vmatpush.bf16.msrb.mxu2 %v6624_v33  ;;  %v7953_v33 = vld [vmem:[%s12312_s10 + $0xc] sm:$0xf0] }
 0xd22   :  { %v2809_v34 = vpop.permute.xlu2 %2808 }
 0xd23   :  { %6510 = vmatmul.msk.f32.gmra.mxu0 %vm2394_vm2, %v2809_v34  ;;  %v6749_v34 = vld [vmem:[%s12312_s10 + $0x1d0] sm:$0xf0] }
 0xd2a   :  { %v2379_v54 = vpop.permute.xlu2 %2378 }
 0xd2b   :  { %v2384_v44 = vsub.f32 %v6503_v43, %v2379_v54  ;;  %v6752_v43 = vor.u32 %v8007_v31, %v6749_v34  ;;  %v6731_v54 = vld [vmem:[%s12312_s10 + $0x1a0] sm:$0xf] }
 0xd2c   :  { %v6523_v31 = vld [vmem:[%s12312_s10] sm:$0xf] }
 0xd2d   :  { %2388 = vrot.lane.b32.xlu1 %v2384_v44, %s8466_s21  ;;  %v8005_v44 = vld [vmem:[%s12312_s10 + $0x1ac] sm:$0xf0]  ;;  %3403 = vmatpush.bf16.msra.mxu3 %v6752_v43  ;;  %v6651_v34 = vld [vmem:[%s12312_s10 + $0x100] sm:$0xf]  ;;  %v7951_v43 = vld [vmem:[%s12312_s10 + $0x4] sm:$0xf] }
 0xd2e   :  { %v6732_v50 = vor.u32 %v8005_v44, %v6731_v54  ;;  %v6525_v54 = vld [vmem:[%s12312_s10 + $0x10] sm:$0xf0] }
 0xd30   :  { %3376 = vmatpush.bf16.msra.mxu1 %v6732_v50  ;;  %v7982_v50 = vld [vmem:[%s12312_s10 + $0xf4] sm:$0xf0] }
 0xd32   :  { %v2391_v46 = vpop.permute.xlu2 %2390 }
 0xd33   :  { %v2398_v47 = vsel %vm2394_vm2, %v2391_v46, 0.0  ;;  %v6605_v46 = vld [vmem:[%s12312_s10 + $0xb0] sm:$0xf0] }
 0xd34   :  { %v6608_v49 = vor.u32 %v7971_v45, %v6605_v46  ;;  %3377 = vmatpush.bf16.msra.mxu1 %v6716_v59  ;;  %v6528_v45 = vor.u32 %v7951_v43, %v6525_v54  ;;  %v6653_v46 = vld [vmem:[%s12312_s10 + $0x110] sm:$0xf0]  ;;  %v6776_v59 = vor.u32 %v8012_v52, %v6773_v58  ;;  %v7996_v54 = vld [vmem:[%s12312_s10 + $0x16c] sm:$0xf]  ;;  %v6547_v58 = vld [vmem:[%s12312_s10 + $0x28] sm:$0xf] }
 0xd35   :  { %2868 = vrot.lane.b32.xlu1 %v2863_v60, %s8466_s21  ;;  %v6604_v60 = vor.u32 %v7973_v39, %v6603_v38  ;;  %v6524_v38 = vor.u32 %v7953_v33, %v6523_v31  ;;  %v7985_v39 = vld [vmem:[%s12312_s10 + $0x10c] sm:$0xf0]  ;;  %v6707_v31 = vld [vmem:[%s12312_s10 + $0x168] sm:$0xf] }
 0xd36   :  { %3390 = vmatpush.bf16.msrb.mxu2 %v6608_v49  ;;  %v6652_v44 = vor.u32 %v7985_v39, %v6651_v34  ;;  %v7998_v34 = vld [vmem:[%s12312_s10 + $0x174] sm:$0xf0]  ;;  %v6581_v39 = vld [vmem:[%s12312_s10 + $0x78] sm:$0xf0] }
 0xd37   :  { %3362 = vmatpush.bf16.msrb.mxu0 %v6604_v60  ;;  %v7983_v60 = vld [vmem:[%s12312_s10 + $0x104] sm:$0xf]  ;;  %v6708_v43 = vor.u32 %v7998_v34, %v6707_v31 }
 0xd38   :  { %v8067_v34 = vld [vmem:[%s12315_s12 + $0x1a0] sm:$0xf0] }
 0xd3a   :  { %3391 = vmatpush.bf16.msrb.mxu2 %v6592_v61  ;;  %v6627_v61 = vld [vmem:[%s12312_s10 + $0xc8] sm:$0xf] }
 0xd3b   :  { %3363 = vmatpush.bf16.msrb.mxu0 %v6588_v57  ;;  %v6645_v57 = vld [vmem:[%s12312_s10 + $0xf8] sm:$0xf0] }
 0xd3c   :  { %v6648_v42 = vor.u32 %v7980_v53, %v6645_v57 }
 0xd46   :  { %2399 = vadd.xlane.f32.xlu0 %v2398_v47  ;;  %v8003_v47 = vld [vmem:[%s12312_s10 + $0x1a4] sm:$0xf] }
 0xd47   :  { %v6736_v51 = vor.u32 %v8003_v47, %v6733_v48  ;;  %v6656_v47 = vor.u32 %v7983_v60, %v6653_v46  ;;  %v6643_v48 = vld [vmem:[%s12312_s10 + $0xe8] sm:$0xf] }
 0xd48   :  { %v6644_v49 = vor.u32 %v7982_v50, %v6643_v48  ;;  %v6691_v48 = vld [vmem:[%s12312_s10 + $0x148] sm:$0xf]  ;;  %v7994_v50 = vld [vmem:[%s12312_s10 + $0x154] sm:$0xf0] }
 0xd49   :  { %3404 = vmatpush.bf16.msra.mxu3 %v6736_v51  ;;  %v6771_v51 = vld [vmem:[%s12312_s10 + $0x1e8] sm:$0xf]  ;;  %v6692_v52 = vor.u32 %v7994_v50, %v6691_v48  ;;  %v8235_v48 = vld [vmem:[%s12315_s12 + $0x6e0] sm:$0xf0] }
 0xd4a   :  { %v6772_v56 = vor.u32 %v8014_v37, %v6771_v51  ;;  %v6565_v51 = vld [vmem:[%s12312_s10 + $0x58] sm:$0xf0]  ;;  %v7992_v37 = vld [vmem:[%s12312_s10 + $0x14c] sm:$0xf] }
 0xd80   :  { %v2834_v0 = vpop.f32.mrf.mxu0 }
 0xd81   :  { %v2840_v2 = vadd.f32 %v2834_v0, %v10333_v35  ;;  %v6571_v0 = vld [vmem:[%s12312_s10 + $0x60] sm:$0xf] }
 0xd83   :  { %v2878_v9 = vmul.f32 %v2840_v2, %v2840_v2 }
 0xd85   :  { %v2880_v12 = vmul.f32 0.5, %v2878_v9  ;;  %v6573_v9 = vld [vmem:[%s12312_s10 + $0x70] sm:$0xf0] }
 0xd87   :  { %v2882_v13 = vsub.f32 -0.9189385, %v2880_v12  ;;  %v6555_v12 = vld [vmem:[%s12312_s10 + $0x40] sm:$0xf] }
 0xd8e   :  { %v2867_v62 = vpop.permute.xlu0 %2866 }
 0xd8f   :  { %v2872_v63 = vsel %vm2394_vm2, %v2867_v62, 0.0  ;;  %v7999_v62 = vld [vmem:[%s12312_s10 + $0x184] sm:$0xf] }
 0xd90   :  { %2873 = vadd.xlane.f32.xlu1 %v2872_v63  ;;  %v6717_v63 = vld [vmem:[%s12312_s10 + $0x190] sm:$0xf0] }
 0xd9f   :  { %v2389_v1 = vpop.permute.xlu1 %2388 }
 0xda0   :  { %v2837_v3 = vpop.f32.mrf.mxu0  ;;  %v2395_v4 = vsel %vm2394_vm2, %v2389_v1, 0.0  ;;  %v6720_v1 = vor.u32 %v7999_v62, %v6717_v63  ;;  %v7978_v62 = vld [vmem:[%s12312_s10 + $0xd4] sm:$0xf0]  ;;  %v6755_v63 = vld [vmem:[%s12312_s10 + $0x1c8] sm:$0xf] }
 0xda1   :  { %v2841_v5 = vadd.f32 %v2837_v3, %v10344_v40  ;;  %2396 = vadd.xlane.f32.xlu2 %v2395_v4  ;;  %v2884_v40 = vsel %vm2394_vm2, %v2882_v13, 0.0  ;;  %v6699_v3 = vld [vmem:[%s12312_s10 + $0x160] sm:$0xf]  ;;  %v7997_v4 = vld [vmem:[%s12312_s10 + $0x16c] sm:$0xf0] }
 0xda2   :  { %3405 = vmatpush.bf16.msra.mxu3 %v6720_v1  ;;  %v8010_v1 = vld [vmem:[%s12312_s10 + $0x1d4] sm:$0xf0] }
 0xda3   :  { %v2879_v6 = vmul.f32 %v2841_v5, %v2841_v5  ;;  %v2897_v7 = vpack.c.bf16 %v2841_v5, %v2840_v2  ;;  %v7965_v2 = vld [vmem:[%s12312_s10 + $0x6c] sm:$0xf0] }
 0xda4   :  { %v6572_v5 = vor.u32 %v7965_v2, %v6571_v0  ;;  %v6628_v0 = vor.u32 %v7978_v62, %v6627_v61  ;;  %v7976_v2 = vld [vmem:[%s12312_s10 + $0xcc] sm:$0xf] }
 0xda5   :  { %6519 = vmatmul.msk.bf16.vlgmr.msra.gmra.mxu2 %vm2394_vm2, %v2897_v7  ;;  %6520 = vmatmul.msk.bf16.vlgmr.msrb.gmra.mxu3 %vm2394_vm2, %v2897_v7  ;;  %v2881_v10 = vmul.f32 0.5, %v2879_v6  ;;  %v6700_v6 = vor.u32 %v7997_v4, %v6699_v3  ;;  %v7963_v7 = vld [vmem:[%s12312_s10 + $0x64] sm:$0xf]  ;;  %v6629_v3 = vld [vmem:[%s12312_s10 + $0xd8] sm:$0xf0]  ;;  %v6756_v4 = vor.u32 %v8010_v1, %v6755_v63 }
 0xda6   :  { %3364 = vmatpush.bf16.msrb.mxu0 %v6572_v5  ;;  %v6632_v5 = vor.u32 %v7976_v2, %v6629_v3  ;;  %v7990_v1 = vld [vmem:[%s12312_s10 + $0x134] sm:$0xf0]  ;;  %v7956_v2 = vld [vmem:[%s12312_s10 + $0x2c] sm:$0xf]  ;;  %v6549_v3 = vld [vmem:[%s12312_s10 + $0x38] sm:$0xf0] }
 0xda7   :  { %v2869_v36 = vpop.permute.xlu1 %2868  ;;  %v2883_v11 = vsub.f32 -0.9189385, %v2881_v10  ;;  %v7995_v10 = vld [vmem:[%s12312_s10 + $0x164] sm:$0xf]  ;;  %3378 = vmatpush.bf16.msra.mxu1 %v6700_v6  ;;  %v8008_v6 = vld [vmem:[%s12312_s10 + $0x1cc] sm:$0xf] }
 0xda8   :  { %v2875_v41 = vsel %vm2394_vm2, %v2869_v36, 0.0  ;;  %v6576_v36 = vor.u32 %v7963_v7, %v6573_v9  ;;  %v6757_v7 = vld [vmem:[%s12312_s10 + $0x1d8] sm:$0xf0] }
 0xda9   :  { %2876 = vadd.xlane.f32.xlu2 %v2875_v41  ;;  %v2887_v35 = vsel %vm2394_vm2, %v2883_v11, 0.0  ;;  %v6701_v11 = vld [vmem:[%s12312_s10 + $0x170] sm:$0xf0]  ;;  %v6760_v9 = vor.u32 %v8008_v6, %v6757_v7 }
 0xdaa   :  { %2888 = vadd.xlane.f32.xlu0 %v2887_v35  ;;  %v6704_v41 = vor.u32 %v7995_v10, %v6701_v11  ;;  %3392 = vmatpush.bf16.msrb.mxu2 %v6576_v36  ;;  %v7961_v35 = vld [vmem:[%s12312_s10 + $0x4c] sm:$0xf0]  ;;  %v6611_v10 = vld [vmem:[%s12312_s10 + $0xa8] sm:$0xf]  ;;  %v7974_v36 = vld [vmem:[%s12312_s10 + $0xb4] sm:$0xf0] }
 0xdab   :  { %v6556_v13 = vor.u32 %v7961_v35, %v6555_v12  ;;  %v6739_v11 = vld [vmem:[%s12312_s10 + $0x1a8] sm:$0xf]  ;;  %v8006_v12 = vld [vmem:[%s12312_s10 + $0x1b4] sm:$0xf0]  ;;  %v7972_v35 = vld [vmem:[%s12312_s10 + $0xac] sm:$0xf] }
 0xdac   :  { %3406 = vmatpush.bf16.msra.mxu3 %v6704_v41  ;;  %v6612_v41 = vor.u32 %v7974_v36, %v6611_v10  ;;  %v6531_v10 = vld [vmem:[%s12312_s10 + $0x8] sm:$0xf]  ;;  %v7954_v36 = vld [vmem:[%s12312_s10 + $0x14] sm:$0xf0] }
 0xdad   :  { %3365 = vmatpush.bf16.msrb.mxu0 %v6556_v13  ;;  %v6613_v13 = vld [vmem:[%s12312_s10 + $0xb8] sm:$0xf0] }
 0xdae   :  { %3393 = vmatpush.bf16.msrb.mxu2 %v6560_v19  ;;  %v6723_v19 = vld [vmem:[%s12312_s10 + $0x188] sm:$0xf] }
 0xdaf   :  { %v6724_v25 = vor.u32 %v8002_v21, %v6723_v19 }
 0xdb0   :  { %3407 = vmatpush.bf16.msra.mxu3 %v6688_v20  ;;  %v6596_v20 = vor.u32 %v7970_v55, %v6595_v18  ;;  %v6532_v18 = vor.u32 %v7954_v36, %v6531_v10  ;;  %v8165_v10 = vld [vmem:[%s12315_s12 + $0x4b0] sm:$0xf0]  ;;  %v7591_v36 = vld [vmem:[%s12315_s12 + $0x658] sm:$0xf] }
 0xdb1   :  { %2885 = vadd.xlane.f32.xlu2 %v2884_v40  ;;  %v6683_v40 = vld [vmem:[%s12312_s10 + $0x140] sm:$0xf]  ;;  %3366 = vmatpush.bf16.msrb.mxu0 %v6540_v24 }
 0xdb2   :  { %v6684_v16 = vor.u32 %v7993_v14, %v6683_v40  ;;  %3394 = vmatpush.bf16.msrb.mxu2 %v6544_v28  ;;  %v6740_v40 = vor.u32 %v8006_v12, %v6739_v11  ;;  %v8004_v14 = vld [vmem:[%s12312_s10 + $0x1ac] sm:$0xf]  ;;  %v6600_v28 = vor.u32 %v7968_v22, %v6597_v23  ;;  %v6659_v11 = vld [vmem:[%s12312_s10 + $0x108] sm:$0xf]  ;;  %v2901_v23 = vld [vmem:[%s12314_s9] sm:$0x3] }
 0xdb3   :  { %v6744_v17 = vor.u32 %v8004_v14, %v6741_v15  ;;  %v6533_v14 = vld [vmem:[%s12312_s10 + $0x18] sm:$0xf0]  ;;  %v7984_v15 = vld [vmem:[%s12312_s10 + $0x10c] sm:$0xf]  ;;  %v2903_v32 = vperm.slane %v2901_v23, 0  ;;  %v2904_v27 = vperm.slane %v2901_v23, 1 }
 0xdb4   :  { %3379 = vmatpush.bf16.msra.mxu1 %v6684_v16  ;;  %3408 = vmatpush.bf16.msra.mxu3 %v6672_v30  ;;  %v6616_v16 = vor.u32 %v7972_v35, %v6613_v13  ;;  %v7966_v30 = vld [vmem:[%s12312_s10 + $0x74] sm:$0xf0]  ;;  %v7952_v13 = vld [vmem:[%s12312_s10 + $0xc] sm:$0xf] }
 0xdb5   :  { %3367 = vmatpush.bf16.msrb.mxu0 %v6524_v38  ;;  %v6580_v33 = vor.u32 %v7966_v30, %v6579_v29  ;;  %v7964_v38 = vld [vmem:[%s12312_s10 + $0x6c] sm:$0xf]  ;;  %v7986_v35 = vld [vmem:[%s12312_s10 + $0x114] sm:$0xf0]  ;;  %v6536_v21 = vor.u32 %v7952_v13, %v6533_v14  ;;  %v6975_v30 = vld [vmem:[%s12315_s12 + $0x188] sm:$0xf] }
 0xdb6   :  { %3395 = vmatpush.bf16.msrb.mxu2 %v6528_v45  ;;  %v6563_v45 = vld [vmem:[%s12312_s10 + $0x48] sm:$0xf]  ;;  %v6584_v60 = vor.u32 %v7964_v38, %v6581_v39  ;;  %v6660_v19 = vor.u32 %v7986_v35, %v6659_v11  ;;  %v8123_v39 = vld [vmem:[%s12315_s12 + $0x360] sm:$0xf0]  ;;  %v8221_v11 = vld [vmem:[%s12315_s12 + $0x670] sm:$0xf0] }
 0xdb7   :  { %v7199_v38 = vld [vmem:[%s12315_s12 + $0x348] sm:$0xf]  ;;  %v8046_v35 = vld [vmem:[%s12315_s12 + $0xf8] sm:$0xf0] }
 0xdb8   :  { %3380 = vmatpush.bf16.msra.mxu1 %v6668_v8  ;;  %3409 = vmatpush.bf16.msra.mxu3 %v6656_v47  ;;  %v7962_v47 = vld [vmem:[%s12312_s10 + $0x54] sm:$0xf0]  ;;  %v8102_v14 = vld [vmem:[%s12315_s12 + $0x2b8] sm:$0xf0] }
 0xdb9   :  { %3416 = vmatpush.bf16.msra.mxu0 %v6644_v49  ;;  %v2400_v8 = vpop.xlane.xlu0 %2399  ;;  %v7960_v49 = vld [vmem:[%s12312_s10 + $0x4c] sm:$0xf]  ;;  %v6564_v53 = vor.u32 %v7962_v47, %v6563_v45  ;;  %v8179_v45 = vld [vmem:[%s12315_s12 + $0x520] sm:$0xf0]  ;;  %v7647_v47 = vld [vmem:[%s12315_s12 + $0x6c8] sm:$0xf] }
 0xdba   :  { %3444 = vmatpush.bf16.msra.mxu2 %v6648_v42  ;;  %v7958_v42 = vld [vmem:[%s12312_s10 + $0x34] sm:$0xf0]  ;;  %v6568_v62 = vor.u32 %v7960_v49, %v6565_v51  ;;  %v6976_v51 = vor.u32 %v8067_v34, %v6975_v30  ;;  %v8032_v34 = vld [vmem:[%s12315_s12 + $0x88] sm:$0xf0] }
 0xdbb   :  { %v6548_v7 = vor.u32 %v7958_v42, %v6547_v58  ;;  %v7395_v42 = vld [vmem:[%s12315_s12 + $0x4d0] sm:$0xf] }
 0xdbc   :  { %3381 = vmatpush.bf16.msra.mxu1 %v6652_v44  ;;  %3458 = vmatpush.bf16.msrb.mxu3 %v6776_v59  ;;  %v6709_v44 = vld [vmem:[%s12312_s10 + $0x178] sm:$0xf0] }
 0xdbd   :  { %3417 = vmatpush.bf16.msra.mxu0 %v6628_v0  ;;  %v6712_v46 = vor.u32 %v7996_v54, %v6709_v44  ;;  %v6675_v0 = vld [vmem:[%s12312_s10 + $0x128] sm:$0xf] }
 0xdbe   :  { %3445 = vmatpush.bf16.msra.mxu2 %v6632_v5  ;;  %v6677_v5 = vld [vmem:[%s12312_s10 + $0x138] sm:$0xf0]  ;;  %v7423_v44 = vld [vmem:[%s12315_s12 + $0x508] sm:$0xf] }
 0xdbf   :  { %v7424_v58 = vor.u32 %v8179_v45, %v7423_v44  ;;  %v7283_v44 = vld [vmem:[%s12315_s12 + $0x3f0] sm:$0xf]  ;;  %v8144_v45 = vld [vmem:[%s12315_s12 + $0x408] sm:$0xf0] }
 0xdc0   :  { %3430 = vmatpush.bf16.msrb.mxu1 %v6772_v56  ;;  %3459 = vmatpush.bf16.msrb.mxu3 %v6760_v9  ;;  %v6693_v56 = vld [vmem:[%s12312_s10 + $0x158] sm:$0xf0]  ;;  %v6676_v9 = vor.u32 %v7990_v1, %v6675_v0  ;;  %v6919_v1 = vld [vmem:[%s12315_s12 + $0x118] sm:$0xf] }
 0xdc1   :  { %3418 = vmatpush.bf16.msra.mxu0 %v6612_v41  ;;  %v6696_v63 = vor.u32 %v7992_v37, %v6693_v56  ;;  %v6552_v41 = vor.u32 %v7956_v2, %v6549_v3  ;;  %v6947_v37 = vld [vmem:[%s12315_s12 + $0x150] sm:$0xf]  ;;  %v7200_v56 = vor.u32 %v8123_v39, %v7199_v38  ;;  %v8053_v2 = vld [vmem:[%s12315_s12 + $0x130] sm:$0xf0]  ;;  %v8088_v39 = vld [vmem:[%s12315_s12 + $0x248] sm:$0xf0] }
 0xdc2   :  { %3446 = vmatpush.bf16.msra.mxu2 %v6616_v16  ;;  %v6661_v16 = vld [vmem:[%s12312_s10 + $0x118] sm:$0xf0]  ;;  %v7059_v38 = vld [vmem:[%s12315_s12 + $0x230] sm:$0xf] }
 0xdc3   :  { %v6664_v22 = vor.u32 %v7984_v15, %v6661_v16  ;;  %v7339_v16 = vld [vmem:[%s12315_s12 + $0x460] sm:$0xf] }
 0xdc4   :  { %3431 = vmatpush.bf16.msrb.mxu1 %v6756_v4  ;;  %3460 = vmatpush.bf16.msrb.mxu3 %v6744_v17  ;;  %v7988_v4 = vld [vmem:[%s12312_s10 + $0x12c] sm:$0xf] }
 0xdc5   :  { %3419 = vmatpush.bf16.msra.mxu0 %v6596_v20  ;;  %v6680_v12 = vor.u32 %v7988_v4, %v6677_v5  ;;  %v7143_v4 = vld [vmem:[%s12315_s12 + $0x2d8] sm:$0xf]  ;;  %v8109_v5 = vld [vmem:[%s12315_s12 + $0x2f0] sm:$0xf0] }
 0xdc6   :  { %3447 = vmatpush.bf16.msra.mxu2 %v6600_v28  ;;  %v7144_v13 = vor.u32 %v8109_v5, %v7143_v4  ;;  %v8057_v5 = vld [vmem:[%s12315_s12 + $0x154] sm:$0xf] }
 0xdc8   :  { %3432 = vmatpush.bf16.msrb.mxu1 %v6740_v40  ;;  %3461 = vmatpush.bf16.msrb.mxu3 %v6728_v26 }
 0xdc9   :  { %3420 = vmatpush.bf16.msra.mxu0 %v6580_v33 }
 0xdca   :  { %3448 = vmatpush.bf16.msra.mxu2 %v6584_v60 }
 0xdcc   :  { %3433 = vmatpush.bf16.msrb.mxu1 %v6724_v25  ;;  %3462 = vmatpush.bf16.msrb.mxu3 %v6712_v46 }
 0xdcd   :  { %3421 = vmatpush.bf16.msra.mxu0 %v6564_v53  ;;  %v8060_v53 = vld [vmem:[%s12315_s12 + $0x168] sm:$0xf0] }
 0xdce   :  { %3449 = vmatpush.bf16.msra.mxu2 %v6568_v62  ;;  %v7619_v62 = vld [vmem:[%s12315_s12 + $0x690] sm:$0xf]  ;;  %v6948_v0 = vor.u32 %v8060_v53, %v6947_v37  ;;  %v7255_v37 = vld [vmem:[%s12315_s12 + $0x3b8] sm:$0xf]  ;;  %v8137_v53 = vld [vmem:[%s12315_s12 + $0x3d0] sm:$0xf0] }
 0xdd0   :  { %3434 = vmatpush.bf16.msrb.mxu1 %v6708_v43  ;;  %3463 = vmatpush.bf16.msrb.mxu3 %v6696_v63  ;;  %v8228_v63 = vld [vmem:[%s12315_s12 + $0x6a8] sm:$0xf0] }
 0xdd1   :  { %3422 = vmatpush.bf16.msra.mxu0 %v6548_v7  ;;  %v7367_v7 = vld [vmem:[%s12315_s12 + $0x498] sm:$0xf] }
 0xdd2   :  { %3450 = vmatpush.bf16.msra.mxu2 %v6552_v41  ;;  %v6920_v41 = vor.u32 %v8053_v2, %v6919_v1  ;;  %v7368_v15 = vor.u32 %v8165_v10, %v7367_v7  ;;  %v7201_v1 = vld [vmem:[%s12315_s12 + $0x364] sm:$0xf0]  ;;  %v6949_v7 = vld [vmem:[%s12315_s12 + $0x16c] sm:$0xf0] }
 0xdd3   :  { %v7173_v10 = vld [vmem:[%s12315_s12 + $0x32c] sm:$0xf0] }
 0xdd4   :  { %3435 = vmatpush.bf16.msrb.mxu1 %v6692_v52  ;;  %3464 = vmatpush.bf16.msrb.mxu3 %v6680_v12  ;;  %v8116_v52 = vld [vmem:[%s12315_s12 + $0x328] sm:$0xf0]  ;;  %v6891_v12 = vld [vmem:[%s12315_s12 + $0xe0] sm:$0xf] }
 0xdd5   :  { %3423 = vmatpush.bf16.msra.mxu0 %v6532_v18  ;;  %v8158_v18 = vld [vmem:[%s12315_s12 + $0x478] sm:$0xf0] }
 0xdd6   :  { %3451 = vmatpush.bf16.msra.mxu2 %v6536_v21  ;;  %v6863_v21 = vld [vmem:[%s12315_s12 + $0xa8] sm:$0xf] }
 0xdd8   :  { %3436 = vmatpush.bf16.msrb.mxu1 %v6676_v9  ;;  %3465 = vmatpush.bf16.msrb.mxu3 %v6664_v22  ;;  %v7620_v9 = vor.u32 %v8228_v63, %v7619_v62  ;;  %v8039_v22 = vld [vmem:[%s12315_s12 + $0xc0] sm:$0xf0]  ;;  %v7256_v62 = vor.u32 %v8137_v53, %v7255_v37  ;;  %v6977_v63 = vld [vmem:[%s12315_s12 + $0x1a4] sm:$0xf0]  ;;  %v8022_v53 = vld [vmem:[%s12315_s12 + $0x3c] sm:$0xf] }
 0xdd9   :  { %v6864_v30 = vor.u32 %v8039_v22, %v6863_v21  ;;  %v8130_v21 = vld [vmem:[%s12315_s12 + $0x398] sm:$0xf0] }
 0xddc   :  { %3437 = vmatpush.bf16.msrb.mxu1 %v6660_v19  ;;  %v8214_v19 = vld [vmem:[%s12315_s12 + $0x638] sm:$0xf0] }
 0xe03   :  { %v2874_v40 = vpop.xlane.xlu1 %2873 }
 0xe14   :  { %v10745_v24 = vpop.xlane.xlu2 %2396 }
 0xe15   :  { %v2890_v17 = vsub.f32 %v10745_v24, %v2874_v40  ;;  %v7115_v40 = vld [vmem:[%s12315_s12 + $0x2a0] sm:$0xf] }
 0xe16   :  { %v7116_v23 = vor.u32 %v8102_v14, %v7115_v40  ;;  %v6893_v40 = vld [vmem:[%s12315_s12 + $0xfc] sm:$0xf0] }
 0xe1c   :  { %v2877_v57 = vpop.xlane.xlu2 %2876 }
 0xe1d   :  { %v2891_v59 = vsub.f32 %v2400_v8, %v2877_v57  ;;  %v2889_v61 = vpop.xlane.xlu0 %2888  ;;  %v7171_v57 = vld [vmem:[%s12315_s12 + $0x310] sm:$0xf] }
 0xe1e   :  { %v7172_v3 = vor.u32 %v8116_v52, %v7171_v57  ;;  %v6779_v57 = vld [vmem:[%s12315_s12] sm:$0xf]  ;;  %v8018_v52 = vld [vmem:[%s12315_s12 + $0x18] sm:$0xf0] }
 0xe1f   :  { %v2893_v6 = vsub.f32 %v2891_v59, %v2889_v61  ;;  %v7648_v59 = vor.u32 %v8235_v48, %v7647_v47  ;;  %v8172_v61 = vld [vmem:[%s12315_s12 + $0x4e8] sm:$0xf0]  ;;  %v7060_v47 = vor.u32 %v8088_v39, %v7059_v38  ;;  %v8025_v48 = vld [vmem:[%s12315_s12 + $0x50] sm:$0xf0]  ;;  %v6780_v2 = vor.u32 %v8018_v52, %v6779_v57  ;;  %v6837_v38 = vld [vmem:[%s12315_s12 + $0x8c] sm:$0xf0] }
 0xe20   :  { %v8169_v39 = vld [vmem:[%s12315_s12 + $0x4d4] sm:$0xf]  ;;  %v8162_v57 = vld [vmem:[%s12315_s12 + $0x49c] sm:$0xf] }
 0xe21   :  { %2896 = vst.msk [vmem:[%s12313_s20 + $0x8] sm:$0xff] %vm2894_vm4, %v2893_v6  ;;  %v7396_v6 = vor.u32 %v8172_v61, %v7395_v42  ;;  %v8064_v42 = vld [vmem:[%s12315_s12 + $0x18c] sm:$0xf]  ;;  %v8074_v61 = vld [vmem:[%s12315_s12 + $0x1d8] sm:$0xf0] }
 0xe22   :  { %v6980_v4 = vor.u32 %v8064_v42, %v6977_v63 }
 0xe24   :  { %v2886_v55 = vpop.xlane.xlu2 %2885 }
 0xe25   :  { %v2892_v20 = vsub.f32 %v2890_v17, %v2886_v55  ;;  %v7592_v17 = vor.u32 %v8221_v11, %v7591_v36  ;;  %v7563_v55 = vld [vmem:[%s12315_s12 + $0x620] sm:$0xf]  ;;  %v6952_v36 = vor.u32 %v8057_v5, %v6949_v7 }
 0xe27   :  { %2895 = vst.msk [vmem:[%s12313_s20] sm:$0xff] %vm2894_vm4, %v2892_v20  ;;  %v6892_v20 = vor.u32 %v8046_v35, %v6891_v12  ;;  %v6921_v12 = vld [vmem:[%s12315_s12 + $0x134] sm:$0xf0] }
 0xe28   :  { %v2941_v24 = vpop.f32.mrf.mxu2  ;;  %v2955_v25 = vpop.f32.mrf.mxu3 }
 0xe29   :  { %v2942_v8 = vadd.f32 %v2941_v24, %v2903_v32  ;;  %v2956_v28 = vadd.f32 %v2955_v25, %v2904_v27  ;;  %v7087_v24 = vld [vmem:[%s12315_s12 + $0x268] sm:$0xf]  ;;  %v8095_v25 = vld [vmem:[%s12315_s12 + $0x280] sm:$0xf0] }
 0xe2b   :  { %v2960_v43 = vmax.f32 %v2942_v8, 0.0  ;;  %v2961_v54 = vmax.f32 %v2956_v28, 0.0  ;;  %v7564_v8 = vor.u32 %v8214_v19, %v7563_v55  ;;  %v8151_v28 = vld [vmem:[%s12315_s12 + $0x440] sm:$0xf0]  ;;  %v7145_v55 = vld [vmem:[%s12315_s12 + $0x2f4] sm:$0xf0] }
 0xe30   :  { %v2943_v26 = vpop.f32.mrf.mxu2  ;;  %v2957_v29 = vpop.f32.mrf.mxu3 }
 0xe31   :  { %v2944_v31 = vadd.f32 %v2943_v26, %v2903_v32  ;;  %v2958_v33 = vadd.f32 %v2957_v29, %v2904_v27  ;;  %v7340_v32 = vor.u32 %v8158_v18, %v7339_v16  ;;  %v7311_v27 = vld [vmem:[%s12315_s12 + $0x428] sm:$0xf]  ;;  %v8207_v29 = vld [vmem:[%s12315_s12 + $0x600] sm:$0xf0]  ;;  %v8200_v16 = vld [vmem:[%s12315_s12 + $0x5c8] sm:$0xf0] }
 0xe32   :  { %v7535_v26 = vld [vmem:[%s12315_s12 + $0x5e8] sm:$0xf]  ;;  %v8106_v18 = vld [vmem:[%s12315_s12 + $0x2dc] sm:$0xf] }
 0xe33   :  { %v2962_v60 = vmax.f32 %v2944_v31, 0.0  ;;  %v2963_v46 = vmax.f32 %v2958_v33, 0.0  ;;  %v6835_v31 = vld [vmem:[%s12315_s12 + $0x70] sm:$0xf]  ;;  %v7088_v33 = vor.u32 %v8095_v25, %v7087_v24  ;;  %v7148_v19 = vor.u32 %v8106_v18, %v7145_v55  ;;  %v6865_v24 = vld [vmem:[%s12315_s12 + $0xc4] sm:$0xf0] }
 0xe34   :  { %v8176_v25 = vld [vmem:[%s12315_s12 + $0x50c] sm:$0xf]  ;;  %v7565_v18 = vld [vmem:[%s12315_s12 + $0x63c] sm:$0xf0] }
 0xe35   :  { %v10885_v50 = vpack.c.bf16 %v2962_v60, %v2960_v43  ;;  %v10887_v49 = vpack.c.bf16 %v2963_v46, %v2961_v54  ;;  %v7312_v43 = vor.u32 %v8151_v28, %v7311_v27  ;;  %v7536_v54 = vor.u32 %v8207_v29, %v7535_v26  ;;  %v6807_v46 = vld [vmem:[%s12315_s12 + $0x38] sm:$0xf]  ;;  %v7425_v27 = vld [vmem:[%s12315_s12 + $0x524] sm:$0xf0]  ;;  %v8193_v28 = vld [vmem:[%s12315_s12 + $0x590] sm:$0xf0] }
 0xe36   :  { %v6836_v60 = vor.u32 %v8032_v34, %v6835_v31  ;;  %v7428_v26 = vor.u32 %v8176_v25, %v7425_v27  ;;  %v7117_v31 = vld [vmem:[%s12315_s12 + $0x2bc] sm:$0xf0]  ;;  %v8029_v34 = vld [vmem:[%s12315_s12 + $0x74] sm:$0xf]  ;;  %v8134_v25 = vld [vmem:[%s12315_s12 + $0x3bc] sm:$0xf] }
 0xe37   :  { %3368 = vmatmul.bf16.vlgmr.msrb.gmra.mxu0 %v10885_v50  ;;  %3382 = vmatmul.bf16.vlgmr.msra.gmra.mxu1 %v10887_v49 }
 0xe38   :  { %3396 = vmatmul.bf16.vlgmr.msrb.gmra.mxu2 %v10885_v50  ;;  %3410 = vmatmul.bf16.vlgmr.msra.gmra.mxu3 %v10887_v49 }
 0xe39   :  { %4908 = vmatpush.bf16.msrb.mxu0 %v6976_v51  ;;  %4922 = vmatpush.bf16.msra.mxu1 %v7200_v56  ;;  %v7031_v51 = vld [vmem:[%s12315_s12 + $0x1f8] sm:$0xf]  ;;  %v6808_v56 = vor.u32 %v8025_v48, %v6807_v46  ;;  %v7089_v48 = vld [vmem:[%s12315_s12 + $0x284] sm:$0xf0] }
 0xe3a   :  { %4936 = vmatpush.bf16.msrb.mxu2 %v7424_v58  ;;  %4950 = vmatpush.bf16.msra.mxu3 %v7648_v59  ;;  %v7003_v59 = vld [vmem:[%s12315_s12 + $0x1c0] sm:$0xf] }
 0xe3d   :  { %4909 = vmatpush.bf16.msrb.mxu0 %v6948_v0  ;;  %4923 = vmatpush.bf16.msra.mxu1 %v7172_v3  ;;  %v8120_v0 = vld [vmem:[%s12315_s12 + $0x34c] sm:$0xf]  ;;  %v7004_v3 = vor.u32 %v8074_v61, %v7003_v59  ;;  %v8085_v59 = vld [vmem:[%s12315_s12 + $0x234] sm:$0xf]  ;;  %v7061_v61 = vld [vmem:[%s12315_s12 + $0x24c] sm:$0xf0] }
 0xe3e   :  { %4937 = vmatpush.bf16.msrb.mxu2 %v7396_v6  ;;  %4951 = vmatpush.bf16.msra.mxu3 %v7620_v9  ;;  %v7204_v6 = vor.u32 %v8120_v0, %v7201_v1  ;;  %v8113_v9 = vld [vmem:[%s12315_s12 + $0x314] sm:$0xf]  ;;  %v7064_v63 = vor.u32 %v8085_v59, %v7061_v61  ;;  %v7621_v0 = vld [vmem:[%s12315_s12 + $0x6ac] sm:$0xf0] }
 0xe3f   :  { %v7176_v11 = vor.u32 %v8113_v9, %v7173_v10  ;;  %v8078_v9 = vld [vmem:[%s12315_s12 + $0x1fc] sm:$0xf]  ;;  %v7033_v10 = vld [vmem:[%s12315_s12 + $0x214] sm:$0xf0] }
 0xe41   :  { %4910 = vmatpush.bf16.msrb.mxu0 %v6920_v41  ;;  %4924 = vmatpush.bf16.msra.mxu1 %v7144_v13  ;;  %v8050_v41 = vld [vmem:[%s12315_s12 + $0x11c] sm:$0xf]  ;;  %v8043_v13 = vld [vmem:[%s12315_s12 + $0xe4] sm:$0xf] }
 0xe42   :  { %4938 = vmatpush.bf16.msrb.mxu2 %v7368_v15  ;;  %4952 = vmatpush.bf16.msra.mxu3 %v7592_v17  ;;  %v6924_v35 = vor.u32 %v8050_v41, %v6921_v12  ;;  %v6896_v14 = vor.u32 %v8043_v13, %v6893_v40  ;;  %v7507_v15 = vld [vmem:[%s12315_s12 + $0x5b0] sm:$0xf]  ;;  %v7593_v41 = vld [vmem:[%s12315_s12 + $0x674] sm:$0xf0]  ;;  %v7313_v13 = vld [vmem:[%s12315_s12 + $0x444] sm:$0xf0] }
 0xe43   :  { %v7508_v17 = vor.u32 %v8200_v16, %v7507_v15  ;;  %v7005_v15 = vld [vmem:[%s12315_s12 + $0x1dc] sm:$0xf0]  ;;  %v8211_v16 = vld [vmem:[%s12315_s12 + $0x624] sm:$0xf] }
 0xe44   :  { %v7568_v55 = vor.u32 %v8211_v16, %v7565_v18  ;;  %v7179_v18 = vld [vmem:[%s12315_s12 + $0x318] sm:$0xf] }
 0xe45   :  { %4911 = vmatpush.bf16.msrb.mxu0 %v6892_v20  ;;  %4925 = vmatpush.bf16.msra.mxu1 %v7116_v23  ;;  %v7227_v20 = vld [vmem:[%s12315_s12 + $0x380] sm:$0xf]  ;;  %v8036_v23 = vld [vmem:[%s12315_s12 + $0xac] sm:$0xf] }
 0xe46   :  { %4939 = vmatpush.bf16.msrb.mxu2 %v7340_v32  ;;  %4953 = vmatpush.bf16.msra.mxu3 %v7564_v8  ;;  %v7228_v22 = vor.u32 %v8130_v21, %v7227_v20  ;;  %v6868_v32 = vor.u32 %v8036_v23, %v6865_v24  ;;  %v7479_v8 = vld [vmem:[%s12315_s12 + $0x578] sm:$0xf]  ;;  %v7285_v20 = vld [vmem:[%s12315_s12 + $0x40c] sm:$0xf0]  ;;  %v7537_v23 = vld [vmem:[%s12315_s12 + $0x604] sm:$0xf0] }
 0xe47   :  { %3424 = vmatmul.bf16.vlgmr.msra.gmra.mxu0 %v10885_v50  ;;  %3438 = vmatmul.bf16.vlgmr.msrb.gmra.mxu1 %v10887_v49  ;;  %v7480_v29 = vor.u32 %v8193_v28, %v7479_v8  ;;  %v8197_v8 = vld [vmem:[%s12315_s12 + $0x5b4] sm:$0xf]  ;;  %v7509_v28 = vld [vmem:[%s12315_s12 + $0x5cc] sm:$0xf0] }
 0xe48   :  { %3452 = vmatmul.bf16.vlgmr.msra.gmra.mxu2 %v10885_v50  ;;  %3466 = vmatmul.bf16.vlgmr.msrb.gmra.mxu3 %v10887_v49  ;;  %v8081_v50 = vld [vmem:[%s12315_s12 + $0x210] sm:$0xf0]  ;;  %v7284_v49 = vor.u32 %v8144_v45, %v7283_v44  ;;  %v7451_v44 = vld [vmem:[%s12315_s12 + $0x540] sm:$0xf]  ;;  %v8186_v45 = vld [vmem:[%s12315_s12 + $0x558] sm:$0xf0] }
 0xe49   :  { %4912 = vmatpush.bf16.msrb.mxu0 %v6864_v30  ;;  %4926 = vmatpush.bf16.msra.mxu1 %v7088_v33  ;;  %v7032_v58 = vor.u32 %v8081_v50, %v7031_v51  ;;  %v8099_v30 = vld [vmem:[%s12315_s12 + $0x2a4] sm:$0xf]  ;;  %v7452_v46 = vor.u32 %v8186_v45, %v7451_v44  ;;  %v8232_v51 = vld [vmem:[%s12315_s12 + $0x6cc] sm:$0xf] }
 0xe4a   :  { %4940 = vmatpush.bf16.msrb.mxu2 %v7312_v43  ;;  %4954 = vmatpush.bf16.msra.mxu3 %v7536_v54  ;;  %v7120_v33 = vor.u32 %v8099_v30, %v7117_v31  ;;  %v6840_v43 = vor.u32 %v8029_v34, %v6837_v38  ;;  %v7397_v54 = vld [vmem:[%s12315_s12 + $0x4ec] sm:$0xf0]  ;;  %v8127_v30 = vld [vmem:[%s12315_s12 + $0x384] sm:$0xf]  ;;  %v7229_v31 = vld [vmem:[%s12315_s12 + $0x39c] sm:$0xf0] }
 0xe4b   :  { %v7232_v38 = vor.u32 %v8127_v30, %v7229_v31  ;;  %v8110_v30 = vld [vmem:[%s12315_s12 + $0x2f8] sm:$0xf0] }
 0xe4d   :  { %4913 = vmatpush.bf16.msrb.mxu0 %v6836_v60  ;;  %4927 = vmatpush.bf16.msra.mxu1 %v7060_v47  ;;  %v7400_v60 = vor.u32 %v8169_v39, %v7397_v54  ;;  %v8092_v47 = vld [vmem:[%s12315_s12 + $0x26c] sm:$0xf]  ;;  %v7481_v54 = vld [vmem:[%s12315_s12 + $0x594] sm:$0xf0] }
 0xe4e   :  { %4941 = vmatpush.bf16.msrb.mxu2 %v7284_v49  ;;  %4955 = vmatpush.bf16.msra.mxu3 %v7508_v17  ;;  %v7092_v50 = vor.u32 %v8092_v47, %v7089_v48  ;;  %v7649_v49 = vld [vmem:[%s12315_s12 + $0x6e4] sm:$0xf0] }
 0xe4f   :  { %v7652_v37 = vor.u32 %v8232_v51, %v7649_v49 }
 0xe51   :  { %4914 = vmatpush.bf16.msrb.mxu0 %v6808_v56  ;;  %4928 = vmatpush.bf16.msra.mxu1 %v7032_v58  ;;  %v6809_v56 = vld [vmem:[%s12315_s12 + $0x54] sm:$0xf0] }
 0xe52   :  { %4942 = vmatpush.bf16.msrb.mxu2 %v7256_v62  ;;  %4956 = vmatpush.bf16.msra.mxu3 %v7480_v29  ;;  %v6812_v52 = vor.u32 %v8022_v53, %v6809_v56  ;;  %v7369_v58 = vld [vmem:[%s12315_s12 + $0x4b4] sm:$0xf0]  ;;  %v8225_v62 = vld [vmem:[%s12315_s12 + $0x694] sm:$0xf]  ;;  %v7512_v29 = vor.u32 %v8197_v8, %v7509_v28 }
 0xe53   :  { %v7372_v42 = vor.u32 %v8162_v57, %v7369_v58  ;;  %v7624_v1 = vor.u32 %v8225_v62, %v7621_v0  ;;  %v8068_v58 = vld [vmem:[%s12315_s12 + $0x1a8] sm:$0xf0] }
 0xe55   :  { %4915 = vmatpush.bf16.msrb.mxu0 %v6780_v2  ;;  %4929 = vmatpush.bf16.msra.mxu1 %v7004_v3  ;;  %v8015_v2 = vld [vmem:[%s12315_s12 + $0x4] sm:$0xf]  ;;  %v6781_v3 = vld [vmem:[%s12315_s12 + $0x1c] sm:$0xf0] }
 0xe56   :  { %4943 = vmatpush.bf16.msrb.mxu2 %v7228_v22  ;;  %4957 = vmatpush.bf16.msra.mxu3 %v7452_v46  ;;  %v6784_v5 = vor.u32 %v8015_v2, %v6781_v3  ;;  %v8204_v22 = vld [vmem:[%s12315_s12 + $0x5ec] sm:$0xf]  ;;  %v7453_v46 = vld [vmem:[%s12315_s12 + $0x55c] sm:$0xf0]  ;;  %v6955_v2 = vld [vmem:[%s12315_s12 + $0x158] sm:$0xf] }
 0xe57   :  { %v7540_v24 = vor.u32 %v8204_v22, %v7537_v23  ;;  %v8061_v3 = vld [vmem:[%s12315_s12 + $0x170] sm:$0xf0]  ;;  %v8047_v22 = vld [vmem:[%s12315_s12 + $0x100] sm:$0xf0] }
 0xe59   :  { %4964 = vmatpush.bf16.msra.mxu0 %v6980_v4  ;;  %4978 = vmatpush.bf16.msrb.mxu1 %v7204_v6  ;;  %v8155_v4 = vld [vmem:[%s12315_s12 + $0x464] sm:$0xf]  ;;  %v7341_v6 = vld [vmem:[%s12315_s12 + $0x47c] sm:$0xf0] }
 0xe5a   :  { %4992 = vmatpush.bf16.msra.mxu2 %v7428_v26  ;;  %5006 = vmatpush.bf16.msrb.mxu3 %v7652_v37  ;;  %v7344_v7 = vor.u32 %v8155_v4, %v7341_v6  ;;  %v11242_v26 = vld [vmem:[%s12316_s11] sm:$0xf] }
 0xe5b   :  { %v3032_v39 = vperm.slane %v11242_v26, 0  ;;  %v3035_v23 = vperm.slane %v11242_v26, 3 }
 0xe5d   :  { %4965 = vmatpush.bf16.msra.mxu0 %v6952_v36  ;;  %4979 = vmatpush.bf16.msrb.mxu1 %v7176_v11  ;;  %v7036_v36 = vor.u32 %v8078_v9, %v7033_v10  ;;  %v8218_v11 = vld [vmem:[%s12315_s12 + $0x65c] sm:$0xf]  ;;  %v3034_v9 = vperm.slane %v11242_v26, 2 }
 0xe5e   :  { %4993 = vmatpush.bf16.msra.mxu2 %v7400_v60  ;;  %5007 = vmatpush.bf16.msrb.mxu3 %v7624_v1  ;;  %v7596_v12 = vor.u32 %v8218_v11, %v7593_v41  ;;  %v8183_v60 = vld [vmem:[%s12315_s12 + $0x544] sm:$0xf]  ;;  %v7207_v11 = vld [vmem:[%s12315_s12 + $0x350] sm:$0xf]  ;;  %v8124_v41 = vld [vmem:[%s12315_s12 + $0x368] sm:$0xf0] }
 0xe5f   :  { %v7456_v51 = vor.u32 %v8183_v60, %v7453_v46  ;;  %v7123_v60 = vld [vmem:[%s12315_s12 + $0x2a8] sm:$0xf]  ;;  %v8103_v46 = vld [vmem:[%s12315_s12 + $0x2c0] sm:$0xf0] }
 0xe61   :  { %4966 = vmatpush.bf16.msra.mxu0 %v6924_v35  ;;  %4980 = vmatpush.bf16.msrb.mxu1 %v7148_v19  ;;  %v8148_v35 = vld [vmem:[%s12315_s12 + $0x42c] sm:$0xf]  ;;  %v8141_v19 = vld [vmem:[%s12315_s12 + $0x3f4] sm:$0xf] }
 0xe62   :  { %4994 = vmatpush.bf16.msra.mxu2 %v7372_v42  ;;  %v7316_v40 = vor.u32 %v8148_v35, %v7313_v13  ;;  %5008 = vmatpush.bf16.msrb.mxu3 %v7596_v12  ;;  %v7288_v21 = vor.u32 %v8141_v19, %v7285_v20  ;;  %v6927_v12 = vld [vmem:[%s12315_s12 + $0x120] sm:$0xf]  ;;  %v8054_v35 = vld [vmem:[%s12315_s12 + $0x138] sm:$0xf0] }
 0xe65   :  { %4967 = vmatpush.bf16.msra.mxu0 %v6896_v14  ;;  %4981 = vmatpush.bf16.msrb.mxu1 %v7120_v33  ;;  %v8071_v14 = vld [vmem:[%s12315_s12 + $0x1c4] sm:$0xf] }
 0xe66   :  { %4995 = vmatpush.bf16.msra.mxu2 %v7344_v7  ;;  %v7008_v17 = vor.u32 %v8071_v14, %v7005_v15  ;;  %5009 = vmatpush.bf16.msrb.mxu3 %v7568_v55  ;;  %v7208_v15 = vor.u32 %v8124_v41, %v7207_v11  ;;  %v8117_v55 = vld [vmem:[%s12315_s12 + $0x330] sm:$0xf0]  ;;  %v7067_v11 = vld [vmem:[%s12315_s12 + $0x238] sm:$0xf] }
 0xe69   :  { %4968 = vmatpush.bf16.msra.mxu0 %v6868_v32  ;;  %4982 = vmatpush.bf16.msrb.mxu1 %v7092_v50  ;;  %v7257_v32 = vld [vmem:[%s12315_s12 + $0x3d4] sm:$0xf0]  ;;  %v3033_v50 = vperm.slane %v11242_v26, 1  ;;  %v7431_v26 = vld [vmem:[%s12315_s12 + $0x510] sm:$0xf] }
 0xe6a   :  { %4996 = vmatpush.bf16.msra.mxu2 %v7316_v40  ;;  %5010 = vmatpush.bf16.msrb.mxu3 %v7540_v24  ;;  %v7260_v27 = vor.u32 %v8134_v25, %v7257_v32 }
 0xe6d   :  { %4969 = vmatpush.bf16.msra.mxu0 %v6840_v43  ;;  %4983 = vmatpush.bf16.msrb.mxu1 %v7064_v63  ;;  %v8190_v43 = vld [vmem:[%s12315_s12 + $0x57c] sm:$0xf] }
 0xe6e   :  { %4997 = vmatpush.bf16.msra.mxu2 %v7288_v21  ;;  %5011 = vmatpush.bf16.msrb.mxu3 %v7512_v29  ;;  %v7484_v44 = vor.u32 %v8190_v43, %v7481_v54  ;;  %v6899_v21 = vld [vmem:[%s12315_s12 + $0xe8] sm:$0xf]  ;;  %v7151_v29 = vld [vmem:[%s12315_s12 + $0x2e0] sm:$0xf] }
 0xe6f   :  { %v6900_v28 = vor.u32 %v8047_v22, %v6899_v21  ;;  %v8065_v21 = vld [vmem:[%s12315_s12 + $0x194] sm:$0xf]  ;;  %v6985_v22 = vld [vmem:[%s12315_s12 + $0x1ac] sm:$0xf0] }
 0xe71   :  { %4970 = vmatpush.bf16.msra.mxu0 %v6812_v52  ;;  %4984 = vmatpush.bf16.msrb.mxu1 %v7036_v36  ;;  %v6983_v52 = vld [vmem:[%s12315_s12 + $0x190] sm:$0xf]  ;;  %v6956_v36 = vor.u32 %v8061_v3, %v6955_v2  ;;  %v7375_v3 = vld [vmem:[%s12315_s12 + $0x4a0] sm:$0xf] }
 0xe72   :  { %4998 = vmatpush.bf16.msra.mxu2 %v7260_v27  ;;  %5012 = vmatpush.bf16.msrb.mxu3 %v7484_v44  ;;  %v6984_v62 = vor.u32 %v8068_v58, %v6983_v52  ;;  %v7180_v27 = vor.u32 %v8117_v55, %v7179_v18  ;;  %v7152_v44 = vor.u32 %v8110_v30, %v7151_v29  ;;  %v6787_v18 = vld [vmem:[%s12315_s12 + $0x8] sm:$0xf]  ;;  %v8019_v55 = vld [vmem:[%s12315_s12 + $0x20] sm:$0xf0]  ;;  %v7319_v29 = vld [vmem:[%s12315_s12 + $0x430] sm:$0xf] }
 0xe73   :  { %v7124_v58 = vor.u32 %v8103_v46, %v7123_v60  ;;  %v8152_v30 = vld [vmem:[%s12315_s12 + $0x448] sm:$0xf0]  ;;  %v7209_v60 = vld [vmem:[%s12315_s12 + $0x36c] sm:$0xf0] }
 0xe75   :  { %4971 = vmatpush.bf16.msra.mxu0 %v6784_v5  ;;  %4985 = vmatpush.bf16.msrb.mxu1 %v7008_v17  ;;  %v6928_v17 = vor.u32 %v8054_v35, %v6927_v12  ;;  %v8089_v35 = vld [vmem:[%s12315_s12 + $0x250] sm:$0xf0] }
 0xe76   :  { %4999 = vmatpush.bf16.msra.mxu2 %v7232_v38  ;;  %5013 = vmatpush.bf16.msrb.mxu3 %v7456_v51  ;;  %v6871_v38 = vld [vmem:[%s12315_s12 + $0xb0] sm:$0xf] }
 0xeb4   :  { %v3369_v33 = vpop.f32.mrf.mxu0  ;;  %v3383_v34 = vpop.f32.mrf.mxu1 }
 0xeb5   :  { %v3370_v45 = vadd.f32 %v3369_v33, %v3032_v39  ;;  %v8180_v33 = vld [vmem:[%s12315_s12 + $0x528] sm:$0xf0] }
 0xeb7   :  { %v3384_v53 = vadd.f32 %v3383_v34, %v3370_v45  ;;  %v7432_v45 = vor.u32 %v8180_v33, %v7431_v26  ;;  %v8058_v33 = vld [vmem:[%s12315_s12 + $0x15c] sm:$0xf] }
 0xeb9   :  { %v3472_v59 = vmax.f32 %v3384_v53, 0.0 }
 0xebb   :  { %v3397_v47 = vpop.f32.mrf.mxu2  ;;  %v3411_v48 = vpop.f32.mrf.mxu3 }
 0xebc   :  { %v3371_v49 = vpop.f32.mrf.mxu0  ;;  %v3385_v37 = vpop.f32.mrf.mxu1  ;;  %v3398_v42 = vadd.f32 %v3397_v47, %v3033_v50 }
 0xebd   :  { %v3372_v56 = vadd.f32 %v3371_v49, %v3032_v39  ;;  %v8040_v39 = vld [vmem:[%s12315_s12 + $0xc8] sm:$0xf0]  ;;  %v8173_v49 = vld [vmem:[%s12315_s12 + $0x4f0] sm:$0xf0] }
 0xebe   :  { %v3412_v4 = vadd.f32 %v3411_v48, %v3398_v42  ;;  %v6872_v51 = vor.u32 %v8040_v39, %v6871_v38  ;;  %v7095_v42 = vld [vmem:[%s12315_s12 + $0x270] sm:$0xf]  ;;  %v7011_v38 = vld [vmem:[%s12315_s12 + $0x1c8] sm:$0xf]  ;;  %v8075_v39 = vld [vmem:[%s12315_s12 + $0x1e0] sm:$0xf0] }
 0xebf   :  { %v3386_v57 = vadd.f32 %v3385_v37, %v3372_v56  ;;  %v6843_v56 = vld [vmem:[%s12315_s12 + $0x78] sm:$0xf] }
 0xec0   :  { %v3473_v13 = vmax.f32 %v3412_v4, 0.0  ;;  %v8166_v4 = vld [vmem:[%s12315_s12 + $0x4b8] sm:$0xf0] }
 0xec1   :  { %v3476_v61 = vmax.f32 %v3386_v57, 0.0  ;;  %v8033_v57 = vld [vmem:[%s12315_s12 + $0x90] sm:$0xf0]  ;;  %v7376_v12 = vor.u32 %v8166_v4, %v7375_v3  ;;  %v6901_v3 = vld [vmem:[%s12315_s12 + $0x104] sm:$0xf0] }
 0xec2   :  { %v6844_v2 = vor.u32 %v8033_v57, %v6843_v56  ;;  %v7543_v57 = vld [vmem:[%s12315_s12 + $0x5f0] sm:$0xf] }
 0xec3   :  { %v11270_v63 = vpack.c.bf16 %v3476_v61, %v3472_v59  ;;  %v3399_v0 = vpop.f32.mrf.mxu2  ;;  %v3413_v1 = vpop.f32.mrf.mxu3 }
 0xec4   :  { %v3400_v5 = vadd.f32 %v3399_v0, %v3033_v50  ;;  %v3425_v6 = vpop.f32.mrf.mxu0  ;;  %v3439_v7 = vpop.f32.mrf.mxu1  ;;  %v7403_v50 = vld [vmem:[%s12315_s12 + $0x4d8] sm:$0xf]  ;;  %v7655_v0 = vld [vmem:[%s12315_s12 + $0x6d0] sm:$0xf] }
 0xec5   :  { %4916 = vmatmul.bf16.vlgmr.msrb.gmra.mxu0 %v11270_v63  ;;  %v3426_v14 = vadd.f32 %v3425_v6, %v3034_v9  ;;  %v7404_v61 = vor.u32 %v8173_v49, %v7403_v50  ;;  %v7012_v50 = vor.u32 %v8075_v39, %v7011_v38 }
 0xec6   :  { %v3414_v10 = vadd.f32 %v3413_v1, %v3400_v5  ;;  %5020 = vmatpush.bf16.msrb.mxu0 %v6984_v62  ;;  %v8096_v62 = vld [vmem:[%s12315_s12 + $0x288] sm:$0xf0] }
 0xec7   :  { %v3440_v25 = vadd.f32 %v3439_v7, %v3426_v14  ;;  %v8236_v1 = vld [vmem:[%s12315_s12 + $0x6e8] sm:$0xf0]  ;;  %v6815_v7 = vld [vmem:[%s12315_s12 + $0x40] sm:$0xf] }
 0xec8   :  { %v3477_v40 = vmax.f32 %v3414_v10, 0.0  ;;  %v7096_v10 = vor.u32 %v8096_v62, %v7095_v42  ;;  %v8114_v42 = vld [vmem:[%s12315_s12 + $0x31c] sm:$0xf]  ;;  %v7263_v62 = vld [vmem:[%s12315_s12 + $0x3c0] sm:$0xf] }
 0xec9   :  { %v3474_v43 = vmax.f32 %v3440_v25, 0.0  ;;  %v8082_v25 = vld [vmem:[%s12315_s12 + $0x218] sm:$0xf0] }
 0xeca   :  { %v11292_v16 = vpack.c.bf16 %v3477_v40, %v3473_v13  ;;  %5021 = vmatpush.bf16.msrb.mxu0 %v6956_v36  ;;  %v7656_v36 = vor.u32 %v8236_v1, %v7655_v0  ;;  %v7627_v13 = vld [vmem:[%s12315_s12 + $0x698] sm:$0xf]  ;;  %v8229_v40 = vld [vmem:[%s12315_s12 + $0x6b0] sm:$0xf0]  ;;  %v8138_v0 = vld [vmem:[%s12315_s12 + $0x3d8] sm:$0xf0] }
 0xecb   :  { %v3453_v19 = vpop.f32.mrf.mxu2  ;;  %v3467_v20 = vpop.f32.mrf.mxu3 }
 0xecc   :  { %4930 = vmatmul.bf16.vlgmr.msra.gmra.mxu1 %v11292_v16  ;;  %v3427_v24 = vpop.f32.mrf.mxu0  ;;  %v3441_v8 = vpop.f32.mrf.mxu1  ;;  %v3454_v34 = vadd.f32 %v3453_v19, %v3035_v23  ;;  %v7068_v19 = vor.u32 %v8089_v35, %v7067_v11  ;;  %v7235_v11 = vld [vmem:[%s12315_s12 + $0x388] sm:$0xf]  ;;  %v8037_v35 = vld [vmem:[%s12315_s12 + $0xb4] sm:$0xf] }
 0xecd   :  { %5034 = vmatpush.bf16.msra.mxu1 %v7208_v15  ;;  %v3428_v32 = vadd.f32 %v3427_v24, %v3034_v9  ;;  %v8026_v9 = vld [vmem:[%s12315_s12 + $0x58] sm:$0xf0]  ;;  %v7347_v15 = vld [vmem:[%s12315_s12 + $0x468] sm:$0xf] }
 0xece   :  { %5022 = vmatpush.bf16.msrb.mxu0 %v6928_v17  ;;  %v3468_v37 = vadd.f32 %v3467_v20, %v3454_v34  ;;  %v6816_v14 = vor.u32 %v8026_v9, %v6815_v7  ;;  %v8159_v17 = vld [vmem:[%s12315_s12 + $0x480] sm:$0xf0]  ;;  %v7628_v20 = vor.u32 %v8229_v40, %v7627_v13  ;;  %v6957_v34 = vld [vmem:[%s12315_s12 + $0x174] sm:$0xf0]  ;;  %v7264_v7 = vor.u32 %v8138_v0, %v7263_v62  ;;  %v6873_v40 = vld [vmem:[%s12315_s12 + $0xcc] sm:$0xf0] }
 0xecf   :  { %v3442_v31 = vadd.f32 %v3441_v8, %v3428_v32  ;;  %v7348_v24 = vor.u32 %v8159_v17, %v7347_v15  ;;  %v7599_v32 = vld [vmem:[%s12315_s12 + $0x660] sm:$0xf]  ;;  %v6788_v8 = vor.u32 %v8019_v55, %v6787_v18  ;;  %v6960_v46 = vor.u32 %v8058_v33, %v6957_v34  ;;  %v8107_v9 = vld [vmem:[%s12315_s12 + $0x2e4] sm:$0xf]  ;;  %v7433_v15 = vld [vmem:[%s12315_s12 + $0x52c] sm:$0xf0] }
 0xed0   :  { %v3475_v5 = vmax.f32 %v3468_v37, 0.0  ;;  %v8051_v37 = vld [vmem:[%s12315_s12 + $0x124] sm:$0xf]  ;;  %v7487_v18 = vld [vmem:[%s12315_s12 + $0x580] sm:$0xf] }
 0xed1   :  { %v3478_v54 = vmax.f32 %v3442_v31, 0.0  ;;  %5035 = vmatpush.bf16.msra.mxu1 %v7180_v27  ;;  %v8222_v27 = vld [vmem:[%s12315_s12 + $0x678] sm:$0xf0]  ;;  %v8233_v33 = vld [vmem:[%s12315_s12 + $0x6d4] sm:$0xf] }
 0xed2   :  { %5023 = vmatpush.bf16.msrb.mxu0 %v6900_v28  ;;  %v6988_v28 = vor.u32 %v8065_v21, %v6985_v22  ;;  %v7600_v26 = vor.u32 %v8222_v27, %v7599_v32  ;;  %v8194_v55 = vld [vmem:[%s12315_s12 + $0x598] sm:$0xf0]  ;;  %v7125_v21 = vld [vmem:[%s12315_s12 + $0x2c4] sm:$0xf0]  ;;  %v6876_v22 = vor.u32 %v8037_v35, %v6873_v40  ;;  %v6845_v32 = vld [vmem:[%s12315_s12 + $0x94] sm:$0xf0] }
 0xed3   :  { %v11332_v47 = vpack.c.bf16 %v3478_v54, %v3474_v43  ;;  %v3455_v48 = vpop.f32.mrf.mxu2  ;;  %v3469_v52 = vpop.f32.mrf.mxu3  ;;  %v7571_v43 = vld [vmem:[%s12315_s12 + $0x628] sm:$0xf]  ;;  %v8215_v54 = vld [vmem:[%s12315_s12 + $0x640] sm:$0xf0]  ;;  %v8170_v27 = vld [vmem:[%s12315_s12 + $0x4dc] sm:$0xf] }
 0xed4   :  { %v3456_v53 = vadd.f32 %v3455_v48, %v3035_v23  ;;  %v7039_v23 = vld [vmem:[%s12315_s12 + $0x200] sm:$0xf]  ;;  %v7291_v48 = vld [vmem:[%s12315_s12 + $0x3f8] sm:$0xf]  ;;  %v7572_v49 = vor.u32 %v8215_v54, %v7571_v43  ;;  %v7657_v34 = vld [vmem:[%s12315_s12 + $0x6ec] sm:$0xf0] }
 0xed5   :  { %5036 = vmatpush.bf16.msra.mxu1 %v7152_v44  ;;  %4944 = vmatmul.bf16.vlgmr.msrb.gmra.mxu2 %v11332_v47  ;;  %v7040_v31 = vor.u32 %v8082_v25, %v7039_v23  ;;  %v7320_v44 = vor.u32 %v8152_v30, %v7319_v29  ;;  %v7488_v25 = vor.u32 %v8194_v55, %v7487_v18  ;;  %v7459_v29 = vld [vmem:[%s12315_s12 + $0x548] sm:$0xf]  ;;  %v8187_v30 = vld [vmem:[%s12315_s12 + $0x560] sm:$0xf0]  ;;  %v6991_v62 = vld [vmem:[%s12315_s12 + $0x198] sm:$0xf] }
 0xed6   :  { %v3470_v59 = vadd.f32 %v3469_v52, %v3456_v53  ;;  %4972 = vmatmul.bf16.vlgmr.msra.gmra.mxu0 %v11270_v63  ;;  %5048 = vmatpush.bf16.msrb.mxu2 %v7432_v45  ;;  %v8121_v45 = vld [vmem:[%s12315_s12 + $0x354] sm:$0xf]  ;;  %v6929_v53 = vld [vmem:[%s12315_s12 + $0x13c] sm:$0xf0]  ;;  %v8208_v52 = vld [vmem:[%s12315_s12 + $0x608] sm:$0xf0]  ;;  %v7460_v54 = vor.u32 %v8187_v30, %v7459_v29 }
 0xed7   :  { %5024 = vmatpush.bf16.msrb.mxu0 %v6872_v51  ;;  %v8145_v51 = vld [vmem:[%s12315_s12 + $0x410] sm:$0xf0]  ;;  %v7212_v56 = vor.u32 %v8121_v45, %v7209_v60  ;;  %v7544_v1 = vor.u32 %v8208_v52, %v7543_v57  ;;  %v8023_v43 = vld [vmem:[%s12315_s12 + $0x44] sm:$0xf]  ;;  %v7377_v60 = vld [vmem:[%s12315_s12 + $0x4bc] sm:$0xf0] }
 0xed8   :  { %v3479_v6 = vmax.f32 %v3470_v59, 0.0  ;;  %v7181_v59 = vld [vmem:[%s12315_s12 + $0x334] sm:$0xf0]  ;;  %v8163_v45 = vld [vmem:[%s12315_s12 + $0x4a4] sm:$0xf] }
 0xed9   :  { %5037 = vmatpush.bf16.msra.mxu1 %v7124_v58  ;;  %v7292_v58 = vor.u32 %v8145_v51, %v7291_v48  ;;  %v7184_v4 = vor.u32 %v8114_v42, %v7181_v59  ;;  %v7660_v48 = vor.u32 %v8233_v33, %v7657_v34  ;;  %v8086_v51 = vld [vmem:[%s12315_s12 + $0x23c] sm:$0xf]  ;;  %v8016_v57 = vld [vmem:[%s12315_s12 + $0xc] sm:$0xf]  ;;  %v6789_v52 = vld [vmem:[%s12315_s12 + $0x24] sm:$0xf0] }
 0xeda   :  { %v11375_v41 = vpack.c.bf16 %v3479_v6, %v3475_v5  ;;  %5049 = vmatpush.bf16.msrb.mxu2 %v7404_v61  ;;  %v6932_v61 = vor.u32 %v8051_v37, %v6929_v53  ;;  %v7515_v5 = vld [vmem:[%s12315_s12 + $0x5b8] sm:$0xf]  ;;  %v8201_v6 = vld [vmem:[%s12315_s12 + $0x5d0] sm:$0xf0]  ;;  %v7349_v42 = vld [vmem:[%s12315_s12 + $0x484] sm:$0xf0] }
 0xedb   :  { %5025 = vmatpush.bf16.msrb.mxu0 %v6844_v2  ;;  %v8044_v2 = vld [vmem:[%s12315_s12 + $0xec] sm:$0xf]  ;;  %v7516_v13 = vor.u32 %v8201_v6, %v7515_v5  ;;  %v7629_v37 = vld [vmem:[%s12315_s12 + $0x6b4] sm:$0xf0]  ;;  %v8069_v0 = vld [vmem:[%s12315_s12 + $0x1b0] sm:$0xf0]  ;;  %v6792_v5 = vor.u32 %v8016_v57, %v6789_v52 }
 0xedc   :  { %4958 = vmatmul.bf16.vlgmr.msra.gmra.mxu3 %v11375_v41  ;;  %4986 = vmatmul.bf16.vlgmr.msrb.gmra.mxu1 %v11292_v16  ;;  %v8062_v35 = vld [vmem:[%s12315_s12 + $0x178] sm:$0xf0]  ;;  %v7013_v40 = vld [vmem:[%s12315_s12 + $0x1e4] sm:$0xf0]  ;;  %v7215_v18 = vld [vmem:[%s12315_s12 + $0x358] sm:$0xf] }
 0xedd   :  { %5038 = vmatpush.bf16.msra.mxu1 %v7096_v10  ;;  %5062 = vmatpush.bf16.msra.mxu3 %v7656_v36  ;;  %v7153_v10 = vld [vmem:[%s12315_s12 + $0x2fc] sm:$0xf0]  ;;  %v6904_v36 = vor.u32 %v8044_v2, %v6901_v3  ;;  %v8219_v3 = vld [vmem:[%s12315_s12 + $0x664] sm:$0xf]  ;;  %v8125_v55 = vld [vmem:[%s12315_s12 + $0x370] sm:$0xf0] }
 0xede   :  { %5050 = vmatpush.bf16.msrb.mxu2 %v7376_v12  ;;  %v8131_v12 = vld [vmem:[%s12315_s12 + $0x3a0] sm:$0xf0]  ;;  %v7156_v17 = vor.u32 %v8107_v9, %v7153_v10  ;;  %v7041_v2 = vld [vmem:[%s12315_s12 + $0x21c] sm:$0xf0]  ;;  %v8149_v9 = vld [vmem:[%s12315_s12 + $0x434] sm:$0xf] }
 0xedf   :  { %5026 = vmatpush.bf16.msrb.mxu0 %v6816_v14  ;;  %v8177_v14 = vld [vmem:[%s12315_s12 + $0x514] sm:$0xf]  ;;  %v7321_v10 = vld [vmem:[%s12315_s12 + $0x44c] sm:$0xf0]  ;;  %v7187_v29 = vld [vmem:[%s12315_s12 + $0x320] sm:$0xf] }
 0xee0   :  { %v7436_v23 = vor.u32 %v8177_v14, %v7433_v15  ;;  %v8212_v14 = vld [vmem:[%s12315_s12 + $0x62c] sm:$0xf]  ;;  %v7573_v15 = vld [vmem:[%s12315_s12 + $0x644] sm:$0xf0]  ;;  %v8118_v30 = vld [vmem:[%s12315_s12 + $0x338] sm:$0xf0] }
 0xee1   :  { %5039 = vmatpush.bf16.msra.mxu1 %v7068_v19  ;;  %5063 = vmatpush.bf16.msra.mxu3 %v7628_v20  ;;  %v7236_v19 = vor.u32 %v8131_v12, %v7235_v11  ;;  %v8100_v20 = vld [vmem:[%s12315_s12 + $0x2ac] sm:$0xf]  ;;  %v6963_v12 = vld [vmem:[%s12315_s12 + $0x160] sm:$0xf]  ;;  %v8181_v57 = vld [vmem:[%s12315_s12 + $0x530] sm:$0xf0] }
 0xee2   :  { %5051 = vmatpush.bf16.msrb.mxu2 %v7348_v24  ;;  %v8030_v24 = vld [vmem:[%s12315_s12 + $0x7c] sm:$0xf]  ;;  %v7265_v33 = vld [vmem:[%s12315_s12 + $0x3dc] sm:$0xf0] }
 0xee3   :  { %5027 = vmatpush.bf16.msrb.mxu0 %v6788_v8  ;;  %v7405_v8 = vld [vmem:[%s12315_s12 + $0x4f4] sm:$0xf0]  ;;  %v6848_v38 = vor.u32 %v8030_v24, %v6845_v32  ;;  %v6935_v24 = vld [vmem:[%s12315_s12 + $0x128] sm:$0xf]  ;;  %v7216_v32 = vor.u32 %v8125_v55, %v7215_v18 }
 0xee4   :  { %v7408_v39 = vor.u32 %v8170_v27, %v7405_v8  ;;  %v8205_v27 = vld [vmem:[%s12315_s12 + $0x5f4] sm:$0xf]  ;;  %v7545_v8 = vld [vmem:[%s12315_s12 + $0x60c] sm:$0xf0] }
 0xee5   :  { %5040 = vmatpush.bf16.msra.mxu1 %v7040_v31  ;;  %5064 = vmatpush.bf16.msra.mxu3 %v7600_v26  ;;  %v8093_v31 = vld [vmem:[%s12315_s12 + $0x274] sm:$0xf]  ;;  %v7097_v26 = vld [vmem:[%s12315_s12 + $0x28c] sm:$0xf0]  ;;  %v7548_v34 = vor.u32 %v8205_v27, %v7545_v8  ;;  %v8020_v8 = vld [vmem:[%s12315_s12 + $0x28] sm:$0xf0] }
 0xee6   :  { %5000 = vmatmul.bf16.vlgmr.msra.gmra.mxu2 %v11332_v47  ;;  %5028 = vmatmul.bf16.vlgmr.msrb.gmra.mxu0 %v11270_v63 }
 0xee7   :  { %5076 = vmatpush.bf16.msra.mxu0 %v6988_v28  ;;  %5052 = vmatpush.bf16.msrb.mxu2 %v7320_v44  ;;  %v7128_v28 = vor.u32 %v8100_v20, %v7125_v21  ;;  %v6817_v44 = vld [vmem:[%s12315_s12 + $0x5c] sm:$0xf0]  ;;  %v8142_v20 = vld [vmem:[%s12315_s12 + $0x3fc] sm:$0xf]  ;;  %v7293_v21 = vld [vmem:[%s12315_s12 + $0x414] sm:$0xf0] }
 0xee8   :  { %v6820_v53 = vor.u32 %v8023_v43, %v6817_v44  ;;  %v7188_v43 = vor.u32 %v8118_v30, %v7187_v29  ;;  %v7517_v44 = vld [vmem:[%s12315_s12 + $0x5d4] sm:$0xf0]  ;;  %v8160_v29 = vld [vmem:[%s12315_s12 + $0x488] sm:$0xf0] }
 0xee9   :  { %5041 = vmatpush.bf16.msra.mxu1 %v7012_v50  ;;  %5065 = vmatpush.bf16.msra.mxu3 %v7572_v49  ;;  %v7069_v50 = vld [vmem:[%s12315_s12 + $0x254] sm:$0xf0]  ;;  %v8226_v49 = vld [vmem:[%s12315_s12 + $0x69c] sm:$0xf] }
 0xeea   :  { %v7072_v59 = vor.u32 %v8086_v51, %v7069_v50  ;;  %v8128_v51 = vld [vmem:[%s12315_s12 + $0x38c] sm:$0xf]  ;;  %v7237_v50 = vld [vmem:[%s12315_s12 + $0x3a4] sm:$0xf0] }
 0xeeb   :  { %5077 = vmatpush.bf16.msra.mxu0 %v6960_v46  ;;  %5053 = vmatpush.bf16.msrb.mxu2 %v7292_v58  ;;  %v7100_v46 = vor.u32 %v8093_v31, %v7097_v26  ;;  %v8156_v58 = vld [vmem:[%s12315_s12 + $0x46c] sm:$0xf]  ;;  %v8135_v26 = vld [vmem:[%s12315_s12 + $0x3c4] sm:$0xf] }
 0xeec   :  { %5014 = vmatmul.bf16.vlgmr.msrb.gmra.mxu3 %v11375_v41  ;;  %5042 = vmatmul.bf16.vlgmr.msra.gmra.mxu1 %v11292_v16  ;;  %v7352_v6 = vor.u32 %v8156_v58, %v7349_v42  ;;  %v8191_v58 = vld [vmem:[%s12315_s12 + $0x584] sm:$0xf]  ;;  %v7489_v42 = vld [vmem:[%s12315_s12 + $0x59c] sm:$0xf0] }
 0xeed   :  { %5090 = vmatpush.bf16.msrb.mxu1 %v7212_v56  ;;  %5066 = vmatpush.bf16.msra.mxu3 %v7544_v1  ;;  %v7380_v56 = vor.u32 %v8163_v45, %v7377_v60  ;;  %v8079_v1 = vld [vmem:[%s12315_s12 + $0x204] sm:$0xf]  ;;  %v7268_v45 = vor.u32 %v8135_v26, %v7265_v33  ;;  %v7159_v60 = vld [vmem:[%s12315_s12 + $0x2e8] sm:$0xf]  ;;  %v8066_v26 = vld [vmem:[%s12315_s12 + $0x19c] sm:$0xf] }
 0xeee   :  { %v6993_v33 = vld [vmem:[%s12315_s12 + $0x1b4] sm:$0xf0] }
 0xeef   :  { %5078 = vmatpush.bf16.msra.mxu0 %v6932_v61  ;;  %5054 = vmatpush.bf16.msrb.mxu2 %v7264_v7  ;;  %v7632_v61 = vor.u32 %v8226_v49, %v7629_v37  ;;  %v6992_v7 = vor.u32 %v8069_v0, %v6991_v62  ;;  %v6879_v49 = vld [vmem:[%s12315_s12 + $0xb8] sm:$0xf]  ;;  %v8104_v62 = vld [vmem:[%s12315_s12 + $0x2c8] sm:$0xf0] }
 0xef1   :  { %5091 = vmatpush.bf16.msrb.mxu1 %v7184_v4  ;;  %5067 = vmatpush.bf16.msra.mxu3 %v7516_v13  ;;  %v7601_v4 = vld [vmem:[%s12315_s12 + $0x67c] sm:$0xf0]  ;;  %v8072_v13 = vld [vmem:[%s12315_s12 + $0x1cc] sm:$0xf] }
 0xef2   :  { %v7604_v11 = vor.u32 %v8219_v3, %v7601_v4  ;;  %v7492_v3 = vor.u32 %v8191_v58, %v7489_v42  ;;  %v8034_v4 = vld [vmem:[%s12315_s12 + $0x98] sm:$0xf0]  ;;  %v7217_v58 = vld [vmem:[%s12315_s12 + $0x374] sm:$0xf0] }
 0xef3   :  { %5079 = vmatpush.bf16.msra.mxu0 %v6904_v36  ;;  %5055 = vmatpush.bf16.msrb.mxu2 %v7236_v19  ;;  %v7044_v36 = vor.u32 %v8079_v1, %v7041_v2  ;;  %v6964_v19 = vor.u32 %v8062_v35, %v6963_v12  ;;  %v6851_v2 = vld [vmem:[%s12315_s12 + $0x80] sm:$0xf]  ;;  %v7663_v12 = vld [vmem:[%s12315_s12 + $0x6d8] sm:$0xf]  ;;  %v8237_v35 = vld [vmem:[%s12315_s12 + $0x6f0] sm:$0xf0] }
 0xef4   :  { %v7664_v55 = vor.u32 %v8237_v35, %v7663_v12  ;;  %v7271_v12 = vld [vmem:[%s12315_s12 + $0x3c8] sm:$0xf]  ;;  %v8139_v35 = vld [vmem:[%s12315_s12 + $0x3e0] sm:$0xf0] }
 0xef5   :  { %5092 = vmatpush.bf16.msrb.mxu1 %v7156_v17  ;;  %5068 = vmatpush.bf16.msra.mxu3 %v7488_v25  ;;  %v7324_v17 = vor.u32 %v8149_v9, %v7321_v10  ;;  %v8055_v25 = vld [vmem:[%s12315_s12 + $0x140] sm:$0xf0]  ;;  %v8184_v9 = vld [vmem:[%s12315_s12 + $0x54c] sm:$0xf]  ;;  %v7461_v10 = vld [vmem:[%s12315_s12 + $0x564] sm:$0xf0] }
 0xef6   :  { %5056 = vmatmul.bf16.vlgmr.msrb.gmra.mxu2 %v11332_v47  ;;  %v6936_v31 = vor.u32 %v8055_v25, %v6935_v24  ;;  %v8230_v24 = vld [vmem:[%s12315_s12 + $0x6b8] sm:$0xf0] }
 0xef7   :  { %5080 = vmatpush.bf16.msra.mxu0 %v6876_v22  ;;  %5104 = vmatpush.bf16.msra.mxu2 %v7436_v23  ;;  %v7016_v22 = vor.u32 %v8072_v13, %v7013_v40  ;;  %v7576_v23 = vor.u32 %v8212_v14, %v7573_v15  ;;  %v6852_v13 = vor.u32 %v8034_v4, %v6851_v2  ;;  %v6823_v15 = vld [vmem:[%s12315_s12 + $0x48] sm:$0xf]  ;;  %v8052_v2 = vld [vmem:[%s12315_s12 + $0x12c] sm:$0xf] }
 0xef8   :  { %v7464_v14 = vor.u32 %v8184_v9, %v7461_v10  ;;  %v6937_v4 = vld [vmem:[%s12315_s12 + $0x144] sm:$0xf0]  ;;  %v7189_v9 = vld [vmem:[%s12315_s12 + $0x33c] sm:$0xf0] }
 0xef9   :  { %5093 = vmatpush.bf16.msrb.mxu1 %v7128_v28  ;;  %5069 = vmatpush.bf16.msra.mxu3 %v7460_v54  ;;  %v7296_v28 = vor.u32 %v8142_v20, %v7293_v21  ;;  %v8198_v54 = vld [vmem:[%s12315_s12 + $0x5bc] sm:$0xf]  ;;  %v8167_v20 = vld [vmem:[%s12315_s12 + $0x4c0] sm:$0xf0]  ;;  %v7075_v21 = vld [vmem:[%s12315_s12 + $0x240] sm:$0xf] }
 0xefa   :  { %v7520_v37 = vor.u32 %v8198_v54, %v7517_v44 }
 0xefb   :  { %5081 = vmatpush.bf16.msra.mxu0 %v6848_v38  ;;  %5105 = vmatpush.bf16.msra.mxu2 %v7408_v39  ;;  %v6907_v38 = vld [vmem:[%s12315_s12 + $0xf0] sm:$0xf]  ;;  %v8048_v39 = vld [vmem:[%s12315_s12 + $0x108] sm:$0xf0] }
 0xefc   :  { %5070 = vmatmul.bf16.vlgmr.msra.gmra.mxu3 %v11375_v41 }
 0xefd   :  { %5094 = vmatpush.bf16.msrb.mxu1 %v7100_v46  ;;  %5118 = vmatpush.bf16.msrb.mxu3 %v7660_v48  ;;  %v8111_v46 = vld [vmem:[%s12315_s12 + $0x300] sm:$0xf0]  ;;  %v6908_v48 = vor.u32 %v8048_v39, %v6907_v38  ;;  %v7607_v39 = vld [vmem:[%s12315_s12 + $0x668] sm:$0xf] }
 0xefe   :  { %v7160_v52 = vor.u32 %v8111_v46, %v7159_v60  ;;  %v8083_v38 = vld [vmem:[%s12315_s12 + $0x220] sm:$0xf0]  ;;  %v7327_v60 = vld [vmem:[%s12315_s12 + $0x438] sm:$0xf]  ;;  %v8153_v46 = vld [vmem:[%s12315_s12 + $0x450] sm:$0xf0] }
 0xeff   :  { %5082 = vmatpush.bf16.msra.mxu0 %v6820_v53  ;;  %5106 = vmatpush.bf16.msra.mxu2 %v7380_v56  ;;  %v8041_v53 = vld [vmem:[%s12315_s12 + $0xd0] sm:$0xf0]  ;;  %v7439_v56 = vld [vmem:[%s12315_s12 + $0x518] sm:$0xf]  ;;  %v7328_v42 = vor.u32 %v8153_v46, %v7327_v60  ;;  %v7467_v60 = vld [vmem:[%s12315_s12 + $0x550] sm:$0xf] }
 0xf00   :  { %v6880_v0 = vor.u32 %v8041_v53, %v6879_v49  ;;  %v7440_v1 = vor.u32 %v8181_v57, %v7439_v56  ;;  %v6965_v49 = vld [vmem:[%s12315_s12 + $0x17c] sm:$0xf0]  ;;  %v8076_v53 = vld [vmem:[%s12315_s12 + $0x1e8] sm:$0xf0]  ;;  %v7579_v56 = vld [vmem:[%s12315_s12 + $0x630] sm:$0xf] }
 0xf01   :  { %5095 = vmatpush.bf16.msrb.mxu1 %v7072_v59  ;;  %5119 = vmatpush.bf16.msrb.mxu3 %v7632_v61  ;;  %v7240_v59 = vor.u32 %v8128_v51, %v7237_v50  ;;  %v7131_v61 = vld [vmem:[%s12315_s12 + $0x2b0] sm:$0xf]  ;;  %v8059_v50 = vld [vmem:[%s12315_s12 + $0x164] sm:$0xf]  ;;  %v8216_v57 = vld [vmem:[%s12315_s12 + $0x648] sm:$0xf0] }
 0xf02   :  { %v8188_v46 = vld [vmem:[%s12315_s12 + $0x568] sm:$0xf0] }
 0xf03   :  { %5083 = vmatpush.bf16.msra.mxu0 %v6792_v5  ;;  %5107 = vmatpush.bf16.msra.mxu2 %v7352_v6  ;;  %v7411_v5 = vld [vmem:[%s12315_s12 + $0x4e0] sm:$0xf]  ;;  %v8174_v6 = vld [vmem:[%s12315_s12 + $0x4f8] sm:$0xf0] }
 0xf04   :  { %v7412_v40 = vor.u32 %v8174_v6, %v7411_v5  ;;  %v7551_v5 = vld [vmem:[%s12315_s12 + $0x5f8] sm:$0xf]  ;;  %v8209_v6 = vld [vmem:[%s12315_s12 + $0x610] sm:$0xf0] }
 0xf05   :  { %5096 = vmatpush.bf16.msrb.mxu1 %v7044_v36  ;;  %5120 = vmatpush.bf16.msrb.mxu3 %v7604_v11  ;;  %v7103_v36 = vld [vmem:[%s12315_s12 + $0x278] sm:$0xf]  ;;  %v8097_v11 = vld [vmem:[%s12315_s12 + $0x290] sm:$0xf0] }
 0xf06   :  { %5084 = vmatmul.bf16.vlgmr.msra.gmra.mxu0 %v11270_v63  ;;  %v7104_v18 = vor.u32 %v8097_v11, %v7103_v36  ;;  %v6940_v36 = vor.u32 %v8052_v2, %v6937_v4  ;;  %v7552_v11 = vor.u32 %v8209_v6, %v7551_v5  ;;  %v7637_v2 = vld [vmem:[%s12315_s12 + $0x6bc] sm:$0xf0]  ;;  %v8017_v4 = vld [vmem:[%s12315_s12 + $0x14] sm:$0xf] }
 0xf07   :  { %5132 = vmatpush.bf16.msrb.mxu0 %v6992_v7  ;;  %5108 = vmatpush.bf16.msra.mxu2 %v7324_v17  ;;  %v7132_v7 = vor.u32 %v8104_v62, %v7131_v61  ;;  %v8027_v17 = vld [vmem:[%s12315_s12 + $0x60] sm:$0xf0]  ;;  %v7580_v62 = vor.u32 %v8216_v57, %v7579_v56  ;;  %v7468_v56 = vor.u32 %v8188_v46, %v7467_v60 }
 0xf08   :  { %v6824_v25 = vor.u32 %v8027_v17, %v6823_v15  ;;  %v7523_v15 = vld [vmem:[%s12315_s12 + $0x5c0] sm:$0xf]  ;;  %v8202_v17 = vld [vmem:[%s12315_s12 + $0x5d8] sm:$0xf0]  ;;  %v8119_v60 = vld [vmem:[%s12315_s12 + $0x340] sm:$0xf0] }
 0xf09   :  { %5097 = vmatpush.bf16.msrb.mxu1 %v7016_v22  ;;  %5121 = vmatpush.bf16.msrb.mxu3 %v7576_v23  ;;  %v8090_v22 = vld [vmem:[%s12315_s12 + $0x258] sm:$0xf0]  ;;  %v7635_v23 = vld [vmem:[%s12315_s12 + $0x6a0] sm:$0xf] }
 0xf0a   :  { %v7076_v30 = vor.u32 %v8090_v22, %v7075_v21  ;;  %v7524_v22 = vor.u32 %v8202_v17, %v7523_v15 }
 0xf0b   :  { %5133 = vmatpush.bf16.msrb.mxu0 %v6964_v19  ;;  %5109 = vmatpush.bf16.msra.mxu2 %v7296_v28  ;;  %v7383_v19 = vld [vmem:[%s12315_s12 + $0x4a8] sm:$0xf]  ;;  %v7355_v28 = vld [vmem:[%s12315_s12 + $0x470] sm:$0xf] }
 0xf0c   :  { %5098 = vmatmul.bf16.vlgmr.msrb.gmra.mxu1 %v11292_v16  ;;  %v7384_v27 = vor.u32 %v8167_v20, %v7383_v19  ;;  %v7356_v44 = vor.u32 %v8160_v29, %v7355_v28  ;;  %v7272_v19 = vor.u32 %v8139_v35, %v7271_v12  ;;  %v7243_v20 = vld [vmem:[%s12315_s12 + $0x390] sm:$0xf]  ;;  %v7495_v28 = vld [vmem:[%s12315_s12 + $0x588] sm:$0xf]  ;;  %v8195_v29 = vld [vmem:[%s12315_s12 + $0x5a0] sm:$0xf0] }
 0xf0d   :  { %5146 = vmatpush.bf16.msra.mxu1 %v7216_v32  ;;  %5122 = vmatpush.bf16.msrb.mxu3 %v7548_v34  ;;  %v6795_v32 = vld [vmem:[%s12315_s12 + $0x10] sm:$0xf]  ;;  %v7047_v34 = vld [vmem:[%s12315_s12 + $0x208] sm:$0xf]  ;;  %v8070_v12 = vld [vmem:[%s12315_s12 + $0x1b8] sm:$0xf0] }
 0xf0e   :  { %v6796_v54 = vor.u32 %v8020_v8, %v6795_v32  ;;  %v7441_v8 = vld [vmem:[%s12315_s12 + $0x534] sm:$0xf0]  ;;  %v8080_v35 = vld [vmem:[%s12315_s12 + $0x20c] sm:$0xf] }
 0xf0f   :  { %5134 = vmatpush.bf16.msrb.mxu0 %v6936_v31  ;;  %5110 = vmatpush.bf16.msra.mxu2 %v7268_v45  ;;  %v7636_v31 = vor.u32 %v8230_v24, %v7635_v23  ;;  %v6996_v45 = vor.u32 %v8066_v26, %v6993_v33  ;;  %v8132_v23 = vld [vmem:[%s12315_s12 + $0x3a8] sm:$0xf0]  ;;  %v8038_v24 = vld [vmem:[%s12315_s12 + $0xbc] sm:$0xf] }
 0xf10   :  { %v7244_v26 = vor.u32 %v8132_v23, %v7243_v20  ;;  %v8063_v23 = vld [vmem:[%s12315_s12 + $0x180] sm:$0xf0] }
 0xf11   :  { %5147 = vmatpush.bf16.msra.mxu1 %v7188_v43  ;;  %5123 = vmatpush.bf16.msrb.mxu3 %v7520_v37  ;;  %v8223_v43 = vld [vmem:[%s12315_s12 + $0x680] sm:$0xf0]  ;;  %v7019_v37 = vld [vmem:[%s12315_s12 + $0x1d0] sm:$0xf] }
 0xf12   :  { %v7608_v51 = vor.u32 %v8223_v43, %v7607_v39  ;;  %v7020_v61 = vor.u32 %v8076_v53, %v7019_v37  ;;  %v6853_v39 = vld [vmem:[%s12315_s12 + $0x9c] sm:$0xf0]  ;;  %v7496_v43 = vor.u32 %v8195_v29, %v7495_v28  ;;  %v8126_v28 = vld [vmem:[%s12315_s12 + $0x378] sm:$0xf0] }
 0xf13   :  { %5135 = vmatpush.bf16.msrb.mxu0 %v6908_v48  ;;  %5111 = vmatpush.bf16.msra.mxu2 %v7240_v59  ;;  %v7048_v48 = vor.u32 %v8083_v38, %v7047_v34  ;;  %v6968_v59 = vor.u32 %v8059_v50, %v6965_v49  ;;  %v8031_v38 = vld [vmem:[%s12315_s12 + $0x84] sm:$0xf]  ;;  %v8234_v50 = vld [vmem:[%s12315_s12 + $0x6dc] sm:$0xf]  ;;  %v7665_v49 = vld [vmem:[%s12315_s12 + $0x6f4] sm:$0xf0] }
 0xf14   :  { %v6856_v37 = vor.u32 %v8031_v38, %v6853_v39  ;;  %v6943_v38 = vld [vmem:[%s12315_s12 + $0x130] sm:$0xf] }
 0xf15   :  { %5148 = vmatpush.bf16.msra.mxu1 %v7160_v52  ;;  %5124 = vmatpush.bf16.msrb.mxu3 %v7492_v3  ;;  %v8122_v52 = vld [vmem:[%s12315_s12 + $0x35c] sm:$0xf] }
 0xf16   :  { %5112 = vmatmul.bf16.vlgmr.msra.gmra.mxu2 %v11332_v47  ;;  %v7220_v3 = vor.u32 %v8122_v52, %v7217_v58  ;;  %v8024_v52 = vld [vmem:[%s12315_s12 + $0x4c] sm:$0xf]  ;;  %v6825_v58 = vld [vmem:[%s12315_s12 + $0x64] sm:$0xf0] }
 0xf17   :  { %5136 = vmatpush.bf16.msrb.mxu0 %v6880_v0  ;;  %5160 = vmatpush.bf16.msrb.mxu2 %v7440_v1  ;;  %v7299_v0 = vld [vmem:[%s12315_s12 + $0x400] sm:$0xf]  ;;  %v8146_v1 = vld [vmem:[%s12315_s12 + $0x418] sm:$0xf0] }
 0xf18   :  { %v7300_v10 = vor.u32 %v8146_v1, %v7299_v0  ;;  %v7077_v0 = vld [vmem:[%s12315_s12 + $0x25c] sm:$0xf0]  ;;  %v8227_v1 = vld [vmem:[%s12315_s12 + $0x6a4] sm:$0xf] }
 0xf19   :  { %5149 = vmatpush.bf16.msra.mxu1 %v7132_v7  ;;  %5125 = vmatpush.bf16.msrb.mxu3 %v7464_v14  ;;  %v8115_v7 = vld [vmem:[%s12315_s12 + $0x324] sm:$0xf]  ;;  %v6909_v14 = vld [vmem:[%s12315_s12 + $0x10c] sm:$0xf0] }
 0xf1b   :  { %5137 = vmatpush.bf16.msrb.mxu0 %v6852_v13  ;;  %5161 = vmatpush.bf16.msrb.mxu2 %v7412_v40  ;;  %v8045_v13 = vld [vmem:[%s12315_s12 + $0xf4] sm:$0xf]  ;;  %v7192_v40 = vor.u32 %v8115_v7, %v7189_v9  ;;  %v6797_v7 = vld [vmem:[%s12315_s12 + $0x2c] sm:$0xf0] }
 0xf1c   :  { %5126 = vmatmul.bf16.vlgmr.msrb.gmra.mxu3 %v11375_v41  ;;  %v6912_v21 = vor.u32 %v8045_v13, %v6909_v14  ;;  %v8157_v9 = vld [vmem:[%s12315_s12 + $0x474] sm:$0xf]  ;;  %v7049_v13 = vld [vmem:[%s12315_s12 + $0x224] sm:$0xf0]  ;;  %v6800_v15 = vor.u32 %v8017_v4, %v6797_v7  ;;  %v8192_v7 = vld [vmem:[%s12315_s12 + $0x58c] sm:$0xf] }
 0xf1d   :  { %5150 = vmatpush.bf16.msra.mxu1 %v7104_v18  ;;  %5174 = vmatpush.bf16.msra.mxu3 %v7664_v55  ;;  %v8108_v18 = vld [vmem:[%s12315_s12 + $0x2ec] sm:$0xf]  ;;  %v7161_v55 = vld [vmem:[%s12315_s12 + $0x304] sm:$0xf0]  ;;  %v7052_v20 = vor.u32 %v8080_v35, %v7049_v13 }
 0xf1e   :  { %v7164_v32 = vor.u32 %v8108_v18, %v7161_v55  ;;  %v7609_v14 = vld [vmem:[%s12315_s12 + $0x684] sm:$0xf0]  ;;  %v8150_v55 = vld [vmem:[%s12315_s12 + $0x43c] sm:$0xf] }
 0xf1f   :  { %5138 = vmatpush.bf16.msrb.mxu0 %v6824_v25  ;;  %5162 = vmatpush.bf16.msrb.mxu2 %v7384_v27  ;;  %v6881_v25 = vld [vmem:[%s12315_s12 + $0xd4] sm:$0xf0]  ;;  %v8178_v27 = vld [vmem:[%s12315_s12 + $0x51c] sm:$0xf]  ;;  %v6859_v13 = vld [vmem:[%s12315_s12 + $0x88] sm:$0xf] }
 0xf20   :  { %v6884_v33 = vor.u32 %v8038_v24, %v6881_v25  ;;  %v7444_v34 = vor.u32 %v8178_v27, %v7441_v8  ;;  %v8073_v24 = vld [vmem:[%s12315_s12 + $0x1d4] sm:$0xf]  ;;  %v7021_v25 = vld [vmem:[%s12315_s12 + $0x1ec] sm:$0xf0]  ;;  %v7223_v8 = vld [vmem:[%s12315_s12 + $0x360] sm:$0xf] }
 0xf21   :  { %5151 = vmatpush.bf16.msra.mxu1 %v7076_v30  ;;  %5175 = vmatpush.bf16.msra.mxu3 %v7636_v31  ;;  %v8101_v30 = vld [vmem:[%s12315_s12 + $0x2b4] sm:$0xf]  ;;  %v7133_v31 = vld [vmem:[%s12315_s12 + $0x2cc] sm:$0xf0]  ;;  %v7224_v39 = vor.u32 %v8126_v28, %v7223_v8  ;;  %v8028_v28 = vld [vmem:[%s12315_s12 + $0x68] sm:$0xf0] }
 0xf22   :  { %v7581_v27 = vld [vmem:[%s12315_s12 + $0x64c] sm:$0xf0] }
 0xf23   :  { %5139 = vmatpush.bf16.msrb.mxu0 %v6796_v54  ;;  %5163 = vmatpush.bf16.msrb.mxu2 %v7356_v44  ;;  %v7136_v54 = vor.u32 %v8101_v30, %v7133_v31  ;;  %v8171_v44 = vld [vmem:[%s12315_s12 + $0x4e4] sm:$0xf]  ;;  %v7024_v31 = vor.u32 %v8073_v24, %v7021_v25  ;;  %v6831_v8 = vld [vmem:[%s12315_s12 + $0x50] sm:$0xf] }
 0xf25   :  { %5152 = vmatpush.bf16.msra.mxu1 %v7048_v48  ;;  %5176 = vmatpush.bf16.msra.mxu3 %v7608_v51  ;;  %v8094_v48 = vld [vmem:[%s12315_s12 + $0x27c] sm:$0xf]  ;;  %v7105_v51 = vld [vmem:[%s12315_s12 + $0x294] sm:$0xf0] }
 0xf26   :  { %5140 = vmatmul.bf16.vlgmr.msrb.gmra.mxu0 %v11270_v63  ;;  %v7108_v57 = vor.u32 %v8094_v48, %v7105_v51 }
 0xf27   :  { %5188 = vmatpush.bf16.msra.mxu0 %v6996_v45  ;;  %5164 = vmatpush.bf16.msrb.mxu2 %v7328_v42  ;;  %v7413_v45 = vld [vmem:[%s12315_s12 + $0x4fc] sm:$0xf0]  ;;  %v8164_v42 = vld [vmem:[%s12315_s12 + $0x4ac] sm:$0xf] }
 0xf28   :  { %v7416_v53 = vor.u32 %v8171_v44, %v7413_v45  ;;  %v7553_v44 = vld [vmem:[%s12315_s12 + $0x614] sm:$0xf0]  ;;  %v7195_v45 = vld [vmem:[%s12315_s12 + $0x328] sm:$0xf] }
 0xf29   :  { %5153 = vmatpush.bf16.msra.mxu1 %v7020_v61  ;;  %5177 = vmatpush.bf16.msra.mxu3 %v7580_v62  ;;  %v7385_v61 = vld [vmem:[%s12315_s12 + $0x4c4] sm:$0xf0]  ;;  %v8087_v62 = vld [vmem:[%s12315_s12 + $0x244] sm:$0xf] }
 0xf2a   :  { %v7388_v5 = vor.u32 %v8164_v42, %v7385_v61  ;;  %v7080_v6 = vor.u32 %v8087_v62, %v7077_v0  ;;  %v8112_v42 = vld [vmem:[%s12315_s12 + $0x308] sm:$0xf0]  ;;  %v8129_v61 = vld [vmem:[%s12315_s12 + $0x394] sm:$0xf] }
 0xf2b   :  { %5189 = vmatpush.bf16.msra.mxu0 %v6968_v59  ;;  %5165 = vmatpush.bf16.msrb.mxu2 %v7300_v10  ;;  %v7668_v59 = vor.u32 %v8234_v50, %v7665_v49  ;;  %v7357_v10 = vld [vmem:[%s12315_s12 + $0x48c] sm:$0xf0]  ;;  %v8136_v50 = vld [vmem:[%s12315_s12 + $0x3cc] sm:$0xf]  ;;  %v7273_v49 = vld [vmem:[%s12315_s12 + $0x3e4] sm:$0xf0] }
 0xf2c   :  { %5154 = vmatmul.bf16.vlgmr.msra.gmra.mxu1 %v11292_v16  ;;  %v7360_v17 = vor.u32 %v8157_v9, %v7357_v10  ;;  %v7497_v9 = vld [vmem:[%s12315_s12 + $0x5a4] sm:$0xf0]  ;;  %v7139_v10 = vld [vmem:[%s12315_s12 + $0x2b8] sm:$0xf] }
 0xf2d   :  { %5202 = vmatpush.bf16.msrb.mxu1 %v7220_v3  ;;  %5178 = vmatpush.bf16.msra.mxu3 %v7552_v11  ;;  %v6828_v3 = vor.u32 %v8024_v52, %v6825_v58  ;;  %v6999_v11 = vld [vmem:[%s12315_s12 + $0x1a0] sm:$0xf]  ;;  %v7167_v58 = vld [vmem:[%s12315_s12 + $0x2f0] sm:$0xf] }
 0xf2e   :  { %v7000_v18 = vor.u32 %v8070_v12, %v6999_v11  ;;  %v7525_v52 = vld [vmem:[%s12315_s12 + $0x5dc] sm:$0xf0]  ;;  %v7168_v4 = vor.u32 %v8112_v42, %v7167_v58 }
 0xf2f   :  { %5190 = vmatpush.bf16.msra.mxu0 %v6940_v36  ;;  %5166 = vmatpush.bf16.msrb.mxu2 %v7272_v19  ;;  %v7640_v36 = vor.u32 %v8227_v1, %v7637_v2  ;;  %v7329_v19 = vld [vmem:[%s12315_s12 + $0x454] sm:$0xf0]  ;;  %v7245_v1 = vld [vmem:[%s12315_s12 + $0x3ac] sm:$0xf0]  ;;  %v6887_v2 = vld [vmem:[%s12315_s12 + $0xc0] sm:$0xf] }
 0xf30   :  { %v7332_v29 = vor.u32 %v8150_v55, %v7329_v19  ;;  %v7248_v11 = vor.u32 %v8129_v61, %v7245_v1  ;;  %v8185_v55 = vld [vmem:[%s12315_s12 + $0x554] sm:$0xf]  ;;  %v7469_v19 = vld [vmem:[%s12315_s12 + $0x56c] sm:$0xf0] }
 0xf31   :  { %5203 = vmatpush.bf16.msrb.mxu1 %v7192_v40  ;;  %5179 = vmatpush.bf16.msra.mxu3 %v7524_v22  ;;  %v8220_v40 = vld [vmem:[%s12315_s12 + $0x66c] sm:$0xf]  ;;  %v6971_v22 = vld [vmem:[%s12315_s12 + $0x168] sm:$0xf]  ;;  %v8077_v1 = vld [vmem:[%s12315_s12 + $0x1f0] sm:$0xf0] }
 0xf32   :  { %v6972_v30 = vor.u32 %v8063_v23, %v6971_v22  ;;  %v7671_v22 = vld [vmem:[%s12315_s12 + $0x6e0] sm:$0xf]  ;;  %v8238_v23 = vld [vmem:[%s12315_s12 + $0x6f8] sm:$0xf0] }
 0xf33   :  { %5191 = vmatpush.bf16.msra.mxu0 %v6912_v21  ;;  %5167 = vmatpush.bf16.msrb.mxu2 %v7244_v26  ;;  %v7612_v21 = vor.u32 %v8220_v40, %v7609_v14  ;;  %v8035_v40 = vld [vmem:[%s12315_s12 + $0xa0] sm:$0xf0]  ;;  %v7500_v14 = vor.u32 %v8192_v7, %v7497_v9 }
 0xf34   :  { %v6860_v24 = vor.u32 %v8035_v40, %v6859_v13 }
 0xf35   :  { %5204 = vmatpush.bf16.msrb.mxu1 %v7164_v32  ;;  %5180 = vmatpush.bf16.msra.mxu3 %v7496_v43  ;;  %v8213_v32 = vld [vmem:[%s12315_s12 + $0x634] sm:$0xf]  ;;  %v8056_v43 = vld [vmem:[%s12315_s12 + $0x148] sm:$0xf0] }
 0xf36   :  { %5168 = vmatmul.bf16.vlgmr.msrb.gmra.mxu2 %v11332_v47  ;;  %v7584_v26 = vor.u32 %v8213_v32, %v7581_v27  ;;  %v6944_v48 = vor.u32 %v8056_v43, %v6943_v38  ;;  %v7472_v32 = vor.u32 %v8185_v55, %v7469_v19  ;;  %v8231_v38 = vld [vmem:[%s12315_s12 + $0x6c0] sm:$0xf0]  ;;  %v6832_v43 = vor.u32 %v8028_v28, %v6831_v8  ;;  %v7503_v8 = vld [vmem:[%s12315_s12 + $0x590] sm:$0xf] }
 0xf37   :  { %5192 = vmatpush.bf16.msra.mxu0 %v6884_v33  ;;  %5216 = vmatpush.bf16.msra.mxu2 %v7444_v34  ;;  %v8143_v33 = vld [vmem:[%s12315_s12 + $0x404] sm:$0xf]  ;;  %v7301_v34 = vld [vmem:[%s12315_s12 + $0x41c] sm:$0xf0] }
 0xf38   :  { %v7304_v46 = vor.u32 %v8143_v33, %v7301_v34  ;;  %v8091_v33 = vld [vmem:[%s12315_s12 + $0x260] sm:$0xf0]  ;;  %v7643_v34 = vld [vmem:[%s12315_s12 + $0x6a8] sm:$0xf] }
 0xf39   :  { %5205 = vmatpush.bf16.msrb.mxu1 %v7136_v54  ;;  %5181 = vmatpush.bf16.msra.mxu3 %v7468_v56  ;;  %v8206_v54 = vld [vmem:[%s12315_s12 + $0x5fc] sm:$0xf]  ;;  %v8049_v56 = vld [vmem:[%s12315_s12 + $0x110] sm:$0xf0] }
 0xf3a   :  { %v7556_v51 = vor.u32 %v8206_v54, %v7553_v44 }
 0xf3b   :  { %5193 = vmatpush.bf16.msra.mxu0 %v6856_v37  ;;  %5217 = vmatpush.bf16.msra.mxu2 %v7416_v53  ;;  %v6915_v37 = vld [vmem:[%s12315_s12 + $0xf8] sm:$0xf]  ;;  %v7196_v53 = vor.u32 %v8119_v60, %v7195_v45  ;;  %v8021_v60 = vld [vmem:[%s12315_s12 + $0x30] sm:$0xf0] }
 0xf3c   :  { %5182 = vmatmul.bf16.vlgmr.msra.gmra.mxu3 %v11375_v41  ;;  %v6916_v62 = vor.u32 %v8049_v56, %v6915_v37  ;;  %v6803_v45 = vld [vmem:[%s12315_s12 + $0x18] sm:$0xf]  ;;  %v8084_v37 = vld [vmem:[%s12315_s12 + $0x228] sm:$0xf0] }
 0xf3d   :  { %5206 = vmatpush.bf16.msrb.mxu1 %v7108_v57  ;;  %5230 = vmatpush.bf16.msrb.mxu3 %v7668_v59  ;;  %v8199_v57 = vld [vmem:[%s12315_s12 + $0x5c4] sm:$0xf]  ;;  %v7276_v59 = vor.u32 %v8136_v50, %v7273_v49  ;;  %v8161_v50 = vld [vmem:[%s12315_s12 + $0x490] sm:$0xf0]  ;;  %v7055_v49 = vld [vmem:[%s12315_s12 + $0x210] sm:$0xf] }
 0xf3e   :  { %v7528_v0 = vor.u32 %v8199_v57, %v7525_v52  ;;  %v8224_v56 = vld [vmem:[%s12315_s12 + $0x688] sm:$0xf0]  ;;  %v6804_v57 = vor.u32 %v8021_v60, %v6803_v45  ;;  %v12201_v52 = vld [vmem:[%s12317_s13] sm:$0x7f]  ;;  %v7056_v42 = vor.u32 %v8084_v37, %v7055_v49 }
 0xf3f   :  { %5194 = vmatpush.bf16.msra.mxu0 %v6828_v3  ;;  %5218 = vmatpush.bf16.msra.mxu2 %v7388_v5  ;;  %v8042_v3 = vld [vmem:[%s12315_s12 + $0xd8] sm:$0xf0]  ;;  %v7447_v5 = vld [vmem:[%s12315_s12 + $0x520] sm:$0xf] }
 0xf40   :  { %v6888_v12 = vor.u32 %v8042_v3, %v6887_v2  ;;  %v7587_v3 = vld [vmem:[%s12315_s12 + $0x638] sm:$0xf] }
 0xf41   :  { %5207 = vmatpush.bf16.msrb.mxu1 %v7080_v6  ;;  %5231 = vmatpush.bf16.msrb.mxu3 %v7640_v36  ;;  %v8182_v6 = vld [vmem:[%s12315_s12 + $0x538] sm:$0xf0]  ;;  %v8105_v36 = vld [vmem:[%s12315_s12 + $0x2d0] sm:$0xf0] }
 0xf42   :  { %v7448_v35 = vor.u32 %v8182_v6, %v7447_v5  ;;  %v3742_v5 = vperm.slane %v12201_v52, 0 }
 0xf43   :  { %5195 = vmatpush.bf16.msra.mxu0 %v6800_v15  ;;  %5219 = vmatpush.bf16.msra.mxu2 %v7360_v17  ;;  %v7140_v15 = vor.u32 %v8105_v36, %v7139_v10  ;;  %v7419_v17 = vld [vmem:[%s12315_s12 + $0x4e8] sm:$0xf] }
 0xf44   :  { %v7307_v36 = vld [vmem:[%s12315_s12 + $0x408] sm:$0xf] }
 0xf45   :  { %5208 = vmatpush.bf16.msrb.mxu1 %v7052_v20  ;;  %5232 = vmatpush.bf16.msrb.mxu3 %v7612_v21  ;;  %v7111_v20 = vld [vmem:[%s12315_s12 + $0x280] sm:$0xf]  ;;  %v8098_v21 = vld [vmem:[%s12315_s12 + $0x298] sm:$0xf0] }
 0xf46   :  { %5196 = vmatmul.bf16.vlgmr.msra.gmra.mxu0 %v11270_v63  ;;  %v7112_v27 = vor.u32 %v8098_v21, %v7111_v20  ;;  %v7531_v20 = vld [vmem:[%s12315_s12 + $0x5c8] sm:$0xf]  ;;  %v8203_v21 = vld [vmem:[%s12315_s12 + $0x5e0] sm:$0xf0] }
 0xf47   :  { %5244 = vmatpush.bf16.msrb.mxu0 %v7000_v18  ;;  %5220 = vmatpush.bf16.msra.mxu2 %v7332_v29  ;;  %v8175_v18 = vld [vmem:[%s12315_s12 + $0x500] sm:$0xf0]  ;;  %v7391_v29 = vld [vmem:[%s12315_s12 + $0x4b0] sm:$0xf] }
 0xf48   :  { %v7420_v25 = vor.u32 %v8175_v18, %v7419_v17  ;;  %v8140_v18 = vld [vmem:[%s12315_s12 + $0x3e8] sm:$0xf0] }
 0xf49   :  { %5209 = vmatpush.bf16.msrb.mxu1 %v7024_v31  ;;  %5233 = vmatpush.bf16.msrb.mxu3 %v7584_v26  ;;  %v8168_v31 = vld [vmem:[%s12315_s12 + $0x4c8] sm:$0xf0]  ;;  %v7083_v26 = vld [vmem:[%s12315_s12 + $0x248] sm:$0xf] }
 0xf4a   :  { %v7392_v54 = vor.u32 %v8168_v31, %v7391_v29  ;;  %v7084_v44 = vor.u32 %v8091_v33, %v7083_v26  ;;  %v3743_v29 = vperm.slane %v12201_v52, 1 }
 0xf4b   :  { %5245 = vmatpush.bf16.msrb.mxu0 %v6972_v30  ;;  %5221 = vmatpush.bf16.msra.mxu2 %v7304_v46  ;;  %v7672_v30 = vor.u32 %v8238_v23, %v7671_v22  ;;  %v7363_v46 = vld [vmem:[%s12315_s12 + $0x478] sm:$0xf] }
 0xf4c   :  { %5210 = vmatmul.bf16.vlgmr.msrb.gmra.mxu1 %v11292_v16  ;;  %v7364_v58 = vor.u32 %v8161_v50, %v7363_v46 }
 0xf4d   :  { %5258 = vmatpush.bf16.msra.mxu1 %v7224_v39  ;;  %5234 = vmatpush.bf16.msrb.mxu3 %v7556_v51  ;;  %v4917_v39 = vpop.f32.mrf.mxu0  ;;  %v7644_v51 = vor.u32 %v8231_v38, %v7643_v34 }
 0xf4e   :  { %v4918_v40 = vadd.f32 %v4917_v39, %v3742_v5  ;;  %v7475_v39 = vld [vmem:[%s12315_s12 + $0x558] sm:$0xf] }
 0xf4f   :  { %5246 = vmatpush.bf16.msrb.mxu0 %v6944_v48  ;;  %5222 = vmatpush.bf16.msra.mxu2 %v7276_v59  ;;  %v4931_v48 = vpop.f32.mrf.mxu1  ;;  %v7335_v59 = vld [vmem:[%s12315_s12 + $0x440] sm:$0xf] }
 0xf50   :  { %v4932_v55 = vadd.f32 %v4931_v48, %v4918_v40 }
 0xf51   :  { %5259 = vmatpush.bf16.msra.mxu1 %v7196_v53  ;;  %5235 = vmatpush.bf16.msrb.mxu3 %v7528_v0  ;;  %v7615_v53 = vld [vmem:[%s12315_s12 + $0x670] sm:$0xf]  ;;  %v7027_v0 = vld [vmem:[%s12315_s12 + $0x1d8] sm:$0xf] }
 0xf52   :  { %v7616_v61 = vor.u32 %v8224_v56, %v7615_v53  ;;  %v7028_v7 = vor.u32 %v8077_v1, %v7027_v0 }
 0xf53   :  { %5247 = vmatpush.bf16.msrb.mxu0 %v6916_v62  ;;  %5223 = vmatpush.bf16.msra.mxu2 %v7248_v11  ;;  %v8154_v62 = vld [vmem:[%s12315_s12 + $0x458] sm:$0xf0]  ;;  %v8147_v11 = vld [vmem:[%s12315_s12 + $0x420] sm:$0xf0] }
 0xf54   :  { %v7336_v6 = vor.u32 %v8154_v62, %v7335_v59 }
 0xf55   :  { %5260 = vmatpush.bf16.msra.mxu1 %v7168_v4  ;;  %5236 = vmatpush.bf16.msrb.mxu3 %v7500_v14  ;;  %v8217_v4 = vld [vmem:[%s12315_s12 + $0x650] sm:$0xf0]  ;;  %v4919_v9 = vpop.f32.mrf.mxu0  ;;  %v7308_v14 = vor.u32 %v8147_v11, %v7307_v36 }
 0xf56   :  { %5224 = vmatmul.bf16.vlgmr.msra.gmra.mxu2 %v11332_v47  ;;  %v7588_v10 = vor.u32 %v8217_v4, %v7587_v3  ;;  %v4920_v31 = vadd.f32 %v4919_v9, %v3742_v5 }
 0xf57   :  { %5248 = vmatpush.bf16.msrb.mxu0 %v6888_v12  ;;  %5272 = vmatpush.bf16.msrb.mxu2 %v7448_v35  ;;  %v7559_v12 = vld [vmem:[%s12315_s12 + $0x600] sm:$0xf]  ;;  %v8210_v35 = vld [vmem:[%s12315_s12 + $0x618] sm:$0xf0]  ;;  %v4933_v13 = vpop.f32.mrf.mxu1 }
 0xf58   :  { %v4945_v2 = vpop.f32.mrf.mxu2  ;;  %v7560_v17 = vor.u32 %v8210_v35, %v7559_v12 }
 0xf59   :  { %5261 = vmatpush.bf16.msra.mxu1 %v7140_v15  ;;  %5237 = vmatpush.bf16.msrb.mxu3 %v7472_v32  ;;  %v4946_v22 = vadd.f32 %v4945_v2, %v4932_v55  ;;  %v8133_v32 = vld [vmem:[%s12315_s12 + $0x3b0] sm:$0xf0] }
 0xf5b   :  { %5249 = vmatpush.bf16.msrb.mxu0 %v6860_v24  ;;  %5273 = vmatpush.bf16.msrb.mxu2 %v7420_v25  ;;  %v7532_v24 = vor.u32 %v8203_v21, %v7531_v20  ;;  %v7251_v25 = vld [vmem:[%s12315_s12 + $0x398] sm:$0xf] }
 0xf5c   :  { %5238 = vmatmul.bf16.vlgmr.msrb.gmra.mxu3 %v11375_v41 }
 0xf5d   :  { %5262 = vmatpush.bf16.msra.mxu1 %v7112_v27  ;;  %5286 = vmatpush.bf16.msra.mxu3 %v7672_v30  ;;  %v4973_v28 = vpop.f32.mrf.mxu0  ;;  %v7252_v30 = vor.u32 %v8133_v32, %v7251_v25 }
 0xf5e   :  { %v4974_v45 = vadd.f32 %v4973_v28, %v3743_v29 }
 0xf5f   :  { %5250 = vmatpush.bf16.msrb.mxu0 %v6832_v43  ;;  %5274 = vmatpush.bf16.msrb.mxu2 %v7392_v54  ;;  %v4959_v15 = vpop.f32.mrf.mxu3  ;;  %v4987_v26 = vpop.f32.mrf.mxu1  ;;  %v8189_v43 = vld [vmem:[%s12315_s12 + $0x570] sm:$0xf0]  ;;  %v4934_v54 = vadd.f32 %v4933_v13, %v4920_v31 }
 0xf60   :  { %v4947_v19 = vpop.f32.mrf.mxu2  ;;  %v4960_v27 = vadd.f32 %v4959_v15, %v4946_v22  ;;  %v7476_v46 = vor.u32 %v8189_v43, %v7475_v39  ;;  %v4988_v48 = vadd.f32 %v4987_v26, %v4974_v45 }
 0xf61   :  { %5263 = vmatpush.bf16.msra.mxu1 %v7084_v44  ;;  %5287 = vmatpush.bf16.msra.mxu3 %v7644_v51  ;;  %v4948_v60 = vadd.f32 %v4947_v19, %v4934_v54 }
 0xf62   :  { %v5300_v38 = vsub.f32 0.0, %v4960_v27 }
 0xf63   :  { %5251 = vmatpush.bf16.msrb.mxu0 %v6804_v57  ;;  %5275 = vmatpush.bf16.msrb.mxu2 %v7364_v58 }
 0xf64   :  { %v5314_v51 = vmul.f32 1.442695, %v5300_v38 }
 0xf65   :  { %5264 = vmatpush.bf16.msra.mxu1 %v7056_v42  ;;  %5288 = vmatpush.bf16.msra.mxu3 %v7616_v61  ;;  %v4975_v37 = vpop.f32.mrf.mxu0 }
 0xf66   :  { %5252 = vmatmul.bf16.vlgmr.msrb.gmra.mxu0 %v11270_v63  ;;  %v7279_v63 = vld [vmem:[%s12315_s12 + $0x3d0] sm:$0xf]  ;;  %8410 = vpow2.f32 %v5314_v51  ;;  %v4976_v42 = vadd.f32 %v4975_v37, %v3743_v29 }
 0xf67   :  { %5276 = vmatpush.bf16.msrb.mxu2 %v7336_v6  ;;  %v7280_v23 = vor.u32 %v8140_v18, %v7279_v63  ;;  %v4961_v33 = vpop.f32.mrf.mxu3  ;;  %v4989_v57 = vpop.f32.mrf.mxu1  ;;  %v3744_v63 = vperm.slane %v12201_v52, 2 }
 0xf68   :  { %v4962_v50 = vadd.f32 %v4961_v33, %v4948_v60  ;;  %v4990_v62 = vadd.f32 %v4989_v57, %v4976_v42 }
 0xf69   :  { %5265 = vmatpush.bf16.msra.mxu1 %v7028_v7  ;;  %5289 = vmatpush.bf16.msra.mxu3 %v7588_v10  ;;  %v5001_v44 = vpop.f32.mrf.mxu2 }
 0xf6a   :  { %v5002_v49 = vadd.f32 %v5001_v44, %v4988_v48  ;;  %v5307_v58 = vsub.f32 0.0, %v4962_v50 }
 0xf6b   :  { %5277 = vmatpush.bf16.msrb.mxu2 %v7308_v14 }
 0xf6c   :  { %5266 = vmatmul.bf16.vlgmr.msra.gmra.mxu1 %v11292_v16  ;;  %v8196_v16 = vld [vmem:[%s12315_s12 + $0x5a8] sm:$0xf0]  ;;  %v5328_v1 = vmul.f32 1.442695, %v5307_v58  ;;  %v8411_v2 = vpop.eup %8410 }
 0xf6d   :  { %5290 = vmatpush.bf16.msra.mxu3 %v7560_v17  ;;  %v7504_v34 = vor.u32 %v8196_v16, %v7503_v8  ;;  %v5342_v5 = vadd.f32 1.0, %v8411_v2  ;;  %v3745_v16 = vperm.slane %v12201_v52, 3 }
 0xf6f   :  { %5278 = vmatpush.bf16.msrb.mxu2 %v7280_v23  ;;  %v5015_v53 = vpop.f32.mrf.mxu3  ;;  %v5043_v12 = vpop.f32.mrf.mxu1 }
 0xf70   :  { %v5016_v56 = vadd.f32 %v5015_v53, %v5002_v49 }
 0xf71   :  { %5291 = vmatpush.bf16.msra.mxu3 %v7532_v24  ;;  %v5003_v61 = vpop.f32.mrf.mxu2 }
 0xf72   :  { %v5301_v59 = vsub.f32 0.0, %v5016_v56  ;;  %v5004_v3 = vadd.f32 %v5003_v61, %v4990_v62 }
 0xf73   :  { %5279 = vmatpush.bf16.msrb.mxu2 %v7252_v30 }
 0xf74   :  { %v5316_v0 = vmul.f32 1.442695, %v5301_v59 }
 0xf75   :  { %5292 = vmatpush.bf16.msra.mxu3 %v7504_v34 }
 0xf76   :  { %5280 = vmatmul.bf16.vlgmr.msrb.gmra.mxu2 %v11332_v47  ;;  %8412 = vpow2.f32 %v5316_v0 }
 0xf77   :  { %v5017_v47 = vpop.f32.mrf.mxu3  ;;  %8414 = vpow2.f32 %v5328_v1  ;;  %v5045_v21 = vpop.f32.mrf.mxu1 }
 0xf78   :  { %v5018_v4 = vadd.f32 %v5017_v47, %v5004_v3  ;;  %8416 = vrcp.f32 %v5342_v5 }
 0xf79   :  { %5293 = vmatpush.bf16.msra.mxu3 %v7476_v46  ;;  %v5057_v40 = vpop.f32.mrf.mxu2 }
 0xf7a   :  { %v5308_v6 = vsub.f32 0.0, %v5018_v4 }
 0xf7c   :  { %5294 = vmatmul.bf16.vlgmr.msra.gmra.mxu3 %v11375_v41  ;;  %v8413_v7 = vpop.eup %8412  ;;  %v5330_v9 = vmul.f32 1.442695, %v5308_v6  ;;  %v5029_v41 = vpop.f32.mrf.mxu0 }
 0xf7d   :  { %v5343_v10 = vadd.f32 1.0, %v8413_v7  ;;  %v8415_v36 = vpop.eup %8414  ;;  %v5030_v19 = vadd.f32 %v5029_v41, %v3744_v63 }
 0xf7e   :  { %8418 = vpow2.f32 %v5330_v9  ;;  %v5349_v11 = vadd.f32 1.0, %v8415_v36  ;;  %v8417_v35 = vpop.eup %8416 }
 0xf7f   :  { %8420 = vrcp.f32 %v5343_v10  ;;  %v5071_v55 = vpop.f32.mrf.mxu3  ;;  %v5044_v23 = vadd.f32 %v5043_v12, %v5030_v19 }
 0xf80   :  { %8422 = vrcp.f32 %v5349_v11 }
 0xf81   :  { %v5059_v25 = vpop.f32.mrf.mxu2  ;;  %v5058_v32 = vadd.f32 %v5057_v40, %v5044_v23  ;;  %v3746_v40 = vperm.slane %v12201_v52, 4 }
 0xf83   :  { %v5072_v27 = vadd.f32 %v5071_v55, %v5058_v32 }
 0xf84   :  { %v8419_v13 = vpop.eup %8418  ;;  %v5031_v18 = vpop.f32.mrf.mxu0 }
 0xf85   :  { %v8421_v14 = vpop.eup %8420  ;;  %v5350_v15 = vadd.f32 1.0, %v8419_v13  ;;  %v5032_v28 = vadd.f32 %v5031_v18, %v3744_v63  ;;  %v5302_v31 = vsub.f32 0.0, %v5072_v27 }
 0xf86   :  { %v5370_v17 = vpack.c.bf16 %v8421_v14, %v8417_v35  ;;  %v8423_v20 = vpop.eup %8422 }
 0xf87   :  { %8424 = vrcp.f32 %v5350_v15  ;;  %v5073_v30 = vpop.f32.mrf.mxu3  ;;  %v5046_v26 = vadd.f32 %v5045_v21, %v5032_v28  ;;  %v5318_v39 = vmul.f32 1.442695, %v5302_v31 }
 0xf88   :  { %5378 = vst [vmem:[%s12318_s19] sm:$0xff] %v5370_v17 }
 0xf89   :  { %v5099_v29 = vpop.f32.mrf.mxu1  ;;  %v5060_v38 = vadd.f32 %v5059_v25, %v5046_v26  ;;  %8426 = vpow2.f32 %v5318_v39 }
 0xf8b   :  { %v5074_v54 = vadd.f32 %v5073_v30, %v5060_v38 }
 0xf8c   :  { %v5085_v8 = vpop.f32.mrf.mxu0 }
 0xf8d   :  { %v8425_v22 = vpop.eup %8424  ;;  %v5086_v34 = vadd.f32 %v5085_v8, %v3745_v16  ;;  %v5309_v48 = vsub.f32 0.0, %v5074_v54 }
 0xf8e   :  { %v5374_v24 = vpack.c.bf16 %v8425_v22, %v8423_v20  ;;  %v3747_v22 = vperm.slane %v12201_v52, 5 }
 0xf8f   :  { %v5100_v43 = vadd.f32 %v5099_v29, %v5086_v34  ;;  %v5332_v57 = vmul.f32 1.442695, %v5309_v48  ;;  %v8427_v58 = vpop.eup %8426 }
 0xf90   :  { %5383 = vst [vmem:[%s12318_s19 + $0x1c] sm:$0xff] %v5374_v24  ;;  %v5344_v62 = vadd.f32 1.0, %v8427_v58 }
 0xf91   :  { %v5101_v51 = vpop.f32.mrf.mxu1 }
 0xf94   :  { %v5087_v45 = vpop.f32.mrf.mxu0 }
 0xf95   :  { %v5088_v50 = vadd.f32 %v5087_v45, %v3745_v16 }
 0xf97   :  { %v5102_v53 = vadd.f32 %v5101_v51, %v5088_v50 }
 0xf99   :  { %v5113_v33 = vpop.f32.mrf.mxu2 }
 0xf9a   :  { %v5114_v44 = vadd.f32 %v5113_v33, %v5100_v43 }
 0xf9f   :  { %v5127_v60 = vpop.f32.mrf.mxu3 }
 0xfa0   :  { %v5128_v46 = vadd.f32 %v5127_v60, %v5114_v44 }
 0xfa1   :  { %v5115_v37 = vpop.f32.mrf.mxu2 }
 0xfa2   :  { %v5303_v49 = vsub.f32 0.0, %v5128_v46  ;;  %v5116_v42 = vadd.f32 %v5115_v37, %v5102_v53 }
 0xfa3   :  { %v5141_v12 = vpop.f32.mrf.mxu0 }
 0xfa4   :  { %v5320_v56 = vmul.f32 1.442695, %v5303_v49  ;;  %v5142_v17 = vadd.f32 %v5141_v12, %v3746_v40 }
 0xfa6   :  { %8428 = vpow2.f32 %v5320_v56 }
 0xfa7   :  { %v5129_v59 = vpop.f32.mrf.mxu3  ;;  %8430 = vpow2.f32 %v5332_v57 }
 0xfa8   :  { %v5130_v61 = vadd.f32 %v5129_v59, %v5116_v42  ;;  %8432 = vrcp.f32 %v5344_v62 }
 0xfa9   :  { %v5155_v35 = vpop.f32.mrf.mxu1 }
 0xfaa   :  { %v5310_v0 = vsub.f32 0.0, %v5130_v61  ;;  %v5156_v18 = vadd.f32 %v5155_v35, %v5142_v17 }
 0xfab   :  { %v5143_v14 = vpop.f32.mrf.mxu0 }
 0xfac   :  { %v8429_v1 = vpop.eup %8428  ;;  %v5334_v2 = vmul.f32 1.442695, %v5310_v0  ;;  %v5144_v23 = vadd.f32 %v5143_v14, %v3746_v40 }
 0xfad   :  { %v5345_v3 = vadd.f32 1.0, %v8429_v1  ;;  %v8431_v47 = vpop.eup %8430  ;;  %v3748_v1 = vperm.slane %v12201_v52, 6 }
 0xfae   :  { %8434 = vpow2.f32 %v5334_v2  ;;  %v5351_v4 = vadd.f32 1.0, %v8431_v47  ;;  %v8433_v5 = vpop.eup %8432 }
 0xfaf   :  { %8436 = vrcp.f32 %v5345_v3 }
 0xfb0   :  { %8438 = vrcp.f32 %v5351_v4 }
 0xfb1   :  { %v5157_v63 = vpop.f32.mrf.mxu1 }
 0xfb2   :  { %v5158_v27 = vadd.f32 %v5157_v63, %v5144_v23 }
 0xfb4   :  { %v8435_v6 = vpop.eup %8434 }
 0xfb5   :  { %v8437_v7 = vpop.eup %8436  ;;  %v5352_v9 = vadd.f32 1.0, %v8435_v6 }
 0xfb6   :  { %v5371_v10 = vpack.c.bf16 %v8437_v7, %v8433_v5  ;;  %v8439_v36 = vpop.eup %8438 }
 0xfb7   :  { %8440 = vrcp.f32 %v5352_v9 }
 0xfb8   :  { %5379 = vst [vmem:[%s12318_s19 + $0x8] sm:$0xff] %v5371_v10 }
 0xfb9   :  { %v5169_v13 = vpop.f32.mrf.mxu2 }
 0xfba   :  { %v5170_v19 = vadd.f32 %v5169_v13, %v5156_v18 }
 0xfbd   :  { %v8441_v41 = vpop.eup %8440 }
 0xfbe   :  { %v5375_v11 = vpack.c.bf16 %v8441_v41, %v8439_v36 }
 0xfbf   :  { %v5183_v15 = vpop.f32.mrf.mxu3 }
 0xfc0   :  { %5384 = vst [vmem:[%s12318_s19 + $0x24] sm:$0xff] %v5375_v11  ;;  %v5184_v20 = vadd.f32 %v5183_v15, %v5170_v19 }
 0xfc1   :  { %v5171_v55 = vpop.f32.mrf.mxu2 }
 0xfc2   :  { %v5304_v32 = vsub.f32 0.0, %v5184_v20  ;;  %v5172_v28 = vadd.f32 %v5171_v55, %v5158_v27 }
 0xfc3   :  { %v5197_v21 = vpop.f32.mrf.mxu0 }
 0xfc4   :  { %v5198_v16 = vadd.f32 %v5197_v21, %v3747_v22  ;;  %v5322_v29 = vmul.f32 1.442695, %v5304_v32 }
 0xfc6   :  { %8442 = vpow2.f32 %v5322_v29 }
 0xfc7   :  { %v5185_v25 = vpop.f32.mrf.mxu3 }
 0xfc8   :  { %v5186_v31 = vadd.f32 %v5185_v25, %v5172_v28 }
 0xfc9   :  { %v5211_v24 = vpop.f32.mrf.mxu1 }
 0xfca   :  { %v5212_v30 = vadd.f32 %v5211_v24, %v5198_v16  ;;  %v5311_v39 = vsub.f32 0.0, %v5186_v31 }
 0xfcb   :  { %v5199_v33 = vpop.f32.mrf.mxu0 }
 0xfcc   :  { %v5200_v54 = vadd.f32 %v5199_v33, %v3747_v22  ;;  %v5336_v48 = vmul.f32 1.442695, %v5311_v39  ;;  %v8443_v51 = vpop.eup %8442 }
 0xfcd   :  { %v5346_v53 = vadd.f32 1.0, %v8443_v51 }
 0xfd1   :  { %v5213_v43 = vpop.f32.mrf.mxu1 }
 0xfd2   :  { %v5214_v60 = vadd.f32 %v5213_v43, %v5200_v54 }
 0xfd9   :  { %v5225_v8 = vpop.f32.mrf.mxu2 }
 0xfda   :  { %v5226_v26 = vadd.f32 %v5225_v8, %v5212_v30 }
 0xfdf   :  { %v5239_v34 = vpop.f32.mrf.mxu3 }
 0xfe0   :  { %v5240_v38 = vadd.f32 %v5239_v34, %v5226_v26 }
 0xfe1   :  { %v5227_v45 = vpop.f32.mrf.mxu2 }
 0xfe2   :  { %v5305_v44 = vsub.f32 0.0, %v5240_v38  ;;  %v5228_v50 = vadd.f32 %v5227_v45, %v5214_v60 }
 0xfe3   :  { %v5253_v62 = vpop.f32.mrf.mxu0 }
 0xfe4   :  { %v5324_v46 = vmul.f32 1.442695, %v5305_v44  ;;  %v5254_v6 = vadd.f32 %v5253_v62, %v3748_v1 }
 0xfe6   :  { %8444 = vpow2.f32 %v5324_v46 }
 0xfe7   :  { %v5241_v49 = vpop.f32.mrf.mxu3  ;;  %8446 = vpow2.f32 %v5336_v48 }
 0xfe8   :  { %v5242_v37 = vadd.f32 %v5241_v49, %v5228_v50  ;;  %8448 = vrcp.f32 %v5346_v53 }
 0xfe9   :  { %v5267_v3 = vpop.f32.mrf.mxu1 }
 0xfea   :  { %v5312_v56 = vsub.f32 0.0, %v5242_v37  ;;  %v5268_v9 = vadd.f32 %v5267_v3, %v5254_v6 }
 0xfeb   :  { %v5255_v41 = vpop.f32.mrf.mxu0 }
 0xfec   :  { %v8445_v57 = vpop.eup %8444  ;;  %v5338_v58 = vmul.f32 1.442695, %v5312_v56  ;;  %v5256_v40 = vadd.f32 %v5255_v41, %v3748_v1 }
 0xfed   :  { %v5347_v42 = vadd.f32 1.0, %v8445_v57  ;;  %v8447_v59 = vpop.eup %8446 }
 0xfee   :  { %8450 = vpow2.f32 %v5338_v58  ;;  %v5353_v61 = vadd.f32 1.0, %v8447_v59  ;;  %v8449_v0 = vpop.eup %8448 }
 0xfef   :  { %8452 = vrcp.f32 %v5347_v42 }
 0xff0   :  { %8454 = vrcp.f32 %v5353_v61 }
 0xff1   :  { %v5269_v13 = vpop.f32.mrf.mxu1 }
 0xff2   :  { %v5270_v17 = vadd.f32 %v5269_v13, %v5256_v40 }
 0xff4   :  { %v8451_v2 = vpop.eup %8450 }
 0xff5   :  { %v8453_v47 = vpop.eup %8452  ;;  %v5354_v4 = vadd.f32 1.0, %v8451_v2 }
 0xff6   :  { %v5372_v5 = vpack.c.bf16 %v8453_v47, %v8449_v0  ;;  %v8455_v36 = vpop.eup %8454 }
 0xff7   :  { %8456 = vrcp.f32 %v5354_v4 }
 0xff8   :  { %5380 = vst [vmem:[%s12318_s19 + $0x10] sm:$0xff] %v5372_v5 }
 0xff9   :  { %v5281_v7 = vpop.f32.mrf.mxu2 }
 0xffa   :  { %v5282_v10 = vadd.f32 %v5281_v7, %v5268_v9 }
 0xffd   :  { %v8457_v12 = vpop.eup %8456 }
 0xffe   :  { %v5376_v35 = vpack.c.bf16 %v8457_v12, %v8455_v36 }
 0xfff   :  { %v5295_v11 = vpop.f32.mrf.mxu3 }
0x1000   :  { %v5296_v52 = vadd.f32 %v5295_v11, %v5282_v10  ;;  %5385 = vst [vmem:[%s12318_s19 + $0x2c] sm:$0xff] %v5376_v35 }
0x1001   :  { %v5283_v15 = vpop.f32.mrf.mxu2 }
0x1002   :  { %v5306_v14 = vsub.f32 0.0, %v5296_v52  ;;  %v5284_v18 = vadd.f32 %v5283_v15, %v5270_v17 }
0x1004   :  { %v5326_v63 = vmul.f32 1.442695, %v5306_v14 }
0x1006   :  { %8458 = vpow2.f32 %v5326_v63 }
0x1007   :  { %v5297_v55 = vpop.f32.mrf.mxu3 }
0x1008   :  { %v5298_v19 = vadd.f32 %v5297_v55, %v5284_v18 }
0x100a   :  { %v5313_v20 = vsub.f32 0.0, %v5298_v19 }
0x100c   :  { %v8459_v21 = vpop.eup %8458  ;;  %v5340_v22 = vmul.f32 1.442695, %v5313_v20 }
0x100d   :  { %v5348_v23 = vadd.f32 1.0, %v8459_v21 }
0x100e   :  { %8460 = vpow2.f32 %v5340_v22 }
0x100f   :  { %8462 = vrcp.f32 %v5348_v23 }
0x1014   :  { %v8461_v24 = vpop.eup %8460 }
0x1015   :  { %v8463_v25 = vpop.eup %8462  ;;  %v5355_v32 = vadd.f32 1.0, %v8461_v24 }
0x1016   :  { %v5373_v27 = vpack.c.bf16 %v8463_v25, %v8463_v25 }
0x1017   :  { %8464 = vrcp.f32 %v5355_v32 }
0x1018   :  { %5382 = vst.msk [vmem:[%s12318_s19 + $0x18] sm:$0xf] %vm5381_vm5, %v5373_v27 }
0x101d   :  { %v8465_v8 = vpop.eup %8464 }
0x101e   :  { %v5377_v16 = vpack.c.bf16 %v8465_v8, %v8465_v8 }
0x1020   :  { %5386 = vst.msk [vmem:[%s12318_s19 + $0x34] sm:$0xf] %vm5381_vm5, %v5377_v16 }

</bundles_post_ra>
